<compile_context>
chip_gen: v7x
topology: tpu7x:2x2x1
jax: 0.10.0
libtpu: 0.0.40
codegen_flags: <defaults>
</compile_context>

<pallas_src>
import functools

import jax
import jax.numpy as jnp
from jax import lax
from jax.experimental import pallas as pl
from jax.experimental.pallas import tpu as pltpu


def _round_up(x, m):
    return ((x + m - 1) // m) * m


def _pick_tile(total, step, max_tile):
    """Largest multiple of `step` that divides `total` and is <= max_tile."""
    t = min(total, max_tile)
    t = (t // step) * step
    while t > step and total % t:
        t -= step
    return max(t, step)


def _sigmoid(x):
    # sigmoid(x) == 0.5*tanh(0.5*x) + 0.5 : one EUP op instead of exp+divide.
    return 0.5 * jnp.tanh(0.5 * x) + 0.5


# ---------------------------------------------------------------------------
# Kernel
# ---------------------------------------------------------------------------
def _lstm_layer_kernel(x_ref, h0_ref, c0_ref, wih_ref, whh_ref, b_ref,
                       out_ref, hT_ref, cT_ref,
                       h_scr, c_scr, gi_scr,
                       *, ts, sub, s_valid):
    """One LSTM layer over a (time_chunk, batch_tile) block.

    Grid: (batch_tiles [parallel], time_chunks [arbitrary]).  Hidden / cell
    state are carried across time chunks in VMEM scratch.  Packed gate order
    is (i, f, o, g) so the three sigmoid gates are lane-contiguous.
    """
    tc = pl.program_id(1)
    _, TB, In = x_ref.shape
    Hp = h0_ref.shape[-1]
    nsub = -(-ts // sub)                       # static number of sub-blocks

    @pl.when(tc == 0)
    def _():
        h_scr[...] = h0_ref[...]
        c_scr[...] = c0_ref[...]

    def compute_gi(sb):
        """Hoisted input projection for sub-block sb: one big bf16 MXU matmul."""
        start = sb * sub
        ln = min(sub, ts - start)
        # (ln, TB, In) -> (ln*TB, In) is layout-preserving (TB % 8 == 0).
        x_flat = x_ref[start:start + ln].reshape(ln * TB, In)
        gi = jnp.dot(x_flat, wih_ref[...], preferred_element_type=jnp.float32)
        gi_scr[sb % 2, :ln] = (gi + b_ref[...]).reshape(ln, TB, 4 * Hp)

    # Prime the 2-deep gi buffer, then issue the NEXT sub-block's input
    # projection before running the current sub-block's recurrence so the MXU
    # work overlaps the latency-bound serial chain and gi scratch stays small.
    compute_gi(0)
    h = h_scr[...]
    c = c_scr[...]
    for sb in range(nsub):
        if sb + 1 < nsub:
            compute_gi(sb + 1)
        start = sb * sub
        ln = min(sub, ts - start)
        gi_view = gi_scr.at[sb % 2]
        out_view = out_ref.at[start:start + ln]

        def step(t, carry):
            h, c = carry
            gh = jnp.dot(h.astype(whh_ref.dtype), whh_ref[...],
                         preferred_element_type=jnp.float32)
            g = gi_view[t] + gh                       # (TB, 4*Hp), f32
            s = _sigmoid(g[:, :3 * Hp])               # contiguous i | f | o
            i_g = s[:, :Hp]
            f_g = s[:, Hp:2 * Hp]
            o_g = s[:, 2 * Hp:3 * Hp]
            c_g = jnp.tanh(g[:, 3 * Hp:])
            c_new = f_g * c + i_g * c_g
            h_new = o_g * jnp.tanh(c_new)
            if s_valid is not None:                   # masked time padding
                valid = (tc * ts + start + t) < s_valid
                c_new = jnp.where(valid, c_new, c)
                h_new = jnp.where(valid, h_new, h)
            out_view[t] = h_new.astype(out_ref.dtype)  # lane-dense (TB, Hp)
            return (h_new, c_new)

        h, c = lax.fori_loop(0, ln, step, (h, c), unroll=min(ln, 8))

    h_scr[...] = h
    c_scr[...] = c
    # hT/cT block index depends only on the batch tile, so HBM writeback
    # happens once per batch tile; writing every chunk is free and robust.
    hT_ref[...] = h.astype(hT_ref.dtype)
    cT_ref[...] = c.astype(cT_ref.dtype)


# ---------------------------------------------------------------------------
# Hardware query + VMEM-aware tile selection
# ---------------------------------------------------------------------------
def _tpu_hw_info():
    """Best-effort per-generation hardware parameters."""
    vmem_bytes = 64 * 1024 * 1024            # conservative default (v7x-sized)
    try:
        info = pltpu.get_tpu_info()
        cap = getattr(info, "vmem_capacity_bytes", None)
        if cap:
            vmem_bytes = int(cap)
    except Exception:
        pass
    kind = ""
    try:
        kind = jax.devices()[0].device_kind.lower()
    except Exception:
        pass
    is_v5e = ("v5 lite" in kind) or ("v5e" in kind) or ("v5litepod" in kind)
    tb_cap = 128 if is_v5e else 256          # MXU M rows: 128 (v5e) / 256 (v6e, v7x)
    min_batch_tiles = 2 if "v7" in kind else 1   # v7x: 2 TensorCores per chip
    return dict(vmem_bytes=vmem_bytes, tb_cap=tb_cap,
                min_batch_tiles=min_batch_tiles)


def _select_tiles(Bp, S, In_worst, Hp, *, vmem_bytes, tb_cap, min_batch_tiles):
    """Pick (TB, SUB, TS, S_pad) so everything fits ~65% of VMEM."""
    budget = int(vmem_bytes * 0.65)
    BF, F32 = 2, 4

    def usage(tb, sub, ts):
        w = (In_worst + Hp) * 4 * Hp * BF * 2          # weights (assume 2 bufs)
        w += 2 * 4 * Hp * F32                          # bias
        state = 10 * tb * Hp * F32                     # h0,c0,hT,cT (2 bufs) + scratch
        gi = 2 * sub * tb * 4 * Hp * F32               # gi double buffer
        io = 2 * ts * tb * (In_worst + Hp) * BF        # x + out blocks (2 bufs, bf16)
        return w + state + gi + io

    tb = _pick_tile(Bp, 8, min(tb_cap, Bp))
    if min_batch_tiles > 1 and Bp // tb < min_batch_tiles and Bp >= 8 * min_batch_tiles:
        tb = _pick_tile(Bp, 8, Bp // min_batch_tiles)  # keep both v7x cores busy
    while tb > 8 and usage(tb, 4, 4) > budget:
        tb = _pick_tile(Bp, 8, tb // 2)

    sub = 16
    while sub > 4 and usage(tb, sub, sub) > budget:
        sub //= 2

    ts = sub
    step = max(sub, 8)
    while ts + step <= 512 and usage(tb, sub, ts + step) <= budget:
        ts += step

    n_chunks = -(-S // ts)                    # minimise time padding
    ts = -(-S // n_chunks)
    sub = min(sub, ts)
    s_pad = n_chunks * ts
    return tb, sub, ts, s_pad, usage(tb, sub, ts)


# ---------------------------------------------------------------------------
# Parameter packing + per-layer pallas_call
# ---------------------------------------------------------------------------
def _pad_lstm_params(w_ih, w_hh, b_ih, b_hh, H, Hp, In, In_p):
    """Lane-dense, zero-padded, pre-transposed bf16 weights + f32 bias.

    PyTorch gate order (i, f, g, o) is re-packed to (i, f, o, g) so the three
    sigmoid gates occupy one contiguous lane range.  Zero padding guarantees
    padded hidden lanes of h/c stay exactly zero across time and layers.
    """
    perm = jnp.array([0, 1, 3, 2])

    w_ih = jnp.asarray(w_ih, jnp.float32).reshape(4, H, In)[perm]
    w_ih = jnp.pad(w_ih, ((0, 0), (0, Hp - H), (0, In_p - In)))
    wih_t = jnp.transpose(w_ih, (2, 0, 1)).reshape(In_p, 4 * Hp).astype(jnp.bfloat16)

    w_hh = jnp.asarray(w_hh, jnp.float32).reshape(4, H, H)[perm]
    w_hh = jnp.pad(w_hh, ((0, 0), (0, Hp - H), (0, Hp - H)))
    whh_t = jnp.transpose(w_hh, (2, 0, 1)).reshape(Hp, 4 * Hp).astype(jnp.bfloat16)

    b = jnp.asarray(b_ih, jnp.float32) + jnp.asarray(b_hh, jnp.float32)
    b = jnp.pad(b.reshape(4, H)[perm], ((0, 0), (0, Hp - H))).reshape(1, 4 * Hp)
    return wih_t, whh_t, b


def lstm_layer_pallas(x_pad, h0p, c0p, wih_t, whh_t, bias, *,
                      TB, TS, SUB, s_valid, vmem_limit):
    """One LSTM layer on padded, time-major data.

    x_pad: (S_pad, Bp, In_p) bf16; h0p/c0p: (Bp, Hp) f32 (padded lanes zero).
    Returns out_seq (S_pad, Bp, Hp) bf16, hT/cT (Bp, Hp) f32.
    """
    S_pad, Bp, In_p = x_pad.shape
    Hp = h0p.shape[-1]
    grid = (Bp // TB, S_pad // TS)
    kernel = functools.partial(_lstm_layer_kernel, ts=TS, sub=SUB, s_valid=s_valid)

    def build(single_buffer_consts):
        ckw = dict(pipeline_mode=pl.Buffered(1)) if single_buffer_consts else {}
        return pl.pallas_call(
            kernel,
            out_shape=(
                jax.ShapeDtypeStruct((S_pad, Bp, Hp), jnp.bfloat16),
                jax.ShapeDtypeStruct((Bp, Hp), jnp.float32),
                jax.ShapeDtypeStruct((Bp, Hp), jnp.float32),
            ),
            grid_spec=pltpu.PrefetchScalarGridSpec(
                num_scalar_prefetch=0,
                grid=grid,
                in_specs=[
                    pl.BlockSpec((TS, TB, In_p), lambda b, t: (t, b, 0)),     # x chunk
                    pl.BlockSpec((TB, Hp), lambda b, t: (b, 0)),              # h0
                    pl.BlockSpec((TB, Hp), lambda b, t: (b, 0)),              # c0
                    pl.BlockSpec((In_p, 4 * Hp), lambda b, t: (0, 0), **ckw),  # W_ih^T
                    pl.BlockSpec((Hp, 4 * Hp), lambda b, t: (0, 0), **ckw),    # W_hh^T
                    pl.BlockSpec((1, 4 * Hp), lambda b, t: (0, 0), **ckw),     # bias
                ],
                out_specs=[
                    pl.BlockSpec((TS, TB, Hp), lambda b, t: (t, b, 0)),       # out_seq
                    pl.BlockSpec((TB, Hp), lambda b, t: (b, 0)),              # h_T
                    pl.BlockSpec((TB, Hp), lambda b, t: (b, 0)),              # c_T
                ],
                scratch_shapes=[
                    pltpu.VMEM((TB, Hp), jnp.float32),               # h carry
                    pltpu.VMEM((TB, Hp), jnp.float32),               # c carry
                    pltpu.VMEM((2, SUB, TB, 4 * Hp), jnp.float32),   # gi double buf
                ],
            ),
            compiler_params=pltpu.CompilerParams(
                dimension_semantics=("parallel", "arbitrary"),
                vmem_limit_bytes=vmem_limit,
            ),
        )

    try:
        return build(True)(x_pad, h0p, c0p, wih_t, whh_t, bias)
    except Exception:
        # pipeline_mode=pl.Buffered(1) unsupported on this jax build: fall back
        # to default double-buffered constant inputs (costs VMEM only).
        return build(False)(x_pad, h0p, c0p, wih_t, whh_t, bias)


# ---------------------------------------------------------------------------
# Module-level forward (equivalent of LSTM.forward, batched input)
# ---------------------------------------------------------------------------
def lstm_forward(x, states, params, *, batch_first=True):
    """Equivalent of LSTM.forward for batched input.

    Args:
      x:      (B, S, F) if batch_first else (S, B, F)
      states: tuple (h0, c0), each (num_layers, B, H) (or (B, H) if 1 layer)
      params: list of per-layer dicts with 'w_ih', 'w_hh', 'b_ih', 'b_hh'
              (PyTorch LSTM gate order i, f, g, o).
    Returns:
      (output, (hstates, cstates)) matching the PyTorch module's shapes.
    """
    num_layers = len(params)
    h0_all, c0_all = states
    x_tm = jnp.transpose(x, (1, 0, 2)) if batch_first else x
    S, B, F = x_tm.shape
    H = (h0_all[0] if num_layers > 1 else h0_all).shape[-1]

    Bp = _round_up(B, 8)
    Fp = _round_up(F, 128)          # lane-dense first-layer feature dim
    Hp = _round_up(H, 128)

    hw = _tpu_hw_info()
    TB, SUB, TS, S_pad, est = _select_tiles(
        Bp, S, max(Fp, Hp), Hp,
        vmem_bytes=hw["vmem_bytes"], tb_cap=hw["tb_cap"],
        min_batch_tiles=hw["min_batch_tiles"])
    vmem_limit = int(min(0.9 * hw["vmem_bytes"], max(2 * est, 32 * 2 ** 20)))
    s_valid = S if S_pad != S else None

    # Pad batch/feature/time once; later layers consume the previous layer's
    # padded bf16 output directly (padded lanes/rows stay exactly zero).
    layer_in = jnp.zeros((S_pad, Bp, Fp), jnp.bfloat16).at[:S, :B, :F].set(
        jnp.asarray(x_tm, jnp.bfloat16))

    out_h, out_c = [], []
    for i, p in enumerate(params):
        h0 = h0_all[i] if num_layers > 1 else h0_all
        c0 = c0_all[i] if num_layers > 1 else c0_all
        Hl = h0.shape[-1]
        In = p["w_ih"].shape[1]
        In_p = layer_in.shape[-1]
        wih_t, whh_t, bias = _pad_lstm_params(
            p["w_ih"], p["w_hh"], p["b_ih"], p["b_hh"], Hl, Hp, In, In_p)
        h0p = jnp.zeros((Bp, Hp), jnp.float32).at[:B, :Hl].set(
            jnp.asarray(h0, jnp.float32))
        c0p = jnp.zeros((Bp, Hp), jnp.float32).at[:B, :Hl].set(
            jnp.asarray(c0, jnp.float32))

        out_pad, hT, cT = lstm_layer_pallas(
            layer_in, h0p, c0p, wih_t, whh_t, bias,
            TB=TB, TS=TS, SUB=SUB, s_valid=s_valid, vmem_limit=vmem_limit)
        # TODO(synk): inter-layer dropout (self.dropout_layer) not implemented;
        # default dropout=0.0 so semantics match.
        layer_in = out_pad
        out_h.append(hT[:B, :Hl])
        out_c.append(cT[:B, :Hl])

    out = layer_in[:S, :B, :H].astype(jnp.float32)
    output = jnp.transpose(out, (1, 0, 2)) if batch_first else out
    hstates = jnp.stack(out_h) if num_layers > 1 else out_h[0]
    cstates = jnp.stack(out_c) if num_layers > 1 else out_c[0]
    return output, (hstates, cstates)


# ---------------------------------------------------------------------------
# Pure-JAX reference (f32, lax.scan) for correctness checking
# ---------------------------------------------------------------------------
def _lstm_layer_ref(x_seq, h0, c0, w_ih, w_hh, b_ih, b_hh):
    H = h0.shape[-1]
    prec = lax.Precision.HIGHEST

    def step(carry, x_t):
        h, c = carry
        g = (jnp.dot(x_t, w_ih.T, precision=prec) + b_ih
             + jnp.dot(h, w_hh.T, precision=prec) + b_hh)
        i = jax.nn.sigmoid(g[:, :H])
        f = jax.nn.sigmoid(g[:, H:2 * H])
        gg = jnp.tanh(g[:, 2 * H:3 * H])
        o = jax.nn.sigmoid(g[:, 3 * H:])
        c_new = f * c + i * gg
        h_new = o * jnp.tanh(c_new)
        return (h_new, c_new), h_new

    (hT, cT), out = lax.scan(step, (h0, c0), x_seq)
    return out, hT, cT


if __name__ == "__main__":
    batch, seq, input_size, hidden_size, num_layers = 2, 8, 16, 32, 2

    key = jax.random.PRNGKey(0)
    keys = jax.random.split(key, 3 + 4 * num_layers)

    x = jax.random.normal(keys[0], (batch, seq, input_size), dtype=jnp.float32)
    h0_all = jax.random.normal(keys[1], (num_layers, batch, hidden_size),
                               dtype=jnp.float32)
    c0_all = jax.random.normal(keys[2], (num_layers, batch, hidden_size),
                               dtype=jnp.float32)

    params = []
    kidx = 3
    for layer in range(num_layers):
        in_sz = input_size if layer == 0 else hidden_size
        scale = 1.0 / jnp.sqrt(jnp.float32(hidden_size))
        params.append({
            "w_ih": scale * jax.random.normal(
                keys[kidx + 0], (4 * hidden_size, in_sz), jnp.float32),
            "w_hh": scale * jax.random.normal(
                keys[kidx + 1], (4 * hidden_size, hidden_size), jnp.float32),
            "b_ih": scale * jax.random.normal(
                keys[kidx + 2], (4 * hidden_size,), jnp.float32),
            "b_hh": scale * jax.random.normal(
                keys[kidx + 3], (4 * hidden_size,), jnp.float32),
        })
        kidx += 4

    output, (hstates, cstates) = lstm_forward(
        x, (h0_all, c0_all), params, batch_first=True)
    output = jax.block_until_ready(output)
    hstates = jax.block_until_ready(hstates)
    cstates = jax.block_until_ready(cstates)

    # Pure-JAX f32 reference check (kernel matmuls run in bf16 so tolerance
    # is relaxed accordingly; gate/state math in the kernel stays f32).
    x_tm = jnp.transpose(x, (1, 0, 2))
    ref_in = x_tm
    ref_h, ref_c = [], []
    for i, p in enumerate(params):
        ref_in, hf, cf = _lstm_layer_ref(ref_in, h0_all[i], c0_all[i],
                                         p["w_ih"], p["w_hh"],
                                         p["b_ih"], p["b_hh"])
        ref_h.append(hf)
        ref_c.append(cf)
    ref_out = jnp.transpose(ref_in, (1, 0, 2))
    ref_hstates = jnp.stack(ref_h)
    ref_cstates = jnp.stack(ref_c)

    assert output.shape == (batch, seq, hidden_size)
    assert hstates.shape == (num_layers, batch, hidden_size)
    assert cstates.shape == (num_layers, batch, hidden_size)
    assert jnp.allclose(output, ref_out, atol=5e-2, rtol=5e-2)
    assert jnp.allclose(hstates, ref_hstates, atol=5e-2, rtol=5e-2)
    assert jnp.allclose(cstates, ref_cstates, atol=5e-2, rtol=5e-2)

    print("KERNEL_OK")
</pallas_src>

<mosaic_0001>
module attributes {stable_mosaic.version = 11 : i64} {
  func.func @_lstm_layer_kernel(%arg0: i32, %arg1: i32, %arg2: memref<8x8x128xbf16, #tpu.memory_space<vmem>>, %arg3: memref<8x128xf32, #tpu.memory_space<vmem>>, %arg4: memref<8x128xf32, #tpu.memory_space<vmem>>, %arg5: memref<128x512xbf16, #tpu.memory_space<vmem>>, %arg6: memref<128x512xbf16, #tpu.memory_space<vmem>>, %arg7: memref<1x512xf32, #tpu.memory_space<vmem>>, %arg8: memref<8x8x128xbf16, #tpu.memory_space<vmem>>, %arg9: memref<8x128xf32, #tpu.memory_space<vmem>>, %arg10: memref<8x128xf32, #tpu.memory_space<vmem>>, %arg11: memref<8x128xf32, #tpu.memory_space<vmem>>, %arg12: memref<8x128xf32, #tpu.memory_space<vmem>>, %arg13: memref<2x8x8x512xf32, #tpu.memory_space<vmem>>) attributes {dimension_semantics = [#tpu.dimension_semantics<parallel>, #tpu.dimension_semantics<arbitrary>], iteration_bounds = array<i64: 1, 1>, scalar_prefetch = 0 : i64, scratch_operands = 3 : i64, tpu.core_type = #tpu.core_type<tc>, window_params = [{transform_indices = @transform_0, window_bounds = array<i64: 8, 8, 128>}, {transform_indices = @transform_1, window_bounds = array<i64: 8, 128>}, {transform_indices = @transform_2, window_bounds = array<i64: 8, 128>}, {pipeline_mode = #tpu.pipeline_mode<synchronous>, transform_indices = @transform_3, window_bounds = array<i64: 128, 512>}, {pipeline_mode = #tpu.pipeline_mode<synchronous>, transform_indices = @transform_4, window_bounds = array<i64: 128, 512>}, {pipeline_mode = #tpu.pipeline_mode<synchronous>, transform_indices = @transform_5, window_bounds = array<i64: 1, 512>}, {transform_indices = @transform_6, window_bounds = array<i64: 8, 8, 128>}, {transform_indices = @transform_7, window_bounds = array<i64: 8, 128>}, {transform_indices = @transform_8, window_bounds = array<i64: 8, 128>}]} {
    %c0_i32 = arith.constant 0 : i32
    %0 = arith.cmpi eq, %arg1, %c0_i32 : i32
    %1 = arith.extui %0 : i1 to i32
    %c0_i32_0 = arith.constant 0 : i32
    %2 = arith.cmpi ne, %1, %c0_i32_0 : i32
    scf.if %2 {
      %c0_153 = arith.constant 0 : index
      %c0_154 = arith.constant 0 : index
      %284 = vector.load %arg3[%c0_153, %c0_154] : memref<8x128xf32, #tpu.memory_space<vmem>>, vector<8x128xf32>
      %c0_155 = arith.constant 0 : index
      %c0_156 = arith.constant 0 : index
      %285 = vector.load %arg11[%c0_155, %c0_156] : memref<8x128xf32, #tpu.memory_space<vmem>>, vector<8x128xf32>
      tpu.vector_store %arg11[%c0_155, %c0_156], %284 {strides = array<i32>} : memref<8x128xf32, #tpu.memory_space<vmem>>, vector<8x128xf32>,
      %c0_157 = arith.constant 0 : index
      %c0_158 = arith.constant 0 : index
      %286 = vector.load %arg4[%c0_157, %c0_158] : memref<8x128xf32, #tpu.memory_space<vmem>>, vector<8x128xf32>
      %c0_159 = arith.constant 0 : index
      %c0_160 = arith.constant 0 : index
      %287 = vector.load %arg12[%c0_159, %c0_160] : memref<8x128xf32, #tpu.memory_space<vmem>>, vector<8x128xf32>
      tpu.vector_store %arg12[%c0_159, %c0_160], %286 {strides = array<i32>} : memref<8x128xf32, #tpu.memory_space<vmem>>, vector<8x128xf32>,
    } else {
    }
    %c0 = arith.constant 0 : index
    %c0_1 = arith.constant 0 : index
    %c0_2 = arith.constant 0 : index
    %3 = vector.load %arg2[%c0, %c0_1, %c0_2] : memref<8x8x128xbf16, #tpu.memory_space<vmem>>, vector<8x8x128xbf16>
    %4 = vector.shape_cast %3 : vector<8x8x128xbf16> to vector<64x128xbf16>
    %c0_3 = arith.constant 0 : index
    %c0_4 = arith.constant 0 : index
    %5 = vector.load %arg5[%c0_3, %c0_4] : memref<128x512xbf16, #tpu.memory_space<vmem>>, vector<128x512xbf16>
    %cst = arith.constant dense<0.000000e+00> : vector<64x512xf32>
    %6 = tpu.matmul %4, %5, %cst {dimension_numbers = #tpu.dot_dimension_numbers<[1], [0], [0], [1], [0, 0, 1, 1], [], []>} : vector<64x128xbf16>, vector<128x512xbf16>, vector<64x512xf32> -> vector<64x512xf32>
    %c0_5 = arith.constant 0 : index
    %c0_6 = arith.constant 0 : index
    %7 = vector.load %arg7[%c0_5, %c0_6] : memref<1x512xf32, #tpu.memory_space<vmem>>, vector<1x512xf32>
    %8 = vector.broadcast %7 : vector<1x512xf32> to vector<64x512xf32>
    %9 = arith.addf %6, %8 : vector<64x512xf32>
    %10 = vector.shape_cast %9 : vector<64x512xf32> to vector<8x8x512xf32>
    %c0_7 = arith.constant 0 : index
    %c0_8 = arith.constant 0 : index
    %c0_9 = arith.constant 0 : index
    %c0_10 = arith.constant 0 : index
    %11 = vector.load %arg13[%c0_7, %c0_8, %c0_9, %c0_10] : memref<2x8x8x512xf32, #tpu.memory_space<vmem>>, vector<1x8x8x512xf32>
    %12 = vector.shape_cast %11 : vector<1x8x8x512xf32> to vector<8x8x512xf32>
    %13 = vector.shape_cast %10 : vector<8x8x512xf32> to vector<1x8x8x512xf32>
    tpu.vector_store %arg13[%c0_7, %c0_8, %c0_9, %c0_10], %13 {strides = array<i32>} : memref<2x8x8x512xf32, #tpu.memory_space<vmem>>, vector<1x8x8x512xf32>,
    %c0_11 = arith.constant 0 : index
    %c0_12 = arith.constant 0 : index
    %14 = vector.load %arg11[%c0_11, %c0_12] : memref<8x128xf32, #tpu.memory_space<vmem>>, vector<8x128xf32>
    %c0_13 = arith.constant 0 : index
    %c0_14 = arith.constant 0 : index
    %15 = vector.load %arg12[%c0_13, %c0_14] : memref<8x128xf32, #tpu.memory_space<vmem>>, vector<8x128xf32>
    %c0_i32_15 = arith.constant 0 : i32
    %c0_i32_16 = arith.constant 0 : i32
    %16 = arith.truncf %14 : vector<8x128xf32> to vector<8x128xbf16>
    %c0_17 = arith.constant 0 : index
    %c0_18 = arith.constant 0 : index
    %17 = vector.load %arg6[%c0_17, %c0_18] : memref<128x512xbf16, #tpu.memory_space<vmem>>, vector<128x512xbf16>
    %cst_19 = arith.constant dense<0.000000e+00> : vector<8x512xf32>
    %18 = tpu.matmul %16, %17, %cst_19 {dimension_numbers = #tpu.dot_dimension_numbers<[1], [0], [0], [1], [0, 0, 1, 1], [], []>} : vector<8x128xbf16>, vector<128x512xbf16>, vector<8x512xf32> -> vector<8x512xf32>
    %c0_i32_20 = arith.constant 0 : i32
    %c0_i32_21 = arith.constant 0 : i32
    %c0_i32_22 = arith.constant 0 : i32
    %19 = tpu.memref_slice %arg13[%c0_i32_15, %c0_i32_20, %c0_i32_21, %c0_i32_22] : memref<2x8x8x512xf32, #tpu.memory_space<vmem>> -> memref<1x8x8x512xf32, #tpu.memory_space<vmem>>
    %20 = tpu.memref_squeeze %19 : memref<1x8x8x512xf32, #tpu.memory_space<vmem>> -> memref<8x8x512xf32, #tpu.memory_space<vmem>>
    %21 = arith.index_cast %c0_i32_16 : i32 to index
    %c0_23 = arith.constant 0 : index
    %c0_24 = arith.constant 0 : index
    %22 = vector.load %20[%21, %c0_23, %c0_24] : memref<8x8x512xf32, #tpu.memory_space<vmem>>, vector<1x8x512xf32>
    %23 = vector.shape_cast %22 : vector<1x8x512xf32> to vector<8x512xf32>
    %24 = arith.addf %23, %18 : vector<8x512xf32>
    %25 = vector.extract_strided_slice %24 {offsets = [0, 0], sizes = [8, 384], strides = [1, 1]} : vector<8x512xf32> to vector<8x384xf32>
    %cst_25 = arith.constant 5.000000e-01 : f32
    %26 = vector.broadcast %cst_25 : f32 to vector<8x384xf32>
    %27 = arith.mulf %26, %25 : vector<8x384xf32>
    %28 = math.tanh %27 : vector<8x384xf32>
    %cst_26 = arith.constant 5.000000e-01 : f32
    %29 = vector.broadcast %cst_26 : f32 to vector<8x384xf32>
    %30 = arith.mulf %29, %28 : vector<8x384xf32>
    %cst_27 = arith.constant 5.000000e-01 : f32
    %31 = vector.broadcast %cst_27 : f32 to vector<8x384xf32>
    %32 = arith.addf %30, %31 : vector<8x384xf32>
    %33 = vector.extract_strided_slice %32 {offsets = [0, 0], sizes = [8, 128], strides = [1, 1]} : vector<8x384xf32> to vector<8x128xf32>
    %34 = vector.extract_strided_slice %32 {offsets = [0, 128], sizes = [8, 128], strides = [1, 1]} : vector<8x384xf32> to vector<8x128xf32>
    %35 = vector.extract_strided_slice %32 {offsets = [0, 256], sizes = [8, 128], strides = [1, 1]} : vector<8x384xf32> to vector<8x128xf32>
    %36 = vector.extract_strided_slice %24 {offsets = [0, 384], sizes = [8, 128], strides = [1, 1]} : vector<8x512xf32> to vector<8x128xf32>
    %37 = math.tanh %36 : vector<8x128xf32>
    %38 = arith.mulf %34, %15 : vector<8x128xf32>
    %39 = arith.mulf %33, %37 : vector<8x128xf32>
    %40 = arith.addf %38, %39 : vector<8x128xf32>
    %41 = math.tanh %40 : vector<8x128xf32>
    %42 = arith.mulf %35, %41 : vector<8x128xf32>
    %43 = arith.truncf %42 : vector<8x128xf32> to vector<8x128xbf16>
    %c0_i32_28 = arith.constant 0 : i32
    %c0_i32_29 = arith.constant 0 : i32
    %c0_i32_30 = arith.constant 0 : i32
    %44 = tpu.memref_slice %arg8[%c0_i32_28, %c0_i32_29, %c0_i32_30] : memref<8x8x128xbf16, #tpu.memory_space<vmem>> -> memref<8x8x128xbf16, #tpu.memory_space<vmem>>
    %45 = arith.index_cast %c0_i32_16 : i32 to index
    %c0_31 = arith.constant 0 : index
    %c0_32 = arith.constant 0 : index
    %46 = vector.load %44[%45, %c0_31, %c0_32] : memref<8x8x128xbf16, #tpu.memory_space<vmem>>, vector<1x8x128xbf16>
    %47 = vector.shape_cast %46 : vector<1x8x128xbf16> to vector<8x128xbf16>
    %48 = vector.shape_cast %43 : vector<8x128xbf16> to vector<1x8x128xbf16>
    tpu.vector_store %44[%45, %c0_31, %c0_32], %48 {strides = array<i32>} : memref<8x8x128xbf16, #tpu.memory_space<vmem>>, vector<1x8x128xbf16>,
    %c1_i32 = arith.constant 1 : i32
    %49 = arith.truncf %42 : vector<8x128xf32> to vector<8x128xbf16>
    %c0_33 = arith.constant 0 : index
    %c0_34 = arith.constant 0 : index
    %50 = vector.load %arg6[%c0_33, %c0_34] : memref<128x512xbf16, #tpu.memory_space<vmem>>, vector<128x512xbf16>
    %cst_35 = arith.constant dense<0.000000e+00> : vector<8x512xf32>
    %51 = tpu.matmul %49, %50, %cst_35 {dimension_numbers = #tpu.dot_dimension_numbers<[1], [0], [0], [1], [0, 0, 1, 1], [], []>} : vector<8x128xbf16>, vector<128x512xbf16>, vector<8x512xf32> -> vector<8x512xf32>
    %c0_i32_36 = arith.constant 0 : i32
    %c0_i32_37 = arith.constant 0 : i32
    %c0_i32_38 = arith.constant 0 : i32
    %52 = tpu.memref_slice %arg13[%c0_i32_15, %c0_i32_36, %c0_i32_37, %c0_i32_38] : memref<2x8x8x512xf32, #tpu.memory_space<vmem>> -> memref<1x8x8x512xf32, #tpu.memory_space<vmem>>
    %53 = tpu.memref_squeeze %52 : memref<1x8x8x512xf32, #tpu.memory_space<vmem>> -> memref<8x8x512xf32, #tpu.memory_space<vmem>>
    %54 = arith.index_cast %c1_i32 : i32 to index
    %c0_39 = arith.constant 0 : index
    %c0_40 = arith.constant 0 : index
    %55 = vector.load %53[%54, %c0_39, %c0_40] : memref<8x8x512xf32, #tpu.memory_space<vmem>>, vector<1x8x512xf32>
    %56 = vector.shape_cast %55 : vector<1x8x512xf32> to vector<8x512xf32>
    %57 = arith.addf %56, %51 : vector<8x512xf32>
    %58 = vector.extract_strided_slice %57 {offsets = [0, 0], sizes = [8, 384], strides = [1, 1]} : vector<8x512xf32> to vector<8x384xf32>
    %cst_41 = arith.constant 5.000000e-01 : f32
    %59 = vector.broadcast %cst_41 : f32 to vector<8x384xf32>
    %60 = arith.mulf %59, %58 : vector<8x384xf32>
    %61 = math.tanh %60 : vector<8x384xf32>
    %cst_42 = arith.constant 5.000000e-01 : f32
    %62 = vector.broadcast %cst_42 : f32 to vector<8x384xf32>
    %63 = arith.mulf %62, %61 : vector<8x384xf32>
    %cst_43 = arith.constant 5.000000e-01 : f32
    %64 = vector.broadcast %cst_43 : f32 to vector<8x384xf32>
    %65 = arith.addf %63, %64 : vector<8x384xf32>
    %66 = vector.extract_strided_slice %65 {offsets = [0, 0], sizes = [8, 128], strides = [1, 1]} : vector<8x384xf32> to vector<8x128xf32>
    %67 = vector.extract_strided_slice %65 {offsets = [0, 128], sizes = [8, 128], strides = [1, 1]} : vector<8x384xf32> to vector<8x128xf32>
    %68 = vector.extract_strided_slice %65 {offsets = [0, 256], sizes = [8, 128], strides = [1, 1]} : vector<8x384xf32> to vector<8x128xf32>
    %69 = vector.extract_strided_slice %57 {offsets = [0, 384], sizes = [8, 128], strides = [1, 1]} : vector<8x512xf32> to vector<8x128xf32>
    %70 = math.tanh %69 : vector<8x128xf32>
    %71 = arith.mulf %67, %40 : vector<8x128xf32>
    %72 = arith.mulf %66, %70 : vector<8x128xf32>
    %73 = arith.addf %71, %72 : vector<8x128xf32>
    %74 = math.tanh %73 : vector<8x128xf32>
    %75 = arith.mulf %68, %74 : vector<8x128xf32>
    %76 = arith.truncf %75 : vector<8x128xf32> to vector<8x128xbf16>
    %c0_i32_44 = arith.constant 0 : i32
    %c0_i32_45 = arith.constant 0 : i32
    %c0_i32_46 = arith.constant 0 : i32
    %77 = tpu.memref_slice %arg8[%c0_i32_44, %c0_i32_45, %c0_i32_46] : memref<8x8x128xbf16, #tpu.memory_space<vmem>> -> memref<8x8x128xbf16, #tpu.memory_space<vmem>>
    %78 = arith.index_cast %c1_i32 : i32 to index
    %c0_47 = arith.constant 0 : index
    %c0_48 = arith.constant 0 : index
    %79 = vector.load %77[%78, %c0_47, %c0_48] : memref<8x8x128xbf16, #tpu.memory_space<vmem>>, vector<1x8x128xbf16>
    %80 = vector.shape_cast %79 : vector<1x8x128xbf16> to vector<8x128xbf16>
    %81 = vector.shape_cast %76 : vector<8x128xbf16> to vector<1x8x128xbf16>
    tpu.vector_store %77[%78, %c0_47, %c0_48], %81 {strides = array<i32>} : memref<8x8x128xbf16, #tpu.memory_space<vmem>>, vector<1x8x128xbf16>,
    %c2_i32 = arith.constant 2 : i32
    %82 = arith.truncf %75 : vector<8x128xf32> to vector<8x128xbf16>
    %c0_49 = arith.constant 0 : index
    %c0_50 = arith.constant 0 : index
    %83 = vector.load %arg6[%c0_49, %c0_50] : memref<128x512xbf16, #tpu.memory_space<vmem>>, vector<128x512xbf16>
    %cst_51 = arith.constant dense<0.000000e+00> : vector<8x512xf32>
    %84 = tpu.matmul %82, %83, %cst_51 {dimension_numbers = #tpu.dot_dimension_numbers<[1], [0], [0], [1], [0, 0, 1, 1], [], []>} : vector<8x128xbf16>, vector<128x512xbf16>, vector<8x512xf32> -> vector<8x512xf32>
    %c0_i32_52 = arith.constant 0 : i32
    %c0_i32_53 = arith.constant 0 : i32
    %c0_i32_54 = arith.constant 0 : i32
    %85 = tpu.memref_slice %arg13[%c0_i32_15, %c0_i32_52, %c0_i32_53, %c0_i32_54] : memref<2x8x8x512xf32, #tpu.memory_space<vmem>> -> memref<1x8x8x512xf32, #tpu.memory_space<vmem>>
    %86 = tpu.memref_squeeze %85 : memref<1x8x8x512xf32, #tpu.memory_space<vmem>> -> memref<8x8x512xf32, #tpu.memory_space<vmem>>
    %87 = arith.index_cast %c2_i32 : i32 to index
    %c0_55 = arith.constant 0 : index
    %c0_56 = arith.constant 0 : index
    %88 = vector.load %86[%87, %c0_55, %c0_56] : memref<8x8x512xf32, #tpu.memory_space<vmem>>, vector<1x8x512xf32>
    %89 = vector.shape_cast %88 : vector<1x8x512xf32> to vector<8x512xf32>
    %90 = arith.addf %89, %84 : vector<8x512xf32>
    %91 = vector.extract_strided_slice %90 {offsets = [0, 0], sizes = [8, 384], strides = [1, 1]} : vector<8x512xf32> to vector<8x384xf32>
    %cst_57 = arith.constant 5.000000e-01 : f32
    %92 = vector.broadcast %cst_57 : f32 to vector<8x384xf32>
    %93 = arith.mulf %92, %91 : vector<8x384xf32>
    %94 = math.tanh %93 : vector<8x384xf32>
    %cst_58 = arith.constant 5.000000e-01 : f32
    %95 = vector.broadcast %cst_58 : f32 to vector<8x384xf32>
    %96 = arith.mulf %95, %94 : vector<8x384xf32>
    %cst_59 = arith.constant 5.000000e-01 : f32
    %97 = vector.broadcast %cst_59 : f32 to vector<8x384xf32>
    %98 = arith.addf %96, %97 : vector<8x384xf32>
    %99 = vector.extract_strided_slice %98 {offsets = [0, 0], sizes = [8, 128], strides = [1, 1]} : vector<8x384xf32> to vector<8x128xf32>
    %100 = vector.extract_strided_slice %98 {offsets = [0, 128], sizes = [8, 128], strides = [1, 1]} : vector<8x384xf32> to vector<8x128xf32>
    %101 = vector.extract_strided_slice %98 {offsets = [0, 256], sizes = [8, 128], strides = [1, 1]} : vector<8x384xf32> to vector<8x128xf32>
    %102 = vector.extract_strided_slice %90 {offsets = [0, 384], sizes = [8, 128], strides = [1, 1]} : vector<8x512xf32> to vector<8x128xf32>
    %103 = math.tanh %102 : vector<8x128xf32>
    %104 = arith.mulf %100, %73 : vector<8x128xf32>
    %105 = arith.mulf %99, %103 : vector<8x128xf32>
    %106 = arith.addf %104, %105 : vector<8x128xf32>
    %107 = math.tanh %106 : vector<8x128xf32>
    %108 = arith.mulf %101, %107 : vector<8x128xf32>
    %109 = arith.truncf %108 : vector<8x128xf32> to vector<8x128xbf16>
    %c0_i32_60 = arith.constant 0 : i32
    %c0_i32_61 = arith.constant 0 : i32
    %c0_i32_62 = arith.constant 0 : i32
    %110 = tpu.memref_slice %arg8[%c0_i32_60, %c0_i32_61, %c0_i32_62] : memref<8x8x128xbf16, #tpu.memory_space<vmem>> -> memref<8x8x128xbf16, #tpu.memory_space<vmem>>
    %111 = arith.index_cast %c2_i32 : i32 to index
    %c0_63 = arith.constant 0 : index
    %c0_64 = arith.constant 0 : index
    %112 = vector.load %110[%111, %c0_63, %c0_64] : memref<8x8x128xbf16, #tpu.memory_space<vmem>>, vector<1x8x128xbf16>
    %113 = vector.shape_cast %112 : vector<1x8x128xbf16> to vector<8x128xbf16>
    %114 = vector.shape_cast %109 : vector<8x128xbf16> to vector<1x8x128xbf16>
    tpu.vector_store %110[%111, %c0_63, %c0_64], %114 {strides = array<i32>} : memref<8x8x128xbf16, #tpu.memory_space<vmem>>, vector<1x8x128xbf16>,
    %c3_i32 = arith.constant 3 : i32
    %115 = arith.truncf %108 : vector<8x128xf32> to vector<8x128xbf16>
    %c0_65 = arith.constant 0 : index
    %c0_66 = arith.constant 0 : index
    %116 = vector.load %arg6[%c0_65, %c0_66] : memref<128x512xbf16, #tpu.memory_space<vmem>>, vector<128x512xbf16>
    %cst_67 = arith.constant dense<0.000000e+00> : vector<8x512xf32>
    %117 = tpu.matmul %115, %116, %cst_67 {dimension_numbers = #tpu.dot_dimension_numbers<[1], [0], [0], [1], [0, 0, 1, 1], [], []>} : vector<8x128xbf16>, vector<128x512xbf16>, vector<8x512xf32> -> vector<8x512xf32>
    %c0_i32_68 = arith.constant 0 : i32
    %c0_i32_69 = arith.constant 0 : i32
    %c0_i32_70 = arith.constant 0 : i32
    %118 = tpu.memref_slice %arg13[%c0_i32_15, %c0_i32_68, %c0_i32_69, %c0_i32_70] : memref<2x8x8x512xf32, #tpu.memory_space<vmem>> -> memref<1x8x8x512xf32, #tpu.memory_space<vmem>>
    %119 = tpu.memref_squeeze %118 : memref<1x8x8x512xf32, #tpu.memory_space<vmem>> -> memref<8x8x512xf32, #tpu.memory_space<vmem>>
    %120 = arith.index_cast %c3_i32 : i32 to index
    %c0_71 = arith.constant 0 : index
    %c0_72 = arith.constant 0 : index
    %121 = vector.load %119[%120, %c0_71, %c0_72] : memref<8x8x512xf32, #tpu.memory_space<vmem>>, vector<1x8x512xf32>
    %122 = vector.shape_cast %121 : vector<1x8x512xf32> to vector<8x512xf32>
    %123 = arith.addf %122, %117 : vector<8x512xf32>
    %124 = vector.extract_strided_slice %123 {offsets = [0, 0], sizes = [8, 384], strides = [1, 1]} : vector<8x512xf32> to vector<8x384xf32>
    %cst_73 = arith.constant 5.000000e-01 : f32
    %125 = vector.broadcast %cst_73 : f32 to vector<8x384xf32>
    %126 = arith.mulf %125, %124 : vector<8x384xf32>
    %127 = math.tanh %126 : vector<8x384xf32>
    %cst_74 = arith.constant 5.000000e-01 : f32
    %128 = vector.broadcast %cst_74 : f32 to vector<8x384xf32>
    %129 = arith.mulf %128, %127 : vector<8x384xf32>
    %cst_75 = arith.constant 5.000000e-01 : f32
    %130 = vector.broadcast %cst_75 : f32 to vector<8x384xf32>
    %131 = arith.addf %129, %130 : vector<8x384xf32>
    %132 = vector.extract_strided_slice %131 {offsets = [0, 0], sizes = [8, 128], strides = [1, 1]} : vector<8x384xf32> to vector<8x128xf32>
    %133 = vector.extract_strided_slice %131 {offsets = [0, 128], sizes = [8, 128], strides = [1, 1]} : vector<8x384xf32> to vector<8x128xf32>
    %134 = vector.extract_strided_slice %131 {offsets = [0, 256], sizes = [8, 128], strides = [1, 1]} : vector<8x384xf32> to vector<8x128xf32>
    %135 = vector.extract_strided_slice %123 {offsets = [0, 384], sizes = [8, 128], strides = [1, 1]} : vector<8x512xf32> to vector<8x128xf32>
    %136 = math.tanh %135 : vector<8x128xf32>
    %137 = arith.mulf %133, %106 : vector<8x128xf32>
    %138 = arith.mulf %132, %136 : vector<8x128xf32>
    %139 = arith.addf %137, %138 : vector<8x128xf32>
    %140 = math.tanh %139 : vector<8x128xf32>
    %141 = arith.mulf %134, %140 : vector<8x128xf32>
    %142 = arith.truncf %141 : vector<8x128xf32> to vector<8x128xbf16>
    %c0_i32_76 = arith.constant 0 : i32
    %c0_i32_77 = arith.constant 0 : i32
    %c0_i32_78 = arith.constant 0 : i32
    %143 = tpu.memref_slice %arg8[%c0_i32_76, %c0_i32_77, %c0_i32_78] : memref<8x8x128xbf16, #tpu.memory_space<vmem>> -> memref<8x8x128xbf16, #tpu.memory_space<vmem>>
    %144 = arith.index_cast %c3_i32 : i32 to index
    %c0_79 = arith.constant 0 : index
    %c0_80 = arith.constant 0 : index
    %145 = vector.load %143[%144, %c0_79, %c0_80] : memref<8x8x128xbf16, #tpu.memory_space<vmem>>, vector<1x8x128xbf16>
    %146 = vector.shape_cast %145 : vector<1x8x128xbf16> to vector<8x128xbf16>
    %147 = vector.shape_cast %142 : vector<8x128xbf16> to vector<1x8x128xbf16>
    tpu.vector_store %143[%144, %c0_79, %c0_80], %147 {strides = array<i32>} : memref<8x8x128xbf16, #tpu.memory_space<vmem>>, vector<1x8x128xbf16>,
    %c4_i32 = arith.constant 4 : i32
    %148 = arith.truncf %141 : vector<8x128xf32> to vector<8x128xbf16>
    %c0_81 = arith.constant 0 : index
    %c0_82 = arith.constant 0 : index
    %149 = vector.load %arg6[%c0_81, %c0_82] : memref<128x512xbf16, #tpu.memory_space<vmem>>, vector<128x512xbf16>
    %cst_83 = arith.constant dense<0.000000e+00> : vector<8x512xf32>
    %150 = tpu.matmul %148, %149, %cst_83 {dimension_numbers = #tpu.dot_dimension_numbers<[1], [0], [0], [1], [0, 0, 1, 1], [], []>} : vector<8x128xbf16>, vector<128x512xbf16>, vector<8x512xf32> -> vector<8x512xf32>
    %c0_i32_84 = arith.constant 0 : i32
    %c0_i32_85 = arith.constant 0 : i32
    %c0_i32_86 = arith.constant 0 : i32
    %151 = tpu.memref_slice %arg13[%c0_i32_15, %c0_i32_84, %c0_i32_85, %c0_i32_86] : memref<2x8x8x512xf32, #tpu.memory_space<vmem>> -> memref<1x8x8x512xf32, #tpu.memory_space<vmem>>
    %152 = tpu.memref_squeeze %151 : memref<1x8x8x512xf32, #tpu.memory_space<vmem>> -> memref<8x8x512xf32, #tpu.memory_space<vmem>>
    %153 = arith.index_cast %c4_i32 : i32 to index
    %c0_87 = arith.constant 0 : index
    %c0_88 = arith.constant 0 : index
    %154 = vector.load %152[%153, %c0_87, %c0_88] : memref<8x8x512xf32, #tpu.memory_space<vmem>>, vector<1x8x512xf32>
    %155 = vector.shape_cast %154 : vector<1x8x512xf32> to vector<8x512xf32>
    %156 = arith.addf %155, %150 : vector<8x512xf32>
    %157 = vector.extract_strided_slice %156 {offsets = [0, 0], sizes = [8, 384], strides = [1, 1]} : vector<8x512xf32> to vector<8x384xf32>
    %cst_89 = arith.constant 5.000000e-01 : f32
    %158 = vector.broadcast %cst_89 : f32 to vector<8x384xf32>
    %159 = arith.mulf %158, %157 : vector<8x384xf32>
    %160 = math.tanh %159 : vector<8x384xf32>
    %cst_90 = arith.constant 5.000000e-01 : f32
    %161 = vector.broadcast %cst_90 : f32 to vector<8x384xf32>
    %162 = arith.mulf %161, %160 : vector<8x384xf32>
    %cst_91 = arith.constant 5.000000e-01 : f32
    %163 = vector.broadcast %cst_91 : f32 to vector<8x384xf32>
    %164 = arith.addf %162, %163 : vector<8x384xf32>
    %165 = vector.extract_strided_slice %164 {offsets = [0, 0], sizes = [8, 128], strides = [1, 1]} : vector<8x384xf32> to vector<8x128xf32>
    %166 = vector.extract_strided_slice %164 {offsets = [0, 128], sizes = [8, 128], strides = [1, 1]} : vector<8x384xf32> to vector<8x128xf32>
    %167 = vector.extract_strided_slice %164 {offsets = [0, 256], sizes = [8, 128], strides = [1, 1]} : vector<8x384xf32> to vector<8x128xf32>
    %168 = vector.extract_strided_slice %156 {offsets = [0, 384], sizes = [8, 128], strides = [1, 1]} : vector<8x512xf32> to vector<8x128xf32>
    %169 = math.tanh %168 : vector<8x128xf32>
    %170 = arith.mulf %166, %139 : vector<8x128xf32>
    %171 = arith.mulf %165, %169 : vector<8x128xf32>
    %172 = arith.addf %170, %171 : vector<8x128xf32>
    %173 = math.tanh %172 : vector<8x128xf32>
    %174 = arith.mulf %167, %173 : vector<8x128xf32>
    %175 = arith.truncf %174 : vector<8x128xf32> to vector<8x128xbf16>
    %c0_i32_92 = arith.constant 0 : i32
    %c0_i32_93 = arith.constant 0 : i32
    %c0_i32_94 = arith.constant 0 : i32
    %176 = tpu.memref_slice %arg8[%c0_i32_92, %c0_i32_93, %c0_i32_94] : memref<8x8x128xbf16, #tpu.memory_space<vmem>> -> memref<8x8x128xbf16, #tpu.memory_space<vmem>>
    %177 = arith.index_cast %c4_i32 : i32 to index
    %c0_95 = arith.constant 0 : index
    %c0_96 = arith.constant 0 : index
    %178 = vector.load %176[%177, %c0_95, %c0_96] : memref<8x8x128xbf16, #tpu.memory_space<vmem>>, vector<1x8x128xbf16>
    %179 = vector.shape_cast %178 : vector<1x8x128xbf16> to vector<8x128xbf16>
    %180 = vector.shape_cast %175 : vector<8x128xbf16> to vector<1x8x128xbf16>
    tpu.vector_store %176[%177, %c0_95, %c0_96], %180 {strides = array<i32>} : memref<8x8x128xbf16, #tpu.memory_space<vmem>>, vector<1x8x128xbf16>,
    %c5_i32 = arith.constant 5 : i32
    %181 = arith.truncf %174 : vector<8x128xf32> to vector<8x128xbf16>
    %c0_97 = arith.constant 0 : index
    %c0_98 = arith.constant 0 : index
    %182 = vector.load %arg6[%c0_97, %c0_98] : memref<128x512xbf16, #tpu.memory_space<vmem>>, vector<128x512xbf16>
    %cst_99 = arith.constant dense<0.000000e+00> : vector<8x512xf32>
    %183 = tpu.matmul %181, %182, %cst_99 {dimension_numbers = #tpu.dot_dimension_numbers<[1], [0], [0], [1], [0, 0, 1, 1], [], []>} : vector<8x128xbf16>, vector<128x512xbf16>, vector<8x512xf32> -> vector<8x512xf32>
    %c0_i32_100 = arith.constant 0 : i32
    %c0_i32_101 = arith.constant 0 : i32
    %c0_i32_102 = arith.constant 0 : i32
    %184 = tpu.memref_slice %arg13[%c0_i32_15, %c0_i32_100, %c0_i32_101, %c0_i32_102] : memref<2x8x8x512xf32, #tpu.memory_space<vmem>> -> memref<1x8x8x512xf32, #tpu.memory_space<vmem>>
    %185 = tpu.memref_squeeze %184 : memref<1x8x8x512xf32, #tpu.memory_space<vmem>> -> memref<8x8x512xf32, #tpu.memory_space<vmem>>
    %186 = arith.index_cast %c5_i32 : i32 to index
    %c0_103 = arith.constant 0 : index
    %c0_104 = arith.constant 0 : index
    %187 = vector.load %185[%186, %c0_103, %c0_104] : memref<8x8x512xf32, #tpu.memory_space<vmem>>, vector<1x8x512xf32>
    %188 = vector.shape_cast %187 : vector<1x8x512xf32> to vector<8x512xf32>
    %189 = arith.addf %188, %183 : vector<8x512xf32>
    %190 = vector.extract_strided_slice %189 {offsets = [0, 0], sizes = [8, 384], strides = [1, 1]} : vector<8x512xf32> to vector<8x384xf32>
    %cst_105 = arith.constant 5.000000e-01 : f32
    %191 = vector.broadcast %cst_105 : f32 to vector<8x384xf32>
    %192 = arith.mulf %191, %190 : vector<8x384xf32>
    %193 = math.tanh %192 : vector<8x384xf32>
    %cst_106 = arith.constant 5.000000e-01 : f32
    %194 = vector.broadcast %cst_106 : f32 to vector<8x384xf32>
    %195 = arith.mulf %194, %193 : vector<8x384xf32>
    %cst_107 = arith.constant 5.000000e-01 : f32
    %196 = vector.broadcast %cst_107 : f32 to vector<8x384xf32>
    %197 = arith.addf %195, %196 : vector<8x384xf32>
    %198 = vector.extract_strided_slice %197 {offsets = [0, 0], sizes = [8, 128], strides = [1, 1]} : vector<8x384xf32> to vector<8x128xf32>
    %199 = vector.extract_strided_slice %197 {offsets = [0, 128], sizes = [8, 128], strides = [1, 1]} : vector<8x384xf32> to vector<8x128xf32>
    %200 = vector.extract_strided_slice %197 {offsets = [0, 256], sizes = [8, 128], strides = [1, 1]} : vector<8x384xf32> to vector<8x128xf32>
    %201 = vector.extract_strided_slice %189 {offsets = [0, 384], sizes = [8, 128], strides = [1, 1]} : vector<8x512xf32> to vector<8x128xf32>
    %202 = math.tanh %201 : vector<8x128xf32>
    %203 = arith.mulf %199, %172 : vector<8x128xf32>
    %204 = arith.mulf %198, %202 : vector<8x128xf32>
    %205 = arith.addf %203, %204 : vector<8x128xf32>
    %206 = math.tanh %205 : vector<8x128xf32>
    %207 = arith.mulf %200, %206 : vector<8x128xf32>
    %208 = arith.truncf %207 : vector<8x128xf32> to vector<8x128xbf16>
    %c0_i32_108 = arith.constant 0 : i32
    %c0_i32_109 = arith.constant 0 : i32
    %c0_i32_110 = arith.constant 0 : i32
    %209 = tpu.memref_slice %arg8[%c0_i32_108, %c0_i32_109, %c0_i32_110] : memref<8x8x128xbf16, #tpu.memory_space<vmem>> -> memref<8x8x128xbf16, #tpu.memory_space<vmem>>
    %210 = arith.index_cast %c5_i32 : i32 to index
    %c0_111 = arith.constant 0 : index
    %c0_112 = arith.constant 0 : index
    %211 = vector.load %209[%210, %c0_111, %c0_112] : memref<8x8x128xbf16, #tpu.memory_space<vmem>>, vector<1x8x128xbf16>
    %212 = vector.shape_cast %211 : vector<1x8x128xbf16> to vector<8x128xbf16>
    %213 = vector.shape_cast %208 : vector<8x128xbf16> to vector<1x8x128xbf16>
    tpu.vector_store %209[%210, %c0_111, %c0_112], %213 {strides = array<i32>} : memref<8x8x128xbf16, #tpu.memory_space<vmem>>, vector<1x8x128xbf16>,
    %c6_i32 = arith.constant 6 : i32
    %214 = arith.truncf %207 : vector<8x128xf32> to vector<8x128xbf16>
    %c0_113 = arith.constant 0 : index
    %c0_114 = arith.constant 0 : index
    %215 = vector.load %arg6[%c0_113, %c0_114] : memref<128x512xbf16, #tpu.memory_space<vmem>>, vector<128x512xbf16>
    %cst_115 = arith.constant dense<0.000000e+00> : vector<8x512xf32>
    %216 = tpu.matmul %214, %215, %cst_115 {dimension_numbers = #tpu.dot_dimension_numbers<[1], [0], [0], [1], [0, 0, 1, 1], [], []>} : vector<8x128xbf16>, vector<128x512xbf16>, vector<8x512xf32> -> vector<8x512xf32>
    %c0_i32_116 = arith.constant 0 : i32
    %c0_i32_117 = arith.constant 0 : i32
    %c0_i32_118 = arith.constant 0 : i32
    %217 = tpu.memref_slice %arg13[%c0_i32_15, %c0_i32_116, %c0_i32_117, %c0_i32_118] : memref<2x8x8x512xf32, #tpu.memory_space<vmem>> -> memref<1x8x8x512xf32, #tpu.memory_space<vmem>>
    %218 = tpu.memref_squeeze %217 : memref<1x8x8x512xf32, #tpu.memory_space<vmem>> -> memref<8x8x512xf32, #tpu.memory_space<vmem>>
    %219 = arith.index_cast %c6_i32 : i32 to index
    %c0_119 = arith.constant 0 : index
    %c0_120 = arith.constant 0 : index
    %220 = vector.load %218[%219, %c0_119, %c0_120] : memref<8x8x512xf32, #tpu.memory_space<vmem>>, vector<1x8x512xf32>
    %221 = vector.shape_cast %220 : vector<1x8x512xf32> to vector<8x512xf32>
    %222 = arith.addf %221, %216 : vector<8x512xf32>
    %223 = vector.extract_strided_slice %222 {offsets = [0, 0], sizes = [8, 384], strides = [1, 1]} : vector<8x512xf32> to vector<8x384xf32>
    %cst_121 = arith.constant 5.000000e-01 : f32
    %224 = vector.broadcast %cst_121 : f32 to vector<8x384xf32>
    %225 = arith.mulf %224, %223 : vector<8x384xf32>
    %226 = math.tanh %225 : vector<8x384xf32>
    %cst_122 = arith.constant 5.000000e-01 : f32
    %227 = vector.broadcast %cst_122 : f32 to vector<8x384xf32>
    %228 = arith.mulf %227, %226 : vector<8x384xf32>
    %cst_123 = arith.constant 5.000000e-01 : f32
    %229 = vector.broadcast %cst_123 : f32 to vector<8x384xf32>
    %230 = arith.addf %228, %229 : vector<8x384xf32>
    %231 = vector.extract_strided_slice %230 {offsets = [0, 0], sizes = [8, 128], strides = [1, 1]} : vector<8x384xf32> to vector<8x128xf32>
    %232 = vector.extract_strided_slice %230 {offsets = [0, 128], sizes = [8, 128], strides = [1, 1]} : vector<8x384xf32> to vector<8x128xf32>
    %233 = vector.extract_strided_slice %230 {offsets = [0, 256], sizes = [8, 128], strides = [1, 1]} : vector<8x384xf32> to vector<8x128xf32>
    %234 = vector.extract_strided_slice %222 {offsets = [0, 384], sizes = [8, 128], strides = [1, 1]} : vector<8x512xf32> to vector<8x128xf32>
    %235 = math.tanh %234 : vector<8x128xf32>
    %236 = arith.mulf %232, %205 : vector<8x128xf32>
    %237 = arith.mulf %231, %235 : vector<8x128xf32>
    %238 = arith.addf %236, %237 : vector<8x128xf32>
    %239 = math.tanh %238 : vector<8x128xf32>
    %240 = arith.mulf %233, %239 : vector<8x128xf32>
    %241 = arith.truncf %240 : vector<8x128xf32> to vector<8x128xbf16>
    %c0_i32_124 = arith.constant 0 : i32
    %c0_i32_125 = arith.constant 0 : i32
    %c0_i32_126 = arith.constant 0 : i32
    %242 = tpu.memref_slice %arg8[%c0_i32_124, %c0_i32_125, %c0_i32_126] : memref<8x8x128xbf16, #tpu.memory_space<vmem>> -> memref<8x8x128xbf16, #tpu.memory_space<vmem>>
    %243 = arith.index_cast %c6_i32 : i32 to index
    %c0_127 = arith.constant 0 : index
    %c0_128 = arith.constant 0 : index
    %244 = vector.load %242[%243, %c0_127, %c0_128] : memref<8x8x128xbf16, #tpu.memory_space<vmem>>, vector<1x8x128xbf16>
    %245 = vector.shape_cast %244 : vector<1x8x128xbf16> to vector<8x128xbf16>
    %246 = vector.shape_cast %241 : vector<8x128xbf16> to vector<1x8x128xbf16>
    tpu.vector_store %242[%243, %c0_127, %c0_128], %246 {strides = array<i32>} : memref<8x8x128xbf16, #tpu.memory_space<vmem>>, vector<1x8x128xbf16>,
    %c7_i32 = arith.constant 7 : i32
    %247 = arith.truncf %240 : vector<8x128xf32> to vector<8x128xbf16>
    %c0_129 = arith.constant 0 : index
    %c0_130 = arith.constant 0 : index
    %248 = vector.load %arg6[%c0_129, %c0_130] : memref<128x512xbf16, #tpu.memory_space<vmem>>, vector<128x512xbf16>
    %cst_131 = arith.constant dense<0.000000e+00> : vector<8x512xf32>
    %249 = tpu.matmul %247, %248, %cst_131 {dimension_numbers = #tpu.dot_dimension_numbers<[1], [0], [0], [1], [0, 0, 1, 1], [], []>} : vector<8x128xbf16>, vector<128x512xbf16>, vector<8x512xf32> -> vector<8x512xf32>
    %c0_i32_132 = arith.constant 0 : i32
    %c0_i32_133 = arith.constant 0 : i32
    %c0_i32_134 = arith.constant 0 : i32
    %250 = tpu.memref_slice %arg13[%c0_i32_15, %c0_i32_132, %c0_i32_133, %c0_i32_134] : memref<2x8x8x512xf32, #tpu.memory_space<vmem>> -> memref<1x8x8x512xf32, #tpu.memory_space<vmem>>
    %251 = tpu.memref_squeeze %250 : memref<1x8x8x512xf32, #tpu.memory_space<vmem>> -> memref<8x8x512xf32, #tpu.memory_space<vmem>>
    %252 = arith.index_cast %c7_i32 : i32 to index
    %c0_135 = arith.constant 0 : index
    %c0_136 = arith.constant 0 : index
    %253 = vector.load %251[%252, %c0_135, %c0_136] : memref<8x8x512xf32, #tpu.memory_space<vmem>>, vector<1x8x512xf32>
    %254 = vector.shape_cast %253 : vector<1x8x512xf32> to vector<8x512xf32>
    %255 = arith.addf %254, %249 : vector<8x512xf32>
    %256 = vector.extract_strided_slice %255 {offsets = [0, 0], sizes = [8, 384], strides = [1, 1]} : vector<8x512xf32> to vector<8x384xf32>
    %cst_137 = arith.constant 5.000000e-01 : f32
    %257 = vector.broadcast %cst_137 : f32 to vector<8x384xf32>
    %258 = arith.mulf %257, %256 : vector<8x384xf32>
    %259 = math.tanh %258 : vector<8x384xf32>
    %cst_138 = arith.constant 5.000000e-01 : f32
    %260 = vector.broadcast %cst_138 : f32 to vector<8x384xf32>
    %261 = arith.mulf %260, %259 : vector<8x384xf32>
    %cst_139 = arith.constant 5.000000e-01 : f32
    %262 = vector.broadcast %cst_139 : f32 to vector<8x384xf32>
    %263 = arith.addf %261, %262 : vector<8x384xf32>
    %264 = vector.extract_strided_slice %263 {offsets = [0, 0], sizes = [8, 128], strides = [1, 1]} : vector<8x384xf32> to vector<8x128xf32>
    %265 = vector.extract_strided_slice %263 {offsets = [0, 128], sizes = [8, 128], strides = [1, 1]} : vector<8x384xf32> to vector<8x128xf32>
    %266 = vector.extract_strided_slice %263 {offsets = [0, 256], sizes = [8, 128], strides = [1, 1]} : vector<8x384xf32> to vector<8x128xf32>
    %267 = vector.extract_strided_slice %255 {offsets = [0, 384], sizes = [8, 128], strides = [1, 1]} : vector<8x512xf32> to vector<8x128xf32>
    %268 = math.tanh %267 : vector<8x128xf32>
    %269 = arith.mulf %265, %238 : vector<8x128xf32>
    %270 = arith.mulf %264, %268 : vector<8x128xf32>
    %271 = arith.addf %269, %270 : vector<8x128xf32>
    %272 = math.tanh %271 : vector<8x128xf32>
    %273 = arith.mulf %266, %272 : vector<8x128xf32>
    %274 = arith.truncf %273 : vector<8x128xf32> to vector<8x128xbf16>
    %c0_i32_140 = arith.constant 0 : i32
    %c0_i32_141 = arith.constant 0 : i32
    %c0_i32_142 = arith.constant 0 : i32
    %275 = tpu.memref_slice %arg8[%c0_i32_140, %c0_i32_141, %c0_i32_142] : memref<8x8x128xbf16, #tpu.memory_space<vmem>> -> memref<8x8x128xbf16, #tpu.memory_space<vmem>>
    %276 = arith.index_cast %c7_i32 : i32 to index
    %c0_143 = arith.constant 0 : index
    %c0_144 = arith.constant 0 : index
    %277 = vector.load %275[%276, %c0_143, %c0_144] : memref<8x8x128xbf16, #tpu.memory_space<vmem>>, vector<1x8x128xbf16>
    %278 = vector.shape_cast %277 : vector<1x8x128xbf16> to vector<8x128xbf16>
    %279 = vector.shape_cast %274 : vector<8x128xbf16> to vector<1x8x128xbf16>
    tpu.vector_store %275[%276, %c0_143, %c0_144], %279 {strides = array<i32>} : memref<8x8x128xbf16, #tpu.memory_space<vmem>>, vector<1x8x128xbf16>,
    %c8_i32 = arith.constant 8 : i32
    %c0_145 = arith.constant 0 : index
    %c0_146 = arith.constant 0 : index
    %280 = vector.load %arg11[%c0_145, %c0_146] : memref<8x128xf32, #tpu.memory_space<vmem>>, vector<8x128xf32>
    tpu.vector_store %arg11[%c0_145, %c0_146], %273 {strides = array<i32>} : memref<8x128xf32, #tpu.memory_space<vmem>>, vector<8x128xf32>,
    %c0_147 = arith.constant 0 : index
    %c0_148 = arith.constant 0 : index
    %281 = vector.load %arg12[%c0_147, %c0_148] : memref<8x128xf32, #tpu.memory_space<vmem>>, vector<8x128xf32>
    tpu.vector_store %arg12[%c0_147, %c0_148], %271 {strides = array<i32>} : memref<8x128xf32, #tpu.memory_space<vmem>>, vector<8x128xf32>,
    %c0_149 = arith.constant 0 : index
    %c0_150 = arith.constant 0 : index
    %282 = vector.load %arg9[%c0_149, %c0_150] : memref<8x128xf32, #tpu.memory_space<vmem>>, vector<8x128xf32>
    tpu.vector_store %arg9[%c0_149, %c0_150], %273 {strides = array<i32>} : memref<8x128xf32, #tpu.memory_space<vmem>>, vector<8x128xf32>,
    %c0_151 = arith.constant 0 : index
    %c0_152 = arith.constant 0 : index
    %283 = vector.load %arg10[%c0_151, %c0_152] : memref<8x128xf32, #tpu.memory_space<vmem>>, vector<8x128xf32>
    tpu.vector_store %arg10[%c0_151, %c0_152], %271 {strides = array<i32>} : memref<8x128xf32, #tpu.memory_space<vmem>>, vector<8x128xf32>,
    return
  }
  func.func @transform_0(%arg0: i32, %arg1: i32) -> (i32, i32, i32) {
    %c0_i32 = arith.constant 0 : i32
    %c0_i32_0 = arith.constant 0 : i32
    return %arg1, %arg0, %c0_i32 : i32, i32, i32
  }
  func.func @transform_1(%arg0: i32, %arg1: i32) -> (i32, i32) {
    %c0_i32 = arith.constant 0 : i32
    %c0_i32_0 = arith.constant 0 : i32
    return %arg0, %c0_i32 : i32, i32
  }
  func.func @transform_2(%arg0: i32, %arg1: i32) -> (i32, i32) {
    %c0_i32 = arith.constant 0 : i32
    %c0_i32_0 = arith.constant 0 : i32
    return %arg0, %c0_i32 : i32, i32
  }
  func.func @transform_3(%arg0: i32, %arg1: i32) -> (i32, i32) {
    %c0_i32 = arith.constant 0 : i32
    %c0_i32_0 = arith.constant 0 : i32
    %c0_i32_1 = arith.constant 0 : i32
    return %c0_i32, %c0_i32_0 : i32, i32
  }
  func.func @transform_4(%arg0: i32, %arg1: i32) -> (i32, i32) {
    %c0_i32 = arith.constant 0 : i32
    %c0_i32_0 = arith.constant 0 : i32
    %c0_i32_1 = arith.constant 0 : i32
    return %c0_i32, %c0_i32_0 : i32, i32
  }
  func.func @transform_5(%arg0: i32, %arg1: i32) -> (i32, i32) {
    %c0_i32 = arith.constant 0 : i32
    %c0_i32_0 = arith.constant 0 : i32
    %c0_i32_1 = arith.constant 0 : i32
    return %c0_i32, %c0_i32_0 : i32, i32
  }
  func.func @transform_6(%arg0: i32, %arg1: i32) -> (i32, i32, i32) {
    %c0_i32 = arith.constant 0 : i32
    %c0_i32_0 = arith.constant 0 : i32
    return %arg1, %arg0, %c0_i32 : i32, i32, i32
  }
  func.func @transform_7(%arg0: i32, %arg1: i32) -> (i32, i32) {
    %c0_i32 = arith.constant 0 : i32
    %c0_i32_0 = arith.constant 0 : i32
    return %arg0, %c0_i32 : i32, i32
  }
  func.func @transform_8(%arg0: i32, %arg1: i32) -> (i32, i32) {
    %c0_i32 = arith.constant 0 : i32
    %c0_i32_0 = arith.constant 0 : i32
    return %arg0, %c0_i32 : i32, i32
  }
}

module attributes {stable_mosaic.version = 11 : i64} {
  func.func @_lstm_layer_kernel(%arg0: i32, %arg1: i32, %arg2: memref<8x8x128xbf16, #tpu.memory_space<vmem>>, %arg3: memref<8x128xf32, #tpu.memory_space<vmem>>, %arg4: memref<8x128xf32, #tpu.memory_space<vmem>>, %arg5: memref<128x512xbf16, #tpu.memory_space<vmem>>, %arg6: memref<128x512xbf16, #tpu.memory_space<vmem>>, %arg7: memref<1x512xf32, #tpu.memory_space<vmem>>, %arg8: memref<8x8x128xbf16, #tpu.memory_space<vmem>>, %arg9: memref<8x128xf32, #tpu.memory_space<vmem>>, %arg10: memref<8x128xf32, #tpu.memory_space<vmem>>, %arg11: memref<8x128xf32, #tpu.memory_space<vmem>>, %arg12: memref<8x128xf32, #tpu.memory_space<vmem>>, %arg13: memref<2x8x8x512xf32, #tpu.memory_space<vmem>>) attributes {dimension_semantics = [#tpu.dimension_semantics<parallel>, #tpu.dimension_semantics<arbitrary>], iteration_bounds = array<i64: 1, 1>, scalar_prefetch = 0 : i64, scratch_operands = 3 : i64, tpu.core_type = #tpu.core_type<tc>, window_params = [{transform_indices = @transform_0, window_bounds = array<i64: 8, 8, 128>}, {transform_indices = @transform_1, window_bounds = array<i64: 8, 128>}, {transform_indices = @transform_2, window_bounds = array<i64: 8, 128>}, {pipeline_mode = #tpu.pipeline_mode<synchronous>, transform_indices = @transform_3, window_bounds = array<i64: 128, 512>}, {pipeline_mode = #tpu.pipeline_mode<synchronous>, transform_indices = @transform_4, window_bounds = array<i64: 128, 512>}, {pipeline_mode = #tpu.pipeline_mode<synchronous>, transform_indices = @transform_5, window_bounds = array<i64: 1, 512>}, {transform_indices = @transform_6, window_bounds = array<i64: 8, 8, 128>}, {transform_indices = @transform_7, window_bounds = array<i64: 8, 128>}, {transform_indices = @transform_8, window_bounds = array<i64: 8, 128>}]} {
    %c0_i32 = arith.constant 0 : i32
    %0 = arith.cmpi eq, %arg1, %c0_i32 : i32
    %1 = arith.extui %0 : i1 to i32
    %c0_i32_0 = arith.constant 0 : i32
    %2 = arith.cmpi ne, %1, %c0_i32_0 : i32
    scf.if %2 {
      %c0_153 = arith.constant 0 : index
      %c0_154 = arith.constant 0 : index
      %284 = vector.load %arg3[%c0_153, %c0_154] : memref<8x128xf32, #tpu.memory_space<vmem>>, vector<8x128xf32>
      %c0_155 = arith.constant 0 : index
      %c0_156 = arith.constant 0 : index
      %285 = vector.load %arg11[%c0_155, %c0_156] : memref<8x128xf32, #tpu.memory_space<vmem>>, vector<8x128xf32>
      tpu.vector_store %arg11[%c0_155, %c0_156], %284 {strides = array<i32>} : memref<8x128xf32, #tpu.memory_space<vmem>>, vector<8x128xf32>,
      %c0_157 = arith.constant 0 : index
      %c0_158 = arith.constant 0 : index
      %286 = vector.load %arg4[%c0_157, %c0_158] : memref<8x128xf32, #tpu.memory_space<vmem>>, vector<8x128xf32>
      %c0_159 = arith.constant 0 : index
      %c0_160 = arith.constant 0 : index
      %287 = vector.load %arg12[%c0_159, %c0_160] : memref<8x128xf32, #tpu.memory_space<vmem>>, vector<8x128xf32>
      tpu.vector_store %arg12[%c0_159, %c0_160], %286 {strides = array<i32>} : memref<8x128xf32, #tpu.memory_space<vmem>>, vector<8x128xf32>,
    } else {
    }
    %c0 = arith.constant 0 : index
    %c0_1 = arith.constant 0 : index
    %c0_2 = arith.constant 0 : index
    %3 = vector.load %arg2[%c0, %c0_1, %c0_2] : memref<8x8x128xbf16, #tpu.memory_space<vmem>>, vector<8x8x128xbf16>
    %4 = vector.shape_cast %3 : vector<8x8x128xbf16> to vector<64x128xbf16>
    %c0_3 = arith.constant 0 : index
    %c0_4 = arith.constant 0 : index
    %5 = vector.load %arg5[%c0_3, %c0_4] : memref<128x512xbf16, #tpu.memory_space<vmem>>, vector<128x512xbf16>
    %cst = arith.constant dense<0.000000e+00> : vector<64x512xf32>
    %6 = tpu.matmul %4, %5, %cst {dimension_numbers = #tpu.dot_dimension_numbers<[1], [0], [0], [1], [0, 0, 1, 1], [], []>} : vector<64x128xbf16>, vector<128x512xbf16>, vector<64x512xf32> -> vector<64x512xf32>
    %c0_5 = arith.constant 0 : index
    %c0_6 = arith.constant 0 : index
    %7 = vector.load %arg7[%c0_5, %c0_6] : memref<1x512xf32, #tpu.memory_space<vmem>>, vector<1x512xf32>
    %8 = vector.broadcast %7 : vector<1x512xf32> to vector<64x512xf32>
    %9 = arith.addf %6, %8 : vector<64x512xf32>
    %10 = vector.shape_cast %9 : vector<64x512xf32> to vector<8x8x512xf32>
    %c0_7 = arith.constant 0 : index
    %c0_8 = arith.constant 0 : index
    %c0_9 = arith.constant 0 : index
    %c0_10 = arith.constant 0 : index
    %11 = vector.load %arg13[%c0_7, %c0_8, %c0_9, %c0_10] : memref<2x8x8x512xf32, #tpu.memory_space<vmem>>, vector<1x8x8x512xf32>
    %12 = vector.shape_cast %11 : vector<1x8x8x512xf32> to vector<8x8x512xf32>
    %13 = vector.shape_cast %10 : vector<8x8x512xf32> to vector<1x8x8x512xf32>
    tpu.vector_store %arg13[%c0_7, %c0_8, %c0_9, %c0_10], %13 {strides = array<i32>} : memref<2x8x8x512xf32, #tpu.memory_space<vmem>>, vector<1x8x8x512xf32>,
    %c0_11 = arith.constant 0 : index
    %c0_12 = arith.constant 0 : index
    %14 = vector.load %arg11[%c0_11, %c0_12] : memref<8x128xf32, #tpu.memory_space<vmem>>, vector<8x128xf32>
    %c0_13 = arith.constant 0 : index
    %c0_14 = arith.constant 0 : index
    %15 = vector.load %arg12[%c0_13, %c0_14] : memref<8x128xf32, #tpu.memory_space<vmem>>, vector<8x128xf32>
    %c0_i32_15 = arith.constant 0 : i32
    %c0_i32_16 = arith.constant 0 : i32
    %16 = arith.truncf %14 : vector<8x128xf32> to vector<8x128xbf16>
    %c0_17 = arith.constant 0 : index
    %c0_18 = arith.constant 0 : index
    %17 = vector.load %arg6[%c0_17, %c0_18] : memref<128x512xbf16, #tpu.memory_space<vmem>>, vector<128x512xbf16>
    %cst_19 = arith.constant dense<0.000000e+00> : vector<8x512xf32>
    %18 = tpu.matmul %16, %17, %cst_19 {dimension_numbers = #tpu.dot_dimension_numbers<[1], [0], [0], [1], [0, 0, 1, 1], [], []>} : vector<8x128xbf16>, vector<128x512xbf16>, vector<8x512xf32> -> vector<8x512xf32>
    %c0_i32_20 = arith.constant 0 : i32
    %c0_i32_21 = arith.constant 0 : i32
    %c0_i32_22 = arith.constant 0 : i32
    %19 = tpu.memref_slice %arg13[%c0_i32_15, %c0_i32_20, %c0_i32_21, %c0_i32_22] : memref<2x8x8x512xf32, #tpu.memory_space<vmem>> -> memref<1x8x8x512xf32, #tpu.memory_space<vmem>>
    %20 = tpu.memref_squeeze %19 : memref<1x8x8x512xf32, #tpu.memory_space<vmem>> -> memref<8x8x512xf32, #tpu.memory_space<vmem>>
    %21 = arith.index_cast %c0_i32_16 : i32 to index
    %c0_23 = arith.constant 0 : index
    %c0_24 = arith.constant 0 : index
    %22 = vector.load %20[%21, %c0_23, %c0_24] : memref<8x8x512xf32, #tpu.memory_space<vmem>>, vector<1x8x512xf32>
    %23 = vector.shape_cast %22 : vector<1x8x512xf32> to vector<8x512xf32>
    %24 = arith.addf %23, %18 : vector<8x512xf32>
    %25 = vector.extract_strided_slice %24 {offsets = [0, 0], sizes = [8, 384], strides = [1, 1]} : vector<8x512xf32> to vector<8x384xf32>
    %cst_25 = arith.constant 5.000000e-01 : f32
    %26 = vector.broadcast %cst_25 : f32 to vector<8x384xf32>
    %27 = arith.mulf %26, %25 : vector<8x384xf32>
    %28 = math.tanh %27 : vector<8x384xf32>
    %cst_26 = arith.constant 5.000000e-01 : f32
    %29 = vector.broadcast %cst_26 : f32 to vector<8x384xf32>
    %30 = arith.mulf %29, %28 : vector<8x384xf32>
    %cst_27 = arith.constant 5.000000e-01 : f32
    %31 = vector.broadcast %cst_27 : f32 to vector<8x384xf32>
    %32 = arith.addf %30, %31 : vector<8x384xf32>
    %33 = vector.extract_strided_slice %32 {offsets = [0, 0], sizes = [8, 128], strides = [1, 1]} : vector<8x384xf32> to vector<8x128xf32>
    %34 = vector.extract_strided_slice %32 {offsets = [0, 128], sizes = [8, 128], strides = [1, 1]} : vector<8x384xf32> to vector<8x128xf32>
    %35 = vector.extract_strided_slice %32 {offsets = [0, 256], sizes = [8, 128], strides = [1, 1]} : vector<8x384xf32> to vector<8x128xf32>
    %36 = vector.extract_strided_slice %24 {offsets = [0, 384], sizes = [8, 128], strides = [1, 1]} : vector<8x512xf32> to vector<8x128xf32>
    %37 = math.tanh %36 : vector<8x128xf32>
    %38 = arith.mulf %34, %15 : vector<8x128xf32>
    %39 = arith.mulf %33, %37 : vector<8x128xf32>
    %40 = arith.addf %38, %39 : vector<8x128xf32>
    %41 = math.tanh %40 : vector<8x128xf32>
    %42 = arith.mulf %35, %41 : vector<8x128xf32>
    %43 = arith.truncf %42 : vector<8x128xf32> to vector<8x128xbf16>
    %c0_i32_28 = arith.constant 0 : i32
    %c0_i32_29 = arith.constant 0 : i32
    %c0_i32_30 = arith.constant 0 : i32
    %44 = tpu.memref_slice %arg8[%c0_i32_28, %c0_i32_29, %c0_i32_30] : memref<8x8x128xbf16, #tpu.memory_space<vmem>> -> memref<8x8x128xbf16, #tpu.memory_space<vmem>>
    %45 = arith.index_cast %c0_i32_16 : i32 to index
    %c0_31 = arith.constant 0 : index
    %c0_32 = arith.constant 0 : index
    %46 = vector.load %44[%45, %c0_31, %c0_32] : memref<8x8x128xbf16, #tpu.memory_space<vmem>>, vector<1x8x128xbf16>
    %47 = vector.shape_cast %46 : vector<1x8x128xbf16> to vector<8x128xbf16>
    %48 = vector.shape_cast %43 : vector<8x128xbf16> to vector<1x8x128xbf16>
    tpu.vector_store %44[%45, %c0_31, %c0_32], %48 {strides = array<i32>} : memref<8x8x128xbf16, #tpu.memory_space<vmem>>, vector<1x8x128xbf16>,
    %c1_i32 = arith.constant 1 : i32
    %49 = arith.truncf %42 : vector<8x128xf32> to vector<8x128xbf16>
    %c0_33 = arith.constant 0 : index
    %c0_34 = arith.constant 0 : index
    %50 = vector.load %arg6[%c0_33, %c0_34] : memref<128x512xbf16, #tpu.memory_space<vmem>>, vector<128x512xbf16>
    %cst_35 = arith.constant dense<0.000000e+00> : vector<8x512xf32>
    %51 = tpu.matmul %49, %50, %cst_35 {dimension_numbers = #tpu.dot_dimension_numbers<[1], [0], [0], [1], [0, 0, 1, 1], [], []>} : vector<8x128xbf16>, vector<128x512xbf16>, vector<8x512xf32> -> vector<8x512xf32>
    %c0_i32_36 = arith.constant 0 : i32
    %c0_i32_37 = arith.constant 0 : i32
    %c0_i32_38 = arith.constant 0 : i32
    %52 = tpu.memref_slice %arg13[%c0_i32_15, %c0_i32_36, %c0_i32_37, %c0_i32_38] : memref<2x8x8x512xf32, #tpu.memory_space<vmem>> -> memref<1x8x8x512xf32, #tpu.memory_space<vmem>>
    %53 = tpu.memref_squeeze %52 : memref<1x8x8x512xf32, #tpu.memory_space<vmem>> -> memref<8x8x512xf32, #tpu.memory_space<vmem>>
    %54 = arith.index_cast %c1_i32 : i32 to index
    %c0_39 = arith.constant 0 : index
    %c0_40 = arith.constant 0 : index
    %55 = vector.load %53[%54, %c0_39, %c0_40] : memref<8x8x512xf32, #tpu.memory_space<vmem>>, vector<1x8x512xf32>
    %56 = vector.shape_cast %55 : vector<1x8x512xf32> to vector<8x512xf32>
    %57 = arith.addf %56, %51 : vector<8x512xf32>
    %58 = vector.extract_strided_slice %57 {offsets = [0, 0], sizes = [8, 384], strides = [1, 1]} : vector<8x512xf32> to vector<8x384xf32>
    %cst_41 = arith.constant 5.000000e-01 : f32
    %59 = vector.broadcast %cst_41 : f32 to vector<8x384xf32>
    %60 = arith.mulf %59, %58 : vector<8x384xf32>
    %61 = math.tanh %60 : vector<8x384xf32>
    %cst_42 = arith.constant 5.000000e-01 : f32
    %62 = vector.broadcast %cst_42 : f32 to vector<8x384xf32>
    %63 = arith.mulf %62, %61 : vector<8x384xf32>
    %cst_43 = arith.constant 5.000000e-01 : f32
    %64 = vector.broadcast %cst_43 : f32 to vector<8x384xf32>
    %65 = arith.addf %63, %64 : vector<8x384xf32>
    %66 = vector.extract_strided_slice %65 {offsets = [0, 0], sizes = [8, 128], strides = [1, 1]} : vector<8x384xf32> to vector<8x128xf32>
    %67 = vector.extract_strided_slice %65 {offsets = [0, 128], sizes = [8, 128], strides = [1, 1]} : vector<8x384xf32> to vector<8x128xf32>
    %68 = vector.extract_strided_slice %65 {offsets = [0, 256], sizes = [8, 128], strides = [1, 1]} : vector<8x384xf32> to vector<8x128xf32>
    %69 = vector.extract_strided_slice %57 {offsets = [0, 384], sizes = [8, 128], strides = [1, 1]} : vector<8x512xf32> to vector<8x128xf32>
    %70 = math.tanh %69 : vector<8x128xf32>
    %71 = arith.mulf %67, %40 : vector<8x128xf32>
    %72 = arith.mulf %66, %70 : vector<8x128xf32>
    %73 = arith.addf %71, %72 : vector<8x128xf32>
    %74 = math.tanh %73 : vector<8x128xf32>
    %75 = arith.mulf %68, %74 : vector<8x128xf32>
    %76 = arith.truncf %75 : vector<8x128xf32> to vector<8x128xbf16>
    %c0_i32_44 = arith.constant 0 : i32
    %c0_i32_45 = arith.constant 0 : i32
    %c0_i32_46 = arith.constant 0 : i32
    %77 = tpu.memref_slice %arg8[%c0_i32_44, %c0_i32_45, %c0_i32_46] : memref<8x8x128xbf16, #tpu.memory_space<vmem>> -> memref<8x8x128xbf16, #tpu.memory_space<vmem>>
    %78 = arith.index_cast %c1_i32 : i32 to index
    %c0_47 = arith.constant 0 : index
    %c0_48 = arith.constant 0 : index
    %79 = vector.load %77[%78, %c0_47, %c0_48] : memref<8x8x128xbf16, #tpu.memory_space<vmem>>, vector<1x8x128xbf16>
    %80 = vector.shape_cast %79 : vector<1x8x128xbf16> to vector<8x128xbf16>
    %81 = vector.shape_cast %76 : vector<8x128xbf16> to vector<1x8x128xbf16>
    tpu.vector_store %77[%78, %c0_47, %c0_48], %81 {strides = array<i32>} : memref<8x8x128xbf16, #tpu.memory_space<vmem>>, vector<1x8x128xbf16>,
    %c2_i32 = arith.constant 2 : i32
    %82 = arith.truncf %75 : vector<8x128xf32> to vector<8x128xbf16>
    %c0_49 = arith.constant 0 : index
    %c0_50 = arith.constant 0 : index
    %83 = vector.load %arg6[%c0_49, %c0_50] : memref<128x512xbf16, #tpu.memory_space<vmem>>, vector<128x512xbf16>
    %cst_51 = arith.constant dense<0.000000e+00> : vector<8x512xf32>
    %84 = tpu.matmul %82, %83, %cst_51 {dimension_numbers = #tpu.dot_dimension_numbers<[1], [0], [0], [1], [0, 0, 1, 1], [], []>} : vector<8x128xbf16>, vector<128x512xbf16>, vector<8x512xf32> -> vector<8x512xf32>
    %c0_i32_52 = arith.constant 0 : i32
    %c0_i32_53 = arith.constant 0 : i32
    %c0_i32_54 = arith.constant 0 : i32
    %85 = tpu.memref_slice %arg13[%c0_i32_15, %c0_i32_52, %c0_i32_53, %c0_i32_54] : memref<2x8x8x512xf32, #tpu.memory_space<vmem>> -> memref<1x8x8x512xf32, #tpu.memory_space<vmem>>
    %86 = tpu.memref_squeeze %85 : memref<1x8x8x512xf32, #tpu.memory_space<vmem>> -> memref<8x8x512xf32, #tpu.memory_space<vmem>>
    %87 = arith.index_cast %c2_i32 : i32 to index
    %c0_55 = arith.constant 0 : index
    %c0_56 = arith.constant 0 : index
    %88 = vector.load %86[%87, %c0_55, %c0_56] : memref<8x8x512xf32, #tpu.memory_space<vmem>>, vector<1x8x512xf32>
    %89 = vector.shape_cast %88 : vector<1x8x512xf32> to vector<8x512xf32>
    %90 = arith.addf %89, %84 : vector<8x512xf32>
    %91 = vector.extract_strided_slice %90 {offsets = [0, 0], sizes = [8, 384], strides = [1, 1]} : vector<8x512xf32> to vector<8x384xf32>
    %cst_57 = arith.constant 5.000000e-01 : f32
    %92 = vector.broadcast %cst_57 : f32 to vector<8x384xf32>
    %93 = arith.mulf %92, %91 : vector<8x384xf32>
    %94 = math.tanh %93 : vector<8x384xf32>
    %cst_58 = arith.constant 5.000000e-01 : f32
    %95 = vector.broadcast %cst_58 : f32 to vector<8x384xf32>
    %96 = arith.mulf %95, %94 : vector<8x384xf32>
    %cst_59 = arith.constant 5.000000e-01 : f32
    %97 = vector.broadcast %cst_59 : f32 to vector<8x384xf32>
    %98 = arith.addf %96, %97 : vector<8x384xf32>
    %99 = vector.extract_strided_slice %98 {offsets = [0, 0], sizes = [8, 128], strides = [1, 1]} : vector<8x384xf32> to vector<8x128xf32>
    %100 = vector.extract_strided_slice %98 {offsets = [0, 128], sizes = [8, 128], strides = [1, 1]} : vector<8x384xf32> to vector<8x128xf32>
    %101 = vector.extract_strided_slice %98 {offsets = [0, 256], sizes = [8, 128], strides = [1, 1]} : vector<8x384xf32> to vector<8x128xf32>
    %102 = vector.extract_strided_slice %90 {offsets = [0, 384], sizes = [8, 128], strides = [1, 1]} : vector<8x512xf32> to vector<8x128xf32>
    %103 = math.tanh %102 : vector<8x128xf32>
    %104 = arith.mulf %100, %73 : vector<8x128xf32>
    %105 = arith.mulf %99, %103 : vector<8x128xf32>
    %106 = arith.addf %104, %105 : vector<8x128xf32>
    %107 = math.tanh %106 : vector<8x128xf32>
    %108 = arith.mulf %101, %107 : vector<8x128xf32>
    %109 = arith.truncf %108 : vector<8x128xf32> to vector<8x128xbf16>
    %c0_i32_60 = arith.constant 0 : i32
    %c0_i32_61 = arith.constant 0 : i32
    %c0_i32_62 = arith.constant 0 : i32
    %110 = tpu.memref_slice %arg8[%c0_i32_60, %c0_i32_61, %c0_i32_62] : memref<8x8x128xbf16, #tpu.memory_space<vmem>> -> memref<8x8x128xbf16, #tpu.memory_space<vmem>>
    %111 = arith.index_cast %c2_i32 : i32 to index
    %c0_63 = arith.constant 0 : index
    %c0_64 = arith.constant 0 : index
    %112 = vector.load %110[%111, %c0_63, %c0_64] : memref<8x8x128xbf16, #tpu.memory_space<vmem>>, vector<1x8x128xbf16>
    %113 = vector.shape_cast %112 : vector<1x8x128xbf16> to vector<8x128xbf16>
    %114 = vector.shape_cast %109 : vector<8x128xbf16> to vector<1x8x128xbf16>
    tpu.vector_store %110[%111, %c0_63, %c0_64], %114 {strides = array<i32>} : memref<8x8x128xbf16, #tpu.memory_space<vmem>>, vector<1x8x128xbf16>,
    %c3_i32 = arith.constant 3 : i32
    %115 = arith.truncf %108 : vector<8x128xf32> to vector<8x128xbf16>
    %c0_65 = arith.constant 0 : index
    %c0_66 = arith.constant 0 : index
    %116 = vector.load %arg6[%c0_65, %c0_66] : memref<128x512xbf16, #tpu.memory_space<vmem>>, vector<128x512xbf16>
    %cst_67 = arith.constant dense<0.000000e+00> : vector<8x512xf32>
    %117 = tpu.matmul %115, %116, %cst_67 {dimension_numbers = #tpu.dot_dimension_numbers<[1], [0], [0], [1], [0, 0, 1, 1], [], []>} : vector<8x128xbf16>, vector<128x512xbf16>, vector<8x512xf32> -> vector<8x512xf32>
    %c0_i32_68 = arith.constant 0 : i32
    %c0_i32_69 = arith.constant 0 : i32
    %c0_i32_70 = arith.constant 0 : i32
    %118 = tpu.memref_slice %arg13[%c0_i32_15, %c0_i32_68, %c0_i32_69, %c0_i32_70] : memref<2x8x8x512xf32, #tpu.memory_space<vmem>> -> memref<1x8x8x512xf32, #tpu.memory_space<vmem>>
    %119 = tpu.memref_squeeze %118 : memref<1x8x8x512xf32, #tpu.memory_space<vmem>> -> memref<8x8x512xf32, #tpu.memory_space<vmem>>
    %120 = arith.index_cast %c3_i32 : i32 to index
    %c0_71 = arith.constant 0 : index
    %c0_72 = arith.constant 0 : index
    %121 = vector.load %119[%120, %c0_71, %c0_72] : memref<8x8x512xf32, #tpu.memory_space<vmem>>, vector<1x8x512xf32>
    %122 = vector.shape_cast %121 : vector<1x8x512xf32> to vector<8x512xf32>
    %123 = arith.addf %122, %117 : vector<8x512xf32>
    %124 = vector.extract_strided_slice %123 {offsets = [0, 0], sizes = [8, 384], strides = [1, 1]} : vector<8x512xf32> to vector<8x384xf32>
    %cst_73 = arith.constant 5.000000e-01 : f32
    %125 = vector.broadcast %cst_73 : f32 to vector<8x384xf32>
    %126 = arith.mulf %125, %124 : vector<8x384xf32>
    %127 = math.tanh %126 : vector<8x384xf32>
    %cst_74 = arith.constant 5.000000e-01 : f32
    %128 = vector.broadcast %cst_74 : f32 to vector<8x384xf32>
    %129 = arith.mulf %128, %127 : vector<8x384xf32>
    %cst_75 = arith.constant 5.000000e-01 : f32
    %130 = vector.broadcast %cst_75 : f32 to vector<8x384xf32>
    %131 = arith.addf %129, %130 : vector<8x384xf32>
    %132 = vector.extract_strided_slice %131 {offsets = [0, 0], sizes = [8, 128], strides = [1, 1]} : vector<8x384xf32> to vector<8x128xf32>
    %133 = vector.extract_strided_slice %131 {offsets = [0, 128], sizes = [8, 128], strides = [1, 1]} : vector<8x384xf32> to vector<8x128xf32>
    %134 = vector.extract_strided_slice %131 {offsets = [0, 256], sizes = [8, 128], strides = [1, 1]} : vector<8x384xf32> to vector<8x128xf32>
    %135 = vector.extract_strided_slice %123 {offsets = [0, 384], sizes = [8, 128], strides = [1, 1]} : vector<8x512xf32> to vector<8x128xf32>
    %136 = math.tanh %135 : vector<8x128xf32>
    %137 = arith.mulf %133, %106 : vector<8x128xf32>
    %138 = arith.mulf %132, %136 : vector<8x128xf32>
    %139 = arith.addf %137, %138 : vector<8x128xf32>
    %140 = math.tanh %139 : vector<8x128xf32>
    %141 = arith.mulf %134, %140 : vector<8x128xf32>
    %142 = arith.truncf %141 : vector<8x128xf32> to vector<8x128xbf16>
    %c0_i32_76 = arith.constant 0 : i32
    %c0_i32_77 = arith.constant 0 : i32
    %c0_i32_78 = arith.constant 0 : i32
    %143 = tpu.memref_slice %arg8[%c0_i32_76, %c0_i32_77, %c0_i32_78] : memref<8x8x128xbf16, #tpu.memory_space<vmem>> -> memref<8x8x128xbf16, #tpu.memory_space<vmem>>
    %144 = arith.index_cast %c3_i32 : i32 to index
    %c0_79 = arith.constant 0 : index
    %c0_80 = arith.constant 0 : index
    %145 = vector.load %143[%144, %c0_79, %c0_80] : memref<8x8x128xbf16, #tpu.memory_space<vmem>>, vector<1x8x128xbf16>
    %146 = vector.shape_cast %145 : vector<1x8x128xbf16> to vector<8x128xbf16>
    %147 = vector.shape_cast %142 : vector<8x128xbf16> to vector<1x8x128xbf16>
    tpu.vector_store %143[%144, %c0_79, %c0_80], %147 {strides = array<i32>} : memref<8x8x128xbf16, #tpu.memory_space<vmem>>, vector<1x8x128xbf16>,
    %c4_i32 = arith.constant 4 : i32
    %148 = arith.truncf %141 : vector<8x128xf32> to vector<8x128xbf16>
    %c0_81 = arith.constant 0 : index
    %c0_82 = arith.constant 0 : index
    %149 = vector.load %arg6[%c0_81, %c0_82] : memref<128x512xbf16, #tpu.memory_space<vmem>>, vector<128x512xbf16>
    %cst_83 = arith.constant dense<0.000000e+00> : vector<8x512xf32>
    %150 = tpu.matmul %148, %149, %cst_83 {dimension_numbers = #tpu.dot_dimension_numbers<[1], [0], [0], [1], [0, 0, 1, 1], [], []>} : vector<8x128xbf16>, vector<128x512xbf16>, vector<8x512xf32> -> vector<8x512xf32>
    %c0_i32_84 = arith.constant 0 : i32
    %c0_i32_85 = arith.constant 0 : i32
    %c0_i32_86 = arith.constant 0 : i32
    %151 = tpu.memref_slice %arg13[%c0_i32_15, %c0_i32_84, %c0_i32_85, %c0_i32_86] : memref<2x8x8x512xf32, #tpu.memory_space<vmem>> -> memref<1x8x8x512xf32, #tpu.memory_space<vmem>>
    %152 = tpu.memref_squeeze %151 : memref<1x8x8x512xf32, #tpu.memory_space<vmem>> -> memref<8x8x512xf32, #tpu.memory_space<vmem>>
    %153 = arith.index_cast %c4_i32 : i32 to index
    %c0_87 = arith.constant 0 : index
    %c0_88 = arith.constant 0 : index
    %154 = vector.load %152[%153, %c0_87, %c0_88] : memref<8x8x512xf32, #tpu.memory_space<vmem>>, vector<1x8x512xf32>
    %155 = vector.shape_cast %154 : vector<1x8x512xf32> to vector<8x512xf32>
    %156 = arith.addf %155, %150 : vector<8x512xf32>
    %157 = vector.extract_strided_slice %156 {offsets = [0, 0], sizes = [8, 384], strides = [1, 1]} : vector<8x512xf32> to vector<8x384xf32>
    %cst_89 = arith.constant 5.000000e-01 : f32
    %158 = vector.broadcast %cst_89 : f32 to vector<8x384xf32>
    %159 = arith.mulf %158, %157 : vector<8x384xf32>
    %160 = math.tanh %159 : vector<8x384xf32>
    %cst_90 = arith.constant 5.000000e-01 : f32
    %161 = vector.broadcast %cst_90 : f32 to vector<8x384xf32>
    %162 = arith.mulf %161, %160 : vector<8x384xf32>
    %cst_91 = arith.constant 5.000000e-01 : f32
    %163 = vector.broadcast %cst_91 : f32 to vector<8x384xf32>
    %164 = arith.addf %162, %163 : vector<8x384xf32>
    %165 = vector.extract_strided_slice %164 {offsets = [0, 0], sizes = [8, 128], strides = [1, 1]} : vector<8x384xf32> to vector<8x128xf32>
    %166 = vector.extract_strided_slice %164 {offsets = [0, 128], sizes = [8, 128], strides = [1, 1]} : vector<8x384xf32> to vector<8x128xf32>
    %167 = vector.extract_strided_slice %164 {offsets = [0, 256], sizes = [8, 128], strides = [1, 1]} : vector<8x384xf32> to vector<8x128xf32>
    %168 = vector.extract_strided_slice %156 {offsets = [0, 384], sizes = [8, 128], strides = [1, 1]} : vector<8x512xf32> to vector<8x128xf32>
    %169 = math.tanh %168 : vector<8x128xf32>
    %170 = arith.mulf %166, %139 : vector<8x128xf32>
    %171 = arith.mulf %165, %169 : vector<8x128xf32>
    %172 = arith.addf %170, %171 : vector<8x128xf32>
    %173 = math.tanh %172 : vector<8x128xf32>
    %174 = arith.mulf %167, %173 : vector<8x128xf32>
    %175 = arith.truncf %174 : vector<8x128xf32> to vector<8x128xbf16>
    %c0_i32_92 = arith.constant 0 : i32
    %c0_i32_93 = arith.constant 0 : i32
    %c0_i32_94 = arith.constant 0 : i32
    %176 = tpu.memref_slice %arg8[%c0_i32_92, %c0_i32_93, %c0_i32_94] : memref<8x8x128xbf16, #tpu.memory_space<vmem>> -> memref<8x8x128xbf16, #tpu.memory_space<vmem>>
    %177 = arith.index_cast %c4_i32 : i32 to index
    %c0_95 = arith.constant 0 : index
    %c0_96 = arith.constant 0 : index
    %178 = vector.load %176[%177, %c0_95, %c0_96] : memref<8x8x128xbf16, #tpu.memory_space<vmem>>, vector<1x8x128xbf16>
    %179 = vector.shape_cast %178 : vector<1x8x128xbf16> to vector<8x128xbf16>
    %180 = vector.shape_cast %175 : vector<8x128xbf16> to vector<1x8x128xbf16>
    tpu.vector_store %176[%177, %c0_95, %c0_96], %180 {strides = array<i32>} : memref<8x8x128xbf16, #tpu.memory_space<vmem>>, vector<1x8x128xbf16>,
    %c5_i32 = arith.constant 5 : i32
    %181 = arith.truncf %174 : vector<8x128xf32> to vector<8x128xbf16>
    %c0_97 = arith.constant 0 : index
    %c0_98 = arith.constant 0 : index
    %182 = vector.load %arg6[%c0_97, %c0_98] : memref<128x512xbf16, #tpu.memory_space<vmem>>, vector<128x512xbf16>
    %cst_99 = arith.constant dense<0.000000e+00> : vector<8x512xf32>
    %183 = tpu.matmul %181, %182, %cst_99 {dimension_numbers = #tpu.dot_dimension_numbers<[1], [0], [0], [1], [0, 0, 1, 1], [], []>} : vector<8x128xbf16>, vector<128x512xbf16>, vector<8x512xf32> -> vector<8x512xf32>
    %c0_i32_100 = arith.constant 0 : i32
    %c0_i32_101 = arith.constant 0 : i32
    %c0_i32_102 = arith.constant 0 : i32
    %184 = tpu.memref_slice %arg13[%c0_i32_15, %c0_i32_100, %c0_i32_101, %c0_i32_102] : memref<2x8x8x512xf32, #tpu.memory_space<vmem>> -> memref<1x8x8x512xf32, #tpu.memory_space<vmem>>
    %185 = tpu.memref_squeeze %184 : memref<1x8x8x512xf32, #tpu.memory_space<vmem>> -> memref<8x8x512xf32, #tpu.memory_space<vmem>>
    %186 = arith.index_cast %c5_i32 : i32 to index
    %c0_103 = arith.constant 0 : index
    %c0_104 = arith.constant 0 : index
    %187 = vector.load %185[%186, %c0_103, %c0_104] : memref<8x8x512xf32, #tpu.memory_space<vmem>>, vector<1x8x512xf32>
    %188 = vector.shape_cast %187 : vector<1x8x512xf32> to vector<8x512xf32>
    %189 = arith.addf %188, %183 : vector<8x512xf32>
    %190 = vector.extract_strided_slice %189 {offsets = [0, 0], sizes = [8, 384], strides = [1, 1]} : vector<8x512xf32> to vector<8x384xf32>
    %cst_105 = arith.constant 5.000000e-01 : f32
    %191 = vector.broadcast %cst_105 : f32 to vector<8x384xf32>
    %192 = arith.mulf %191, %190 : vector<8x384xf32>
    %193 = math.tanh %192 : vector<8x384xf32>
    %cst_106 = arith.constant 5.000000e-01 : f32
    %194 = vector.broadcast %cst_106 : f32 to vector<8x384xf32>
    %195 = arith.mulf %194, %193 : vector<8x384xf32>
    %cst_107 = arith.constant 5.000000e-01 : f32
    %196 = vector.broadcast %cst_107 : f32 to vector<8x384xf32>
    %197 = arith.addf %195, %196 : vector<8x384xf32>
    %198 = vector.extract_strided_slice %197 {offsets = [0, 0], sizes = [8, 128], strides = [1, 1]} : vector<8x384xf32> to vector<8x128xf32>
    %199 = vector.extract_strided_slice %197 {offsets = [0, 128], sizes = [8, 128], strides = [1, 1]} : vector<8x384xf32> to vector<8x128xf32>
    %200 = vector.extract_strided_slice %197 {offsets = [0, 256], sizes = [8, 128], strides = [1, 1]} : vector<8x384xf32> to vector<8x128xf32>
    %201 = vector.extract_strided_slice %189 {offsets = [0, 384], sizes = [8, 128], strides = [1, 1]} : vector<8x512xf32> to vector<8x128xf32>
    %202 = math.tanh %201 : vector<8x128xf32>
    %203 = arith.mulf %199, %172 : vector<8x128xf32>
    %204 = arith.mulf %198, %202 : vector<8x128xf32>
    %205 = arith.addf %203, %204 : vector<8x128xf32>
    %206 = math.tanh %205 : vector<8x128xf32>
    %207 = arith.mulf %200, %206 : vector<8x128xf32>
    %208 = arith.truncf %207 : vector<8x128xf32> to vector<8x128xbf16>
    %c0_i32_108 = arith.constant 0 : i32
    %c0_i32_109 = arith.constant 0 : i32
    %c0_i32_110 = arith.constant 0 : i32
    %209 = tpu.memref_slice %arg8[%c0_i32_108, %c0_i32_109, %c0_i32_110] : memref<8x8x128xbf16, #tpu.memory_space<vmem>> -> memref<8x8x128xbf16, #tpu.memory_space<vmem>>
    %210 = arith.index_cast %c5_i32 : i32 to index
    %c0_111 = arith.constant 0 : index
    %c0_112 = arith.constant 0 : index
    %211 = vector.load %209[%210, %c0_111, %c0_112] : memref<8x8x128xbf16, #tpu.memory_space<vmem>>, vector<1x8x128xbf16>
    %212 = vector.shape_cast %211 : vector<1x8x128xbf16> to vector<8x128xbf16>
    %213 = vector.shape_cast %208 : vector<8x128xbf16> to vector<1x8x128xbf16>
    tpu.vector_store %209[%210, %c0_111, %c0_112], %213 {strides = array<i32>} : memref<8x8x128xbf16, #tpu.memory_space<vmem>>, vector<1x8x128xbf16>,
    %c6_i32 = arith.constant 6 : i32
    %214 = arith.truncf %207 : vector<8x128xf32> to vector<8x128xbf16>
    %c0_113 = arith.constant 0 : index
    %c0_114 = arith.constant 0 : index
    %215 = vector.load %arg6[%c0_113, %c0_114] : memref<128x512xbf16, #tpu.memory_space<vmem>>, vector<128x512xbf16>
    %cst_115 = arith.constant dense<0.000000e+00> : vector<8x512xf32>
    %216 = tpu.matmul %214, %215, %cst_115 {dimension_numbers = #tpu.dot_dimension_numbers<[1], [0], [0], [1], [0, 0, 1, 1], [], []>} : vector<8x128xbf16>, vector<128x512xbf16>, vector<8x512xf32> -> vector<8x512xf32>
    %c0_i32_116 = arith.constant 0 : i32
    %c0_i32_117 = arith.constant 0 : i32
    %c0_i32_118 = arith.constant 0 : i32
    %217 = tpu.memref_slice %arg13[%c0_i32_15, %c0_i32_116, %c0_i32_117, %c0_i32_118] : memref<2x8x8x512xf32, #tpu.memory_space<vmem>> -> memref<1x8x8x512xf32, #tpu.memory_space<vmem>>
    %218 = tpu.memref_squeeze %217 : memref<1x8x8x512xf32, #tpu.memory_space<vmem>> -> memref<8x8x512xf32, #tpu.memory_space<vmem>>
    %219 = arith.index_cast %c6_i32 : i32 to index
    %c0_119 = arith.constant 0 : index
    %c0_120 = arith.constant 0 : index
    %220 = vector.load %218[%219, %c0_119, %c0_120] : memref<8x8x512xf32, #tpu.memory_space<vmem>>, vector<1x8x512xf32>
    %221 = vector.shape_cast %220 : vector<1x8x512xf32> to vector<8x512xf32>
    %222 = arith.addf %221, %216 : vector<8x512xf32>
    %223 = vector.extract_strided_slice %222 {offsets = [0, 0], sizes = [8, 384], strides = [1, 1]} : vector<8x512xf32> to vector<8x384xf32>
    %cst_121 = arith.constant 5.000000e-01 : f32
    %224 = vector.broadcast %cst_121 : f32 to vector<8x384xf32>
    %225 = arith.mulf %224, %223 : vector<8x384xf32>
    %226 = math.tanh %225 : vector<8x384xf32>
    %cst_122 = arith.constant 5.000000e-01 : f32
    %227 = vector.broadcast %cst_122 : f32 to vector<8x384xf32>
    %228 = arith.mulf %227, %226 : vector<8x384xf32>
    %cst_123 = arith.constant 5.000000e-01 : f32
    %229 = vector.broadcast %cst_123 : f32 to vector<8x384xf32>
    %230 = arith.addf %228, %229 : vector<8x384xf32>
    %231 = vector.extract_strided_slice %230 {offsets = [0, 0], sizes = [8, 128], strides = [1, 1]} : vector<8x384xf32> to vector<8x128xf32>
    %232 = vector.extract_strided_slice %230 {offsets = [0, 128], sizes = [8, 128], strides = [1, 1]} : vector<8x384xf32> to vector<8x128xf32>
    %233 = vector.extract_strided_slice %230 {offsets = [0, 256], sizes = [8, 128], strides = [1, 1]} : vector<8x384xf32> to vector<8x128xf32>
    %234 = vector.extract_strided_slice %222 {offsets = [0, 384], sizes = [8, 128], strides = [1, 1]} : vector<8x512xf32> to vector<8x128xf32>
    %235 = math.tanh %234 : vector<8x128xf32>
    %236 = arith.mulf %232, %205 : vector<8x128xf32>
    %237 = arith.mulf %231, %235 : vector<8x128xf32>
    %238 = arith.addf %236, %237 : vector<8x128xf32>
    %239 = math.tanh %238 : vector<8x128xf32>
    %240 = arith.mulf %233, %239 : vector<8x128xf32>
    %241 = arith.truncf %240 : vector<8x128xf32> to vector<8x128xbf16>
    %c0_i32_124 = arith.constant 0 : i32
    %c0_i32_125 = arith.constant 0 : i32
    %c0_i32_126 = arith.constant 0 : i32
    %242 = tpu.memref_slice %arg8[%c0_i32_124, %c0_i32_125, %c0_i32_126] : memref<8x8x128xbf16, #tpu.memory_space<vmem>> -> memref<8x8x128xbf16, #tpu.memory_space<vmem>>
    %243 = arith.index_cast %c6_i32 : i32 to index
    %c0_127 = arith.constant 0 : index
    %c0_128 = arith.constant 0 : index
    %244 = vector.load %242[%243, %c0_127, %c0_128] : memref<8x8x128xbf16, #tpu.memory_space<vmem>>, vector<1x8x128xbf16>
    %245 = vector.shape_cast %244 : vector<1x8x128xbf16> to vector<8x128xbf16>
    %246 = vector.shape_cast %241 : vector<8x128xbf16> to vector<1x8x128xbf16>
    tpu.vector_store %242[%243, %c0_127, %c0_128], %246 {strides = array<i32>} : memref<8x8x128xbf16, #tpu.memory_space<vmem>>, vector<1x8x128xbf16>,
    %c7_i32 = arith.constant 7 : i32
    %247 = arith.truncf %240 : vector<8x128xf32> to vector<8x128xbf16>
    %c0_129 = arith.constant 0 : index
    %c0_130 = arith.constant 0 : index
    %248 = vector.load %arg6[%c0_129, %c0_130] : memref<128x512xbf16, #tpu.memory_space<vmem>>, vector<128x512xbf16>
    %cst_131 = arith.constant dense<0.000000e+00> : vector<8x512xf32>
    %249 = tpu.matmul %247, %248, %cst_131 {dimension_numbers = #tpu.dot_dimension_numbers<[1], [0], [0], [1], [0, 0, 1, 1], [], []>} : vector<8x128xbf16>, vector<128x512xbf16>, vector<8x512xf32> -> vector<8x512xf32>
    %c0_i32_132 = arith.constant 0 : i32
    %c0_i32_133 = arith.constant 0 : i32
    %c0_i32_134 = arith.constant 0 : i32
    %250 = tpu.memref_slice %arg13[%c0_i32_15, %c0_i32_132, %c0_i32_133, %c0_i32_134] : memref<2x8x8x512xf32, #tpu.memory_space<vmem>> -> memref<1x8x8x512xf32, #tpu.memory_space<vmem>>
    %251 = tpu.memref_squeeze %250 : memref<1x8x8x512xf32, #tpu.memory_space<vmem>> -> memref<8x8x512xf32, #tpu.memory_space<vmem>>
    %252 = arith.index_cast %c7_i32 : i32 to index
    %c0_135 = arith.constant 0 : index
    %c0_136 = arith.constant 0 : index
    %253 = vector.load %251[%252, %c0_135, %c0_136] : memref<8x8x512xf32, #tpu.memory_space<vmem>>, vector<1x8x512xf32>
    %254 = vector.shape_cast %253 : vector<1x8x512xf32> to vector<8x512xf32>
    %255 = arith.addf %254, %249 : vector<8x512xf32>
    %256 = vector.extract_strided_slice %255 {offsets = [0, 0], sizes = [8, 384], strides = [1, 1]} : vector<8x512xf32> to vector<8x384xf32>
    %cst_137 = arith.constant 5.000000e-01 : f32
    %257 = vector.broadcast %cst_137 : f32 to vector<8x384xf32>
    %258 = arith.mulf %257, %256 : vector<8x384xf32>
    %259 = math.tanh %258 : vector<8x384xf32>
    %cst_138 = arith.constant 5.000000e-01 : f32
    %260 = vector.broadcast %cst_138 : f32 to vector<8x384xf32>
    %261 = arith.mulf %260, %259 : vector<8x384xf32>
    %cst_139 = arith.constant 5.000000e-01 : f32
    %262 = vector.broadcast %cst_139 : f32 to vector<8x384xf32>
    %263 = arith.addf %261, %262 : vector<8x384xf32>
    %264 = vector.extract_strided_slice %263 {offsets = [0, 0], sizes = [8, 128], strides = [1, 1]} : vector<8x384xf32> to vector<8x128xf32>
    %265 = vector.extract_strided_slice %263 {offsets = [0, 128], sizes = [8, 128], strides = [1, 1]} : vector<8x384xf32> to vector<8x128xf32>
    %266 = vector.extract_strided_slice %263 {offsets = [0, 256], sizes = [8, 128], strides = [1, 1]} : vector<8x384xf32> to vector<8x128xf32>
    %267 = vector.extract_strided_slice %255 {offsets = [0, 384], sizes = [8, 128], strides = [1, 1]} : vector<8x512xf32> to vector<8x128xf32>
    %268 = math.tanh %267 : vector<8x128xf32>
    %269 = arith.mulf %265, %238 : vector<8x128xf32>
    %270 = arith.mulf %264, %268 : vector<8x128xf32>
    %271 = arith.addf %269, %270 : vector<8x128xf32>
    %272 = math.tanh %271 : vector<8x128xf32>
    %273 = arith.mulf %266, %272 : vector<8x128xf32>
    %274 = arith.truncf %273 : vector<8x128xf32> to vector<8x128xbf16>
    %c0_i32_140 = arith.constant 0 : i32
    %c0_i32_141 = arith.constant 0 : i32
    %c0_i32_142 = arith.constant 0 : i32
    %275 = tpu.memref_slice %arg8[%c0_i32_140, %c0_i32_141, %c0_i32_142] : memref<8x8x128xbf16, #tpu.memory_space<vmem>> -> memref<8x8x128xbf16, #tpu.memory_space<vmem>>
    %276 = arith.index_cast %c7_i32 : i32 to index
    %c0_143 = arith.constant 0 : index
    %c0_144 = arith.constant 0 : index
    %277 = vector.load %275[%276, %c0_143, %c0_144] : memref<8x8x128xbf16, #tpu.memory_space<vmem>>, vector<1x8x128xbf16>
    %278 = vector.shape_cast %277 : vector<1x8x128xbf16> to vector<8x128xbf16>
    %279 = vector.shape_cast %274 : vector<8x128xbf16> to vector<1x8x128xbf16>
    tpu.vector_store %275[%276, %c0_143, %c0_144], %279 {strides = array<i32>} : memref<8x8x128xbf16, #tpu.memory_space<vmem>>, vector<1x8x128xbf16>,
    %c8_i32 = arith.constant 8 : i32
    %c0_145 = arith.constant 0 : index
    %c0_146 = arith.constant 0 : index
    %280 = vector.load %arg11[%c0_145, %c0_146] : memref<8x128xf32, #tpu.memory_space<vmem>>, vector<8x128xf32>
    tpu.vector_store %arg11[%c0_145, %c0_146], %273 {strides = array<i32>} : memref<8x128xf32, #tpu.memory_space<vmem>>, vector<8x128xf32>,
    %c0_147 = arith.constant 0 : index
    %c0_148 = arith.constant 0 : index
    %281 = vector.load %arg12[%c0_147, %c0_148] : memref<8x128xf32, #tpu.memory_space<vmem>>, vector<8x128xf32>
    tpu.vector_store %arg12[%c0_147, %c0_148], %271 {strides = array<i32>} : memref<8x128xf32, #tpu.memory_space<vmem>>, vector<8x128xf32>,
    %c0_149 = arith.constant 0 : index
    %c0_150 = arith.constant 0 : index
    %282 = vector.load %arg9[%c0_149, %c0_150] : memref<8x128xf32, #tpu.memory_space<vmem>>, vector<8x128xf32>
    tpu.vector_store %arg9[%c0_149, %c0_150], %273 {strides = array<i32>} : memref<8x128xf32, #tpu.memory_space<vmem>>, vector<8x128xf32>,
    %c0_151 = arith.constant 0 : index
    %c0_152 = arith.constant 0 : index
    %283 = vector.load %arg10[%c0_151, %c0_152] : memref<8x128xf32, #tpu.memory_space<vmem>>, vector<8x128xf32>
    tpu.vector_store %arg10[%c0_151, %c0_152], %271 {strides = array<i32>} : memref<8x128xf32, #tpu.memory_space<vmem>>, vector<8x128xf32>,
    return
  }
  func.func @transform_0(%arg0: i32, %arg1: i32) -> (i32, i32, i32) {
    %c0_i32 = arith.constant 0 : i32
    %c0_i32_0 = arith.constant 0 : i32
    return %arg1, %arg0, %c0_i32 : i32, i32, i32
  }
  func.func @transform_1(%arg0: i32, %arg1: i32) -> (i32, i32) {
    %c0_i32 = arith.constant 0 : i32
    %c0_i32_0 = arith.constant 0 : i32
    return %arg0, %c0_i32 : i32, i32
  }
  func.func @transform_2(%arg0: i32, %arg1: i32) -> (i32, i32) {
    %c0_i32 = arith.constant 0 : i32
    %c0_i32_0 = arith.constant 0 : i32
    return %arg0, %c0_i32 : i32, i32
  }
  func.func @transform_3(%arg0: i32, %arg1: i32) -> (i32, i32) {
    %c0_i32 = arith.constant 0 : i32
    %c0_i32_0 = arith.constant 0 : i32
    %c0_i32_1 = arith.constant 0 : i32
    return %c0_i32, %c0_i32_0 : i32, i32
  }
  func.func @transform_4(%arg0: i32, %arg1: i32) -> (i32, i32) {
    %c0_i32 = arith.constant 0 : i32
    %c0_i32_0 = arith.constant 0 : i32
    %c0_i32_1 = arith.constant 0 : i32
    return %c0_i32, %c0_i32_0 : i32, i32
  }
  func.func @transform_5(%arg0: i32, %arg1: i32) -> (i32, i32) {
    %c0_i32 = arith.constant 0 : i32
    %c0_i32_0 = arith.constant 0 : i32
    %c0_i32_1 = arith.constant 0 : i32
    return %c0_i32, %c0_i32_0 : i32, i32
  }
  func.func @transform_6(%arg0: i32, %arg1: i32) -> (i32, i32, i32) {
    %c0_i32 = arith.constant 0 : i32
    %c0_i32_0 = arith.constant 0 : i32
    return %arg1, %arg0, %c0_i32 : i32, i32, i32
  }
  func.func @transform_7(%arg0: i32, %arg1: i32) -> (i32, i32) {
    %c0_i32 = arith.constant 0 : i32
    %c0_i32_0 = arith.constant 0 : i32
    return %arg0, %c0_i32 : i32, i32
  }
  func.func @transform_8(%arg0: i32, %arg1: i32) -> (i32, i32) {
    %c0_i32 = arith.constant 0 : i32
    %c0_i32_0 = arith.constant 0 : i32
    return %arg0, %c0_i32 : i32, i32
  }
}

</mosaic_0001>

<bundles_post_ra>
// kernel: tpu_custom_call.1
= control target key start
LH: loop header
LB: loop body
LE: loop exit
PB: predicated region body
PF: predicated region fallthrough
CT: control target
= control target key end

     0   :  { %14 = vsyncpa [#allocation6], 0  ;;  %s4459_s0 = inlined_call_operand.hbm [shape: bf16[8,8,128], index: 0, kind: input, shape index: {}]   ;;  %s4460_s1 = inlined_call_operand.hbm [shape: f32[8,128], index: 1, kind: input, shape index: {}]   ;;  %s4461_s2 = inlined_call_operand.hbm [shape: f32[8,128], index: 2, kind: input, shape index: {}]   ;;  %s4462_s3 = inlined_call_operand.hbm [shape: bf16[128,512], index: 3, kind: input, shape index: {}]   ;;  %s4463_s4 = inlined_call_operand.hbm [shape: bf16[128,512], index: 4, kind: input, shape index: {}]   ;;  %s4464_s5 = inlined_call_operand.vmem [shape: f32[1,512], index: 5, kind: input, shape index: {}]   ;;  %s4465_s6 = inlined_call_operand.hbm [shape: bf16[8,8,128], index: 6, kind: output, shape index: {0}]   ;;  %s4466_s7 = inlined_call_operand.hbm [shape: f32[8,128], index: 7, kind: output, shape index: {1}]   ;;  %s4467_s8 = inlined_call_operand.hbm [shape: f32[8,128], index: 8, kind: output, shape index: {2}]  }
   0x1   :  { %15 = vsyncpa [#allocation9], 0 }
   0x2   :  { %16 = vsyncpa [#allocation12], 0 }
   0x3   :  { %17 = vsyncpa [#allocation7], 0 }
   0x4   :  { %18 = vsyncpa [#allocation16], 0  ;;  %s3727_s27 = smov [#allocation8]   ;;  %s3728_s29 = smov [#allocation11]  }
   0x5   :  { %s37_s28 = sshll.u32 %s3727_s27, 4  ;;  %s56_s30 = sshll.u32 %s3728_s29, 4  ;;  %s38_s28 = int_to_ptr.vmem [resolvable:$true] %s37_s28  ;;  %s3785_s30 = int_to_ptr.vmem [resolvable:$true] %s56_s30 }
   0x6   :  { %s3541_s11 = scalar_lea.hbm %s4460_s1, 128 }
   0x7   :  { %p3542_p0 = scmp.ne.s32.totalorder %s4460_s1, %s3541_s11  ;;  %p3545_p1 = scmp.lt.u32.totalorder %s3541_s11, %s4460_s1 }
   0x9   :  { %p3547_p2 = pnand %p3545_p1, %p3542_p0 }
   0xb   :  { %3550 = shalt.err (!%p3547_p2)
}
   0xc   :  { %s3551_s16 = scalar_lea.vmem %s38_s28, 128  ;;  %p3556_p4 = scmp.lt.s32.totalorder %s38_s28, %s38_s28 }
   0xd   :  { %p3552_p3 = scmp.ne.s32.totalorder %s38_s28, %s3551_s16  ;;  %p3557_p5 = scmp.lt.s32.totalorder %s3551_s16, %s3551_s16 }
   0xf   :  { %p3558_p6 = por %p3557_p5, %p3556_p4 }
  0x11   :  { %p3559_p7 = pnand %p3558_p6, %p3552_p3 }
  0x13   :  { %3562 = shalt.err (!%p3559_p7)
}
  0x14   :  { %40 = dma.hbm_to_vmem [thread:$0]  %s4460_s1, 128, %s38_s28, [#allocation9]  }
  0x15   :  { %s3563_s21 = scalar_lea.hbm %s4462_s3, 4096 }
  0x16   :  { %p3564_p8 = scmp.ne.s32.totalorder %s4462_s3, %s3563_s21  ;;  %p3567_p9 = scmp.lt.u32.totalorder %s3563_s21, %s4462_s3 }
  0x18   :  { %p3569_p10 = pnand %p3567_p9, %p3564_p8 }
  0x1a   :  { %3572 = shalt.err (!%p3569_p10)
}
  0x1b   :  { %s3573_s26 = scalar_lea.vmem %s3785_s30, 4096  ;;  %p3578_p12 = scmp.lt.s32.totalorder %s3785_s30, %s3785_s30 }
  0x1c   :  { %p3574_p11 = scmp.ne.s32.totalorder %s3785_s30, %s3573_s26  ;;  %p3579_p13 = scmp.lt.s32.totalorder %s3573_s26, %s3573_s26 }
  0x1e   :  { %p3580_p0 = por %p3579_p13, %p3578_p12 }
  0x20   :  { %p3581_p1 = pnand %p3580_p0, %p3574_p11 }
  0x22   :  { %3584 = shalt.err (!%p3581_p1)
}
  0x23   :  { %s3729_s1 = smov 256   ;;  %s3730_s27 = smov 16  }
  0x24   :  { %62 = dma.hbm_to_vmem [thread:$0]  %s4462_s3, 4096, %s3785_s30, [#allocation12], %s3729_s1, %s3729_s1, %s3730_s27  }
  0x25   :  { %s3731_s9 = smov [#allocation5]   ;;  %s3585_s13 = scalar_lea.hbm %s4459_s0, 512 }
  0x26   :  { %s24_s10 = sshll.u32 %s3731_s9, 4  ;;  %p3586_p2 = scmp.ne.s32.totalorder %s4459_s0, %s3585_s13  ;;  %s25_s10 = int_to_ptr.vmem [resolvable:$true] %s24_s10 }
  0x27   :  { %p3589_p3 = scmp.lt.u32.totalorder %s3585_s13, %s4459_s0 }
  0x29   :  { %p3591_p4 = pnand %p3589_p3, %p3586_p2 }
  0x2b   :  { %3594 = shalt.err (!%p3591_p4)
}
  0x2c   :  { %s3595_s18 = scalar_lea.vmem %s25_s10, 512  ;;  %p3600_p6 = scmp.lt.s32.totalorder %s25_s10, %s25_s10 }
  0x2d   :  { %p3596_p5 = scmp.ne.s32.totalorder %s25_s10, %s3595_s18  ;;  %p3601_p7 = scmp.lt.s32.totalorder %s3595_s18, %s3595_s18 }
  0x2f   :  { %p3602_p8 = por %p3601_p7, %p3600_p6 }
  0x31   :  { %p3603_p9 = pnand %p3602_p8, %p3596_p5 }
  0x33   :  { %3606 = shalt.err (!%p3603_p9)
}
  0x34   :  { %s3732_s3 = smov 64   ;;  %s3733_s30 = smov 4  }
  0x35   :  { %30 = dma.hbm_to_vmem [thread:$0]  %s4459_s0, 512, %s25_s10, [#allocation6], %s3732_s3, %s3732_s3, %s3733_s30  }
  0x36   :  { %s3734_s21 = smov [#allocation10]   ;;  %s3735_s23 = smov [#allocation13]  }
  0x37   :  { %s47_s22 = sshll.u32 %s3734_s21, 4  ;;  %s68_s24 = sshll.u32 %s3735_s23, 4  ;;  %s48_s22 = int_to_ptr.vmem [resolvable:$true] %s47_s22  ;;  %s69_s24 = int_to_ptr.vmem [resolvable:$true] %s68_s24 }
  0x38   :  { %s3607_s28 = scalar_lea.hbm %s4461_s2, 128 }
  0x39   :  { %p3608_p10 = scmp.ne.s32.totalorder %s4461_s2, %s3607_s28  ;;  %p3611_p11 = scmp.lt.u32.totalorder %s3607_s28, %s4461_s2 }
  0x3b   :  { %p3613_p12 = pnand %p3611_p11, %p3608_p10 }
  0x3d   :  { %3616 = shalt.err (!%p3613_p12)
}
  0x3e   :  { %s3617_s0 = scalar_lea.vmem %s48_s22, 128  ;;  %p3622_p0 = scmp.lt.s32.totalorder %s48_s22, %s48_s22 }
  0x3f   :  { %p3618_p13 = scmp.ne.s32.totalorder %s48_s22, %s3617_s0  ;;  %p3623_p1 = scmp.lt.s32.totalorder %s3617_s0, %s3617_s0 }
  0x41   :  { %p3624_p2 = por %p3623_p1, %p3622_p0 }
  0x43   :  { %p3625_p3 = pnand %p3624_p2, %p3618_p13 }
  0x45   :  { %3628 = shalt.err (!%p3625_p3)
}
  0x46   :  { %50 = dma.hbm_to_vmem [thread:$0]  %s4461_s2, 128, %s48_s22, [#allocation9]  }
  0x47   :  { %s3629_s16 = scalar_lea.hbm %s4463_s4, 4096 }
  0x48   :  { %p3630_p4 = scmp.ne.s32.totalorder %s4463_s4, %s3629_s16  ;;  %p3633_p5 = scmp.lt.u32.totalorder %s3629_s16, %s4463_s4 }
  0x4a   :  { %p3635_p6 = pnand %p3633_p5, %p3630_p4 }
  0x4c   :  { %3638 = shalt.err (!%p3635_p6)
}
  0x4d   :  { %s3639_s21 = scalar_lea.vmem %s69_s24, 4096  ;;  %p3644_p8 = scmp.lt.s32.totalorder %s69_s24, %s69_s24 }
  0x4e   :  { %p3640_p7 = scmp.ne.s32.totalorder %s69_s24, %s3639_s21  ;;  %p3645_p9 = scmp.lt.s32.totalorder %s3639_s21, %s3639_s21 }
  0x50   :  { %p3646_p10 = por %p3645_p9, %p3644_p8 }
  0x52   :  { %p3647_p11 = pnand %p3646_p10, %p3640_p7 }
  0x54   :  { %3650 = shalt.err (!%p3647_p11)
}
  0x55   :  { %74 = dma.hbm_to_vmem [thread:$0]  %s4463_s4, 4096, %s69_s24, [#allocation12], %s3729_s1, %s3729_s1, %s3730_s27  }
  0x56   :  { %3717 = dma.done.wait [#allocation6], 512  }
  0x57   :  { %3718 = vsyncadd [#allocation6], 4294966784 }
  0x58   :  { %3719 = dma.done.wait [#allocation9], 256  }
  0x59   :  { %3720 = vsyncadd [#allocation9], 4294967040 }
  0x5a   :  { %3721 = dma.done.wait [#allocation12], 8192  }
  0x5b   :  { %3722 = vsyncadd [#allocation12], 4294959104  ;;  %v4468_v0 = vmov 0   ;;  %v3313_v1 = vld [vmem:[#allocation11 + $0x4] ss:$16 sps:$4 sm:$0xff]   ;;  %v3374_v44 = vld [vmem:[#allocation5 + $0x8] sm:$0xff]  }
  0x5c   :  { %379 = vmatprep.mubr.bf16.mxu0 %v4468_v0  ;;  %452 = vmatprep.mubr.bf16.mxu1 %v4468_v0  ;;  %v3315_v2 = vld [vmem:[#allocation11 + $0xc] ss:$16 sps:$4 sm:$0xff]   ;;  %v3317_v3 = vld [vmem:[#allocation11] ss:$16 sps:$4 sm:$0xff]   ;;  %v3318_v4 = vld [vmem:[#allocation11 + $0x8] ss:$16 sps:$4 sm:$0xff]  }
  0x5d   :  { %347 = vmatprep.subr.bf16.mxu0 %v3313_v1  ;;  %420 = vmatprep.subr.bf16.mxu1 %v3315_v2  ;;  %v3319_v5 = vld [vmem:[#allocation11 + $0x24] ss:$16 sps:$4 sm:$0xff]   ;;  %v3321_v6 = vld [vmem:[#allocation11 + $0x2c] ss:$16 sps:$4 sm:$0xff]   ;;  %v3323_v7 = vld [vmem:[#allocation11 + $0x20] ss:$16 sps:$4 sm:$0xff]  }
  0x5e   :  { %348 = vmatpush1.bf16.msra.mxu0 %v3317_v3  ;;  %421 = vmatpush1.bf16.msra.mxu1 %v3318_v4  ;;  %v3324_v8 = vld [vmem:[#allocation11 + $0x28] ss:$16 sps:$4 sm:$0xff]   ;;  %v3325_v9 = vld [vmem:[#allocation11 + $0x44] ss:$16 sps:$4 sm:$0xff]   ;;  %v3327_v10 = vld [vmem:[#allocation11 + $0x4c] ss:$16 sps:$4 sm:$0xff]  }
  0x5f   :  { %349 = vmatprep.subr.bf16.mxu0 %v3319_v5  ;;  %422 = vmatprep.subr.bf16.mxu1 %v3321_v6  ;;  %v3329_v11 = vld [vmem:[#allocation11 + $0x40] ss:$16 sps:$4 sm:$0xff]   ;;  %v3330_v12 = vld [vmem:[#allocation11 + $0x48] ss:$16 sps:$4 sm:$0xff]   ;;  %v3331_v13 = vld [vmem:[#allocation11 + $0x64] ss:$16 sps:$4 sm:$0xff]  }
  0x60   :  { %v3333_v14 = vld [vmem:[#allocation11 + $0x6c] ss:$16 sps:$4 sm:$0xff]   ;;  %v3335_v15 = vld [vmem:[#allocation11 + $0x60] ss:$16 sps:$4 sm:$0xff]   ;;  %v3336_v16 = vld [vmem:[#allocation11 + $0x68] ss:$16 sps:$4 sm:$0xff]  }
  0x61   :  { %v3337_v17 = vld [vmem:[#allocation11 + $0x84] ss:$16 sps:$4 sm:$0xff]   ;;  %v3339_v18 = vld [vmem:[#allocation11 + $0x8c] ss:$16 sps:$4 sm:$0xff]   ;;  %v3341_v19 = vld [vmem:[#allocation11 + $0x80] ss:$16 sps:$4 sm:$0xff]  }
  0x62   :  { %350 = vmatpush1.bf16.msra.mxu0 %v3323_v7  ;;  %423 = vmatpush1.bf16.msra.mxu1 %v3324_v8  ;;  %v3342_v20 = vld [vmem:[#allocation11 + $0x88] ss:$16 sps:$4 sm:$0xff]   ;;  %v3343_v21 = vld [vmem:[#allocation11 + $0xa4] ss:$16 sps:$4 sm:$0xff]   ;;  %v3345_v22 = vld [vmem:[#allocation11 + $0xac] ss:$16 sps:$4 sm:$0xff]   ;;  %v143_v8 = vlaneseq }
  0x63   :  { %351 = vmatprep.subr.bf16.mxu0 %v3325_v9  ;;  %424 = vmatprep.subr.bf16.mxu1 %v3327_v10  ;;  %v3347_v23 = vld [vmem:[#allocation11 + $0xa0] ss:$16 sps:$4 sm:$0xff]   ;;  %v3348_v24 = vld [vmem:[#allocation11 + $0xa8] ss:$16 sps:$4 sm:$0xff]   ;;  %v3349_v25 = vld [vmem:[#allocation11 + $0xc4] ss:$16 sps:$4 sm:$0xff]  }
  0x64   :  { %v3351_v26 = vld [vmem:[#allocation11 + $0xcc] ss:$16 sps:$4 sm:$0xff]   ;;  %v3353_v27 = vld [vmem:[#allocation11 + $0xc0] ss:$16 sps:$4 sm:$0xff]   ;;  %v3354_v28 = vld [vmem:[#allocation11 + $0xc8] ss:$16 sps:$4 sm:$0xff]  }
  0x65   :  { %v3355_v29 = vld [vmem:[#allocation11 + $0xe4] ss:$16 sps:$4 sm:$0xff]   ;;  %v3357_v30 = vld [vmem:[#allocation11 + $0xec] ss:$16 sps:$4 sm:$0xff]   ;;  %v3359_v31 = vld [vmem:[#allocation11 + $0xe0] ss:$16 sps:$4 sm:$0xff]  }
  0x66   :  { %352 = vmatpush1.bf16.msra.mxu0 %v3329_v11  ;;  %425 = vmatpush1.bf16.msra.mxu1 %v3330_v12  ;;  %v3360_v32 = vld [vmem:[#allocation11 + $0xe8] ss:$16 sps:$4 sm:$0xff]   ;;  %v3863_v33 = vld [vmem:[#allocation13 + $0x4] ss:$16 sps:$4 sm:$0xff]   ;;  %v3865_v34 = vld [vmem:[#allocation13 + $0xc] ss:$16 sps:$4 sm:$0xff]  }
  0x67   :  { %353 = vmatprep.subr.bf16.mxu0 %v3331_v13  ;;  %426 = vmatprep.subr.bf16.mxu1 %v3333_v14  ;;  %v3361_v35 = vld [vmem:[#allocation5] sm:$0xff]   ;;  %v3869_v37 = vld [vmem:[#allocation13 + $0x8] ss:$16 sps:$4 sm:$0xff]   ;;  %v3875_v39 = vld [vmem:[#allocation13 + $0x2c] ss:$16 sps:$4 sm:$0xff]   ;;  %v144_v9 = vshrl.u32 %v143_v8, 7 }
  0x68   :  { %v3867_v36 = vld [vmem:[#allocation13] ss:$16 sps:$4 sm:$0xff]   ;;  %v3873_v38 = vld [vmem:[#allocation13 + $0x24] ss:$16 sps:$4 sm:$0xff]   ;;  %v3881_v41 = vld [vmem:[#allocation13 + $0x28] ss:$16 sps:$4 sm:$0xff]  }
  0x69   :  { %v3877_v40 = vld [vmem:[#allocation13 + $0x20] ss:$16 sps:$4 sm:$0xff]   ;;  %v3885_v42 = vld [vmem:[#allocation13 + $0x44] ss:$16 sps:$4 sm:$0xff]   ;;  %v3887_v43 = vld [vmem:[#allocation13 + $0x4c] ss:$16 sps:$4 sm:$0xff]  }
  0x6a   :  { %354 = vmatpush1.bf16.msra.mxu0 %v3335_v15  ;;  %427 = vmatpush1.bf16.msra.mxu1 %v3336_v16  ;;  %v3891_v45 = vld [vmem:[#allocation13 + $0x40] ss:$16 sps:$4 sm:$0xff]   ;;  %v3893_v46 = vld [vmem:[#allocation13 + $0x48] ss:$16 sps:$4 sm:$0xff]   ;;  %v3897_v47 = vld [vmem:[#allocation13 + $0x64] ss:$16 sps:$4 sm:$0xff]  }
  0x6b   :  { %355 = vmatprep.subr.bf16.mxu0 %v3337_v17  ;;  %428 = vmatprep.subr.bf16.mxu1 %v3339_v18  ;;  %v3901_v48 = vld [vmem:[#allocation13 + $0x6c] ss:$16 sps:$4 sm:$0xff]   ;;  %v3903_v49 = vld [vmem:[#allocation13 + $0x60] ss:$16 sps:$4 sm:$0xff]   ;;  %v3905_v50 = vld [vmem:[#allocation13 + $0x68] ss:$16 sps:$4 sm:$0xff]  }
  0x6c   :  { %v3909_v51 = vld [vmem:[#allocation13 + $0x84] ss:$16 sps:$4 sm:$0xff]   ;;  %v3913_v52 = vld [vmem:[#allocation13 + $0x8c] ss:$16 sps:$4 sm:$0xff]   ;;  %v3917_v54 = vld [vmem:[#allocation13 + $0x80] ss:$16 sps:$4 sm:$0xff]  }
  0x6d   :  { %v3387_v53 = vld [vmem:[#allocation5 + $0x10] sm:$0xff]   ;;  %v3919_v55 = vld [vmem:[#allocation13 + $0x88] ss:$16 sps:$4 sm:$0xff]   ;;  %v3923_v57 = vld [vmem:[#allocation13 + $0xac] ss:$16 sps:$4 sm:$0xff]   ;;  %v153_v10 = vsub.s32 2, %v144_v9 }
  0x6e   :  { %356 = vmatpush1.bf16.msra.mxu0 %v3341_v19  ;;  %429 = vmatpush1.bf16.msra.mxu1 %v3342_v20  ;;  %v3921_v56 = vld [vmem:[#allocation13 + $0xa4] ss:$16 sps:$4 sm:$0xff]   ;;  %v3929_v58 = vld [vmem:[#allocation13 + $0xa0] ss:$16 sps:$4 sm:$0xff]   ;;  %v3931_v59 = vld [vmem:[#allocation13 + $0xa8] ss:$16 sps:$4 sm:$0xff]  }
  0x6f   :  { %357 = vmatprep.subr.bf16.mxu0 %v3343_v21  ;;  %430 = vmatprep.subr.bf16.mxu1 %v3345_v22  ;;  %v3933_v60 = vld [vmem:[#allocation13 + $0xc4] ss:$16 sps:$4 sm:$0xff]   ;;  %v3935_v61 = vld [vmem:[#allocation13 + $0xcc] ss:$16 sps:$4 sm:$0xff]   ;;  %v3943_v63 = vld [vmem:[#allocation13 + $0xc0] ss:$16 sps:$4 sm:$0xff]  }
  0x70   :  { %v3400_v62 = vld [vmem:[#allocation5 + $0x18] sm:$0xff]   ;;  %v3947_v2 = vld [vmem:[#allocation13 + $0xe4] ss:$16 sps:$4 sm:$0xff]   ;;  %v3957_v4 = vld [vmem:[#allocation13 + $0xe0] ss:$16 sps:$4 sm:$0xff]   ;;  %v157_v11 = vsub.s32 3, %v144_v9 }
  0x71   :  { %v3945_v1 = vld [vmem:[#allocation13 + $0xc8] ss:$16 sps:$4 sm:$0xff]   ;;  %v3949_v3 = vld [vmem:[#allocation13 + $0xec] ss:$16 sps:$4 sm:$0xff]   ;;  %v97_v6 = vld [vmem:[#allocation8] sm:$0xff]  ;;  %v145_v12 = vsub.s32 0, %v144_v9 }
  0x72   :  { %358 = vmatpush1.bf16.msra.mxu0 %v3347_v23  ;;  %431 = vmatpush1.bf16.msra.mxu1 %v3348_v24  ;;  %v3959_v5 = vld [vmem:[#allocation13 + $0xe8] ss:$16 sps:$4 sm:$0xff]   ;;  %v527_v7 = vpack.c.bf16 %v97_v6, %v97_v6  ;;  %v141_v13 = vld [vmem:[%s4464_s5] sm:$0xf]  ;;  %v149_v14 = vsub.s32 1, %v144_v9  ;;  %s3737_s5 = smov [#allocation15]  }
  0x73   :  { %359 = vmatprep.subr.bf16.mxu0 %v3349_v25  ;;  %432 = vmatprep.subr.bf16.mxu1 %v3351_v26  ;;  %v4006_v15 = vrot.slane %v141_v13, %v153_v10  ;;  %v4012_v18 = vrot.slane %v141_v13, %v157_v11  ;;  %v146_v19 = vrot.slane %v141_v13, %v145_v12  ;;  %s2980_s27 = sshll.u32 %s3737_s5, 4  ;;  %s3738_s23 = smov [#allocation17]   ;;  %s2981_s27 = int_to_ptr.vmem [resolvable:$true] %s2980_s27 }
  0x74   :  { %v150_v22 = vrot.slane %v141_v13, %v149_v14  ;;  %s2990_s24 = sshll.u32 %s3738_s23, 4  ;;  %s3739_s25 = smov [#allocation14]   ;;  %s4406_s24 = int_to_ptr.vmem [resolvable:$true] %s2990_s24 }
  0x75   :  { %s2967_s26 = sshll.u32 %s3739_s25, 4  ;;  %s3651_s28 = scalar_lea.vmem %s2981_s27, 128  ;;  %s4408_s26 = int_to_ptr.vmem [resolvable:$true] %s2967_s26 }
  0x76   :  { %360 = vmatpush1.bf16.msra.mxu0 %v3353_v27  ;;  %433 = vmatpush1.bf16.msra.mxu1 %v3354_v28  ;;  %p3652_p12 = scmp.ne.s32.totalorder %s2981_s27, %s3651_s28  ;;  %p3656_p13 = scmp.lt.s32.totalorder %s2981_s27, %s2981_s27 }
  0x77   :  { %361 = vmatprep.subr.bf16.mxu0 %v3355_v29  ;;  %434 = vmatprep.subr.bf16.mxu1 %v3357_v30  ;;  %p3657_p0 = scmp.lt.s32.totalorder %s3651_s28, %s3651_s28 }
  0x79   :  { %p3658_p1 = por %p3657_p0, %p3656_p13 }
  0x7a   :  { %362 = vmatpush1.bf16.msra.mxu0 %v3359_v31  ;;  %435 = vmatpush1.bf16.msra.mxu1 %v3360_v32 }
  0x7b   :  { %720 = vmatprep.subr.bf16.mxu0 %v3863_v33  ;;  %761 = vmatprep.subr.bf16.mxu1 %v3865_v34  ;;  %p3659_p2 = pnand %p3658_p1, %p3652_p12 }
  0x7d   :  { %380 = vmatmul.mubr.bf16.vlgmr.msra.gmra.mrb[0].mxu0 %v3361_v35  ;;  %453 = vmatmul.mubr.bf16.vlgmr.msra.gmra.mrb[0].mxu1 %v3361_v35 }
  0x7e   :  { %721 = vmatpush1.bf16.msra.mxu0 %v3867_v36  ;;  %762 = vmatpush1.bf16.msra.mxu1 %v3869_v37 }
  0x7f   :  { %722 = vmatprep.subr.bf16.mxu0 %v3873_v38  ;;  %763 = vmatprep.subr.bf16.mxu1 %v3875_v39 }
  0x80   :  { %389 = vmatprep.mubr.bf16.mxu0 %v4468_v0  ;;  %462 = vmatprep.mubr.bf16.mxu1 %v4468_v0 }
  0x82   :  { %723 = vmatpush1.bf16.msra.mxu0 %v3877_v40  ;;  %764 = vmatpush1.bf16.msra.mxu1 %v3881_v41 }
  0x83   :  { %724 = vmatprep.subr.bf16.mxu0 %v3885_v42  ;;  %765 = vmatprep.subr.bf16.mxu1 %v3887_v43 }
  0x85   :  { %390 = vmatmul.mubr.bf16.gmra.mrb[4].mxu0 %v3374_v44  ;;  %463 = vmatmul.mubr.bf16.gmra.mrb[4].mxu1 %v3374_v44 }
  0x86   :  { %725 = vmatpush1.bf16.msra.mxu0 %v3891_v45  ;;  %766 = vmatpush1.bf16.msra.mxu1 %v3893_v46 }
  0x87   :  { %726 = vmatprep.subr.bf16.mxu0 %v3897_v47  ;;  %767 = vmatprep.subr.bf16.mxu1 %v3901_v48 }
  0x88   :  { %399 = vmatprep.mubr.bf16.mxu0 %v4468_v0  ;;  %472 = vmatprep.mubr.bf16.mxu1 %v4468_v0 }
  0x8a   :  { %727 = vmatpush1.bf16.msra.mxu0 %v3903_v49  ;;  %768 = vmatpush1.bf16.msra.mxu1 %v3905_v50 }
  0x8b   :  { %728 = vmatprep.subr.bf16.mxu0 %v3909_v51  ;;  %769 = vmatprep.subr.bf16.mxu1 %v3913_v52 }
  0x8d   :  { %400 = vmatmul.mubr.bf16.gmra.mrb[8].mxu0 %v3387_v53  ;;  %473 = vmatmul.mubr.bf16.gmra.mrb[8].mxu1 %v3387_v53 }
  0x8e   :  { %729 = vmatpush1.bf16.msra.mxu0 %v3917_v54  ;;  %770 = vmatpush1.bf16.msra.mxu1 %v3919_v55 }
  0x8f   :  { %730 = vmatprep.subr.bf16.mxu0 %v3921_v56  ;;  %771 = vmatprep.subr.bf16.mxu1 %v3923_v57 }
  0x90   :  { %409 = vmatprep.mubr.bf16.mxu0 %v4468_v0  ;;  %482 = vmatprep.mubr.bf16.mxu1 %v4468_v0 }
  0x92   :  { %731 = vmatpush1.bf16.msra.mxu0 %v3929_v58  ;;  %772 = vmatpush1.bf16.msra.mxu1 %v3931_v59 }
  0x93   :  { %732 = vmatprep.subr.bf16.mxu0 %v3933_v60  ;;  %773 = vmatprep.subr.bf16.mxu1 %v3935_v61 }
  0x95   :  { %410 = vmatmul.mubr.bf16.gmra.mrb[12].mxu0 %v3400_v62  ;;  %483 = vmatmul.mubr.bf16.gmra.mrb[12].mxu1 %v3400_v62 }
  0x96   :  { %733 = vmatpush1.bf16.msra.mxu0 %v3943_v63  ;;  %774 = vmatpush1.bf16.msra.mxu1 %v3945_v1 }
  0x97   :  { %734 = vmatprep.subr.bf16.mxu0 %v3947_v2  ;;  %775 = vmatprep.subr.bf16.mxu1 %v3949_v3 }
  0x98   :  { %752 = vmatprep.mubr.bf16.mxu0 %v4468_v0  ;;  %793 = vmatprep.mubr.bf16.mxu1 %v4468_v0 }
  0x9a   :  { %735 = vmatpush1.bf16.msra.mxu0 %v3957_v4  ;;  %776 = vmatpush1.bf16.msra.mxu1 %v3959_v5 }
  0x9b   :  { %1022 = vmatprep.subr.bf16.mxu0 %v3863_v33  ;;  %1063 = vmatprep.subr.bf16.mxu1 %v3865_v34 }
  0x9d   :  { %753 = vmatmul.mubr.bf16.vlgmr.msra.gmra.mrb[16].mxu0 %v527_v7  ;;  %794 = vmatmul.mubr.bf16.vlgmr.msra.gmra.mrb[16].mxu1 %v527_v7 }
  0x9e   :  { %1023 = vmatpush1.bf16.msra.mxu0 %v3867_v36  ;;  %1064 = vmatpush1.bf16.msra.mxu1 %v3869_v37 }
  0x9f   :  { %1024 = vmatprep.subr.bf16.mxu0 %v3873_v38  ;;  %1065 = vmatprep.subr.bf16.mxu1 %v3875_v39 }
  0xa0   :  { %1054 = vmatprep.mubr.bf16.mxu0 %v4468_v0  ;;  %1095 = vmatprep.mubr.bf16.mxu1 %v4468_v0 }
  0xa2   :  { %1025 = vmatpush1.bf16.msra.mxu0 %v3877_v40  ;;  %1066 = vmatpush1.bf16.msra.mxu1 %v3881_v41 }
  0xa3   :  { %1026 = vmatprep.subr.bf16.mxu0 %v3885_v42  ;;  %1067 = vmatprep.subr.bf16.mxu1 %v3887_v43 }
  0xa6   :  { %1027 = vmatpush1.bf16.msra.mxu0 %v3891_v45  ;;  %1068 = vmatpush1.bf16.msra.mxu1 %v3893_v46 }
  0xa7   :  { %1028 = vmatprep.subr.bf16.mxu0 %v3897_v47  ;;  %1069 = vmatprep.subr.bf16.mxu1 %v3901_v48 }
  0xaa   :  { %1029 = vmatpush1.bf16.msra.mxu0 %v3903_v49  ;;  %1070 = vmatpush1.bf16.msra.mxu1 %v3905_v50 }
  0xab   :  { %1030 = vmatprep.subr.bf16.mxu0 %v3909_v51  ;;  %1071 = vmatprep.subr.bf16.mxu1 %v3913_v52 }
  0xae   :  { %1031 = vmatpush1.bf16.msra.mxu0 %v3917_v54  ;;  %1072 = vmatpush1.bf16.msra.mxu1 %v3919_v55 }
  0xaf   :  { %1032 = vmatprep.subr.bf16.mxu0 %v3921_v56  ;;  %1073 = vmatprep.subr.bf16.mxu1 %v3923_v57 }
  0xb2   :  { %1033 = vmatpush1.bf16.msra.mxu0 %v3929_v58  ;;  %1074 = vmatpush1.bf16.msra.mxu1 %v3931_v59 }
  0xb3   :  { %1034 = vmatprep.subr.bf16.mxu0 %v3933_v60  ;;  %1075 = vmatprep.subr.bf16.mxu1 %v3935_v61 }
  0xb6   :  { %1035 = vmatpush1.bf16.msra.mxu0 %v3943_v63  ;;  %1076 = vmatpush1.bf16.msra.mxu1 %v3945_v1 }
  0xb7   :  { %1036 = vmatprep.subr.bf16.mxu0 %v3947_v2  ;;  %1077 = vmatprep.subr.bf16.mxu1 %v3949_v3 }
  0xba   :  { %1037 = vmatpush1.bf16.msra.mxu0 %v3957_v4  ;;  %1078 = vmatpush1.bf16.msra.mxu1 %v3959_v5 }
  0xbb   :  { %1326 = vmatprep.subr.bf16.mxu0 %v3863_v33  ;;  %1367 = vmatprep.subr.bf16.mxu1 %v3865_v34 }
 0x150   :  { %v4008_v16 = vpop.f32.mrb[0].mxu0  ;;  %v4010_v17 = vpop.f32.mrb[0].mxu1 }
 0x151   :  { %v383_v20 = vpop.f32.mrb[1].mxu0  ;;  %v456_v21 = vpop.f32.mrb[1].mxu1 }
 0x152   :  { %v385_v23 = vpop.f32.mrb[2].mxu0  ;;  %v458_v24 = vpop.f32.mrb[2].mxu1 }
 0x153   :  { %v4014_v25 = vadd.f32 %v385_v23, %v146_v19  ;;  %v387_v26 = vpop.f32.mrb[3].mxu0  ;;  %v4017_v27 = vadd.f32 %v458_v24, %v4006_v15  ;;  %v460_v28 = vpop.f32.mrb[3].mxu1 }
 0x154   :  { %v4019_v29 = vadd.f32 %v387_v26, %v150_v22  ;;  %v4022_v30 = vadd.f32 %v460_v28, %v4012_v18 }
 0x158   :  { %v391_v31 = vpop.f32.mrb[4].mxu0  ;;  %v464_v32 = vpop.f32.mrb[4].mxu1 }
 0x159   :  { %v4024_v35 = vadd.f32 %v391_v31, %v146_v19  ;;  %v393_v44 = vpop.f32.mrb[5].mxu0  ;;  %v4027_v53 = vadd.f32 %v464_v32, %v4006_v15  ;;  %v466_v62 = vpop.f32.mrb[5].mxu1 }
 0x15a   :  { %v4029_v6 = vadd.f32 %v393_v44, %v150_v22  ;;  %v395_v7 = vpop.f32.mrb[6].mxu0  ;;  %v4032_v8 = vadd.f32 %v466_v62, %v4012_v18  ;;  %v468_v9 = vpop.f32.mrb[6].mxu1 }
 0x15b   :  { %v4034_v10 = vadd.f32 %v395_v7, %v146_v19  ;;  %v397_v11 = vpop.f32.mrb[7].mxu0  ;;  %v4037_v12 = vadd.f32 %v468_v9, %v4006_v15  ;;  %v470_v13 = vpop.f32.mrb[7].mxu1 }
 0x15c   :  { %4470 = vst [vmem:[#allocation23_spill] sm:$0xff] %v4032_v8  ;;  %v4039_v14 = vadd.f32 %v397_v11, %v150_v22  ;;  %v4042_v23 = vadd.f32 %v470_v13, %v4012_v18 }
 0x15d   :  { %4471 = vst [vmem:[#allocation24_spill] sm:$0xff] %v4034_v10  ;;  %4472 = vst [vmem:[#allocation25_spill] sm:$0xff] %v4037_v12 }
 0x15e   :  { %4473 = vst [vmem:[#allocation26_spill] sm:$0xff] %v4039_v14  ;;  %4474 = vst [vmem:[#allocation27_spill] sm:$0xff] %v4042_v23 }
 0x160   :  { %v401_v24 = vpop.f32.mrb[8].mxu0  ;;  %v474_v26 = vpop.f32.mrb[8].mxu1 }
 0x161   :  { %v4044_v28 = vadd.f32 %v401_v24, %v146_v19  ;;  %v403_v31 = vpop.f32.mrb[9].mxu0  ;;  %v4047_v32 = vadd.f32 %v474_v26, %v4006_v15  ;;  %v476_v44 = vpop.f32.mrb[9].mxu1 }
 0x162   :  { %v4049_v62 = vadd.f32 %v403_v31, %v150_v22  ;;  %v405_v7 = vpop.f32.mrb[10].mxu0  ;;  %v4052_v9 = vadd.f32 %v476_v44, %v4012_v18  ;;  %v478_v11 = vpop.f32.mrb[10].mxu1 }
 0x163   :  { %4475 = vst [vmem:[#allocation28_spill] sm:$0xff] %v4044_v28  ;;  %4476 = vst [vmem:[#allocation29_spill] sm:$0xff] %v4047_v32  ;;  %v4054_v0 = vadd.f32 %v405_v7, %v146_v19  ;;  %v407_v13 = vpop.f32.mrb[11].mxu0  ;;  %v4057_v23 = vadd.f32 %v478_v11, %v4006_v15  ;;  %v480_v24 = vpop.f32.mrb[11].mxu1 }
 0x164   :  { %4477 = vst [vmem:[#allocation30_spill] sm:$0xff] %v4049_v62  ;;  %4478 = vst [vmem:[#allocation31_spill] sm:$0xff] %v4052_v9  ;;  %v4059_v28 = vadd.f32 %v407_v13, %v150_v22  ;;  %v4062_v26 = vadd.f32 %v480_v24, %v4012_v18 }
 0x165   :  { %4479 = vst [vmem:[#allocation32_spill] sm:$0xff] %v4054_v0  ;;  %4480 = vst [vmem:[#allocation33_spill] sm:$0xff] %v4057_v23 }
 0x166   :  { %4481 = vst [vmem:[#allocation34_spill] sm:$0xff] %v4059_v28  ;;  %4482 = vst [vmem:[#allocation35_spill] sm:$0xff] %v4062_v26 }
 0x168   :  { %v411_v32 = vpop.f32.mrb[12].mxu0  ;;  %v484_v31 = vpop.f32.mrb[12].mxu1 }
 0x169   :  { %v4064_v62 = vadd.f32 %v411_v32, %v146_v19  ;;  %v413_v14 = vpop.f32.mrb[13].mxu0  ;;  %v4067_v44 = vadd.f32 %v484_v31, %v4006_v15  ;;  %v486_v7 = vpop.f32.mrb[13].mxu1 }
 0x16a   :  { %v4069_v0 = vadd.f32 %v413_v14, %v150_v22  ;;  %v415_v9 = vpop.f32.mrb[14].mxu0  ;;  %v4072_v11 = vadd.f32 %v486_v7, %v4012_v18  ;;  %v488_v13 = vpop.f32.mrb[14].mxu1  ;;  %v382_v14 = vadd.f32 %v4008_v16, %v146_v19  ;;  %v384_v7 = vadd.f32 %v383_v20, %v150_v22 }
 0x16b   :  { %4483 = vst [vmem:[#allocation36_spill] sm:$0xff] %v4064_v62  ;;  %4484 = vst [vmem:[#allocation37_spill] sm:$0xff] %v4067_v44  ;;  %v4074_v28 = vadd.f32 %v415_v9, %v146_v19  ;;  %v417_v24 = vpop.f32.mrb[15].mxu0  ;;  %v4077_v26 = vadd.f32 %v488_v13, %v4006_v15  ;;  %v490_v32 = vpop.f32.mrb[15].mxu1 }
 0x16c   :  { %4485 = vst [vmem:[#allocation38_spill] sm:$0xff] %v4069_v0  ;;  %4486 = vst [vmem:[#allocation39_spill] sm:$0xff] %v4072_v11  ;;  %v4079_v62 = vadd.f32 %v417_v24, %v150_v22  ;;  %v4082_v31 = vadd.f32 %v490_v32, %v4012_v18  ;;  %v455_v0 = vadd.f32 %v4010_v17, %v4006_v15  ;;  %v99_v22 = vld [vmem:[#allocation10] sm:$0xff] }
 0x16d   :  { %4487 = vst [vmem:[#allocation40_spill] sm:$0xff] %v4074_v28  ;;  %4488 = vst [vmem:[#allocation41_spill] sm:$0xff] %v4077_v26  ;;  %v457_v11 = vadd.f32 %v456_v21, %v4012_v18 }
 0x16e   :  { %4489 = vst [vmem:[#allocation42_spill] sm:$0xff] %v4079_v62  ;;  %4490 = vst [vmem:[#allocation43_spill] sm:$0xff] %v4082_v31 }
 0x170   :  { %v754_v9 = vpop.f32.mrb[16].mxu0  ;;  %v795_v28 = vpop.f32.mrb[16].mxu1 }
 0x171   :  { %v806_v44 = vadd.f32 %v754_v9, %v382_v14  ;;  %v808_v23 = vadd.f32 %v795_v28, %v455_v0  ;;  %v756_v13 = vpop.f32.mrb[17].mxu0  ;;  %v797_v26 = vpop.f32.mrb[17].mxu1  ;;  %v4491_v14 = vmov 0  }
 0x172   :  { %v807_v12 = vadd.f32 %v756_v13, %v384_v7  ;;  %v809_v24 = vadd.f32 %v797_v26, %v457_v11  ;;  %v758_v62 = vpop.f32.mrb[18].mxu0  ;;  %v799_v10 = vpop.f32.mrb[18].mxu1 }
 0x173   :  { %v810_v32 = vmul.f32 0.5, %v806_v44  ;;  %v759_v31 = vpop.f32.mrb[19].mxu0  ;;  %v800_v8 = vpop.f32.mrb[19].mxu1  ;;  %v812_v15 = vmul.f32 0.5, %v808_v23 }
 0x174   :  { %v811_v16 = vmul.f32 0.5, %v807_v12 }
 0x175   :  { %3461 = vtanh.f32 %v810_v32 }
 0x176   :  { %3463 = vtanh.f32 %v811_v16 }
 0x177   :  { %3465 = vtanh.f32 %v809_v24 }
 0x178   :  { %3467 = vtanh.f32 %v812_v15 }
 0x17f   :  { %v3462_v17 = vpop.eup %3461 }
 0x180   :  { %v816_v18 = vmul.f32 0.5, %v3462_v17  ;;  %v3464_v19 = vpop.eup %3463 }
 0x181   :  { %v817_v0 = vmul.f32 0.5, %v3464_v19  ;;  %v3466_v21 = vpop.eup %3465 }
 0x182   :  { %v819_v20 = vadd.f32 0.5, %v816_v18  ;;  %v3468_v8 = vpop.eup %3467 }
 0x183   :  { %v820_v28 = vadd.f32 0.5, %v817_v0  ;;  %v818_v12 = vmul.f32 0.5, %v3468_v8 }
 0x184   :  { %v824_v26 = vmul.f32 %v3466_v21, %v819_v20 }
 0x185   :  { %v823_v62 = vmul.f32 %v820_v28, %v99_v22  ;;  %v821_v44 = vadd.f32 0.5, %v818_v12 }
 0x187   :  { %v4088_v10 = vadd.f32 %v824_v26, %v823_v62 }
 0x189   :  { %3469 = vtanh.f32 %v4088_v10 }
 0x193   :  { %v3470_v11 = vpop.eup %3469 }
 0x194   :  { %v827_v23 = vmul.f32 %v3470_v11, %v821_v44 }
 0x196   :  { %v828_v31 = vpack.c.bf16 %v827_v23, %v827_v23 }
 0x198   :  { %829 = vst [vmem:[#allocation14] sm:$0xf] %v828_v31  ;;  %1055 = vmatmul.mubr.bf16.vlgmr.msra.gmra.mrb[20].mxu0 %v828_v31  ;;  %1096 = vmatmul.mubr.bf16.vlgmr.msra.gmra.mrb[20].mxu1 %v828_v31 }
 0x199   :  { %1327 = vmatpush1.bf16.msra.mxu0 %v3867_v36  ;;  %1368 = vmatpush1.bf16.msra.mxu1 %v3869_v37 }
 0x19a   :  { %1328 = vmatprep.subr.bf16.mxu0 %v3873_v38  ;;  %1369 = vmatprep.subr.bf16.mxu1 %v3875_v39 }
 0x19b   :  { %1358 = vmatprep.mubr.bf16.mxu0 %v4491_v14  ;;  %1399 = vmatprep.mubr.bf16.mxu1 %v4491_v14 }
 0x19d   :  { %1329 = vmatpush1.bf16.msra.mxu0 %v3877_v40  ;;  %1370 = vmatpush1.bf16.msra.mxu1 %v3881_v41 }
 0x19e   :  { %1330 = vmatprep.subr.bf16.mxu0 %v3885_v42  ;;  %1371 = vmatprep.subr.bf16.mxu1 %v3887_v43 }
 0x1a1   :  { %1331 = vmatpush1.bf16.msra.mxu0 %v3891_v45  ;;  %1372 = vmatpush1.bf16.msra.mxu1 %v3893_v46 }
 0x1a2   :  { %1332 = vmatprep.subr.bf16.mxu0 %v3897_v47  ;;  %1373 = vmatprep.subr.bf16.mxu1 %v3901_v48 }
 0x1a5   :  { %1333 = vmatpush1.bf16.msra.mxu0 %v3903_v49  ;;  %1374 = vmatpush1.bf16.msra.mxu1 %v3905_v50 }
 0x1a6   :  { %1334 = vmatprep.subr.bf16.mxu0 %v3909_v51  ;;  %1375 = vmatprep.subr.bf16.mxu1 %v3913_v52 }
 0x1a9   :  { %1335 = vmatpush1.bf16.msra.mxu0 %v3917_v54  ;;  %1376 = vmatpush1.bf16.msra.mxu1 %v3919_v55 }
 0x1aa   :  { %1336 = vmatprep.subr.bf16.mxu0 %v3921_v56  ;;  %1377 = vmatprep.subr.bf16.mxu1 %v3923_v57 }
 0x1ad   :  { %1337 = vmatpush1.bf16.msra.mxu0 %v3929_v58  ;;  %1378 = vmatpush1.bf16.msra.mxu1 %v3931_v59 }
 0x1ae   :  { %1338 = vmatprep.subr.bf16.mxu0 %v3933_v60  ;;  %1379 = vmatprep.subr.bf16.mxu1 %v3935_v61 }
 0x1b1   :  { %1339 = vmatpush1.bf16.msra.mxu0 %v3943_v63  ;;  %1380 = vmatpush1.bf16.msra.mxu1 %v3945_v1 }
 0x1b2   :  { %1340 = vmatprep.subr.bf16.mxu0 %v3947_v2  ;;  %1381 = vmatprep.subr.bf16.mxu1 %v3949_v3 }
 0x1b5   :  { %1341 = vmatpush1.bf16.msra.mxu0 %v3957_v4  ;;  %1382 = vmatpush1.bf16.msra.mxu1 %v3959_v5 }
 0x1b6   :  { %1630 = vmatprep.subr.bf16.mxu0 %v3863_v33  ;;  %1671 = vmatprep.subr.bf16.mxu1 %v3865_v34 }
 0x26b   :  { %v1056_v7 = vpop.f32.mrb[20].mxu0  ;;  %v1097_v9 = vpop.f32.mrb[20].mxu1 }
 0x26c   :  { %v1109_v13 = vadd.f32 %v1056_v7, %v4014_v25  ;;  %v1111_v24 = vadd.f32 %v1097_v9, %v4017_v27  ;;  %v1058_v32 = vpop.f32.mrb[21].mxu0  ;;  %v1099_v16 = vpop.f32.mrb[21].mxu1 }
 0x26d   :  { %v1110_v15 = vadd.f32 %v1058_v32, %v4019_v29  ;;  %v1112_v17 = vadd.f32 %v1099_v16, %v4022_v30  ;;  %v1060_v18 = vpop.f32.mrb[22].mxu0  ;;  %v1101_v19 = vpop.f32.mrb[22].mxu1  ;;  %v4187_v32 = vld [vmem:[#allocation13 + $0x24] ss:$16 sps:$4 sm:$0xff]   ;;  %v4189_v16 = vld [vmem:[#allocation13 + $0x2c] ss:$16 sps:$4 sm:$0xff]  }
 0x26e   :  { %v1113_v20 = vmul.f32 0.5, %v1109_v13  ;;  %v1061_v0 = vpop.f32.mrb[23].mxu0  ;;  %v1102_v21 = vpop.f32.mrb[23].mxu1  ;;  %v1115_v34 = vmul.f32 0.5, %v1111_v24  ;;  %v4179_v13 = vld [vmem:[#allocation13] ss:$16 sps:$4 sm:$0xff]  }
 0x26f   :  { %v1114_v33 = vmul.f32 0.5, %v1110_v15  ;;  %v4181_v24 = vld [vmem:[#allocation13 + $0x8] ss:$16 sps:$4 sm:$0xff]   ;;  %v4191_v15 = vld [vmem:[#allocation13 + $0x20] ss:$16 sps:$4 sm:$0xff]  }
 0x270   :  { %3471 = vtanh.f32 %v1113_v20  ;;  %v4199_v18 = vld [vmem:[#allocation13 + $0x44] ss:$16 sps:$4 sm:$0xff]   ;;  %v4201_v19 = vld [vmem:[#allocation13 + $0x4c] ss:$16 sps:$4 sm:$0xff]   ;;  %v4203_v20 = vld [vmem:[#allocation13 + $0x40] ss:$16 sps:$4 sm:$0xff]  }
 0x271   :  { %3473 = vtanh.f32 %v1114_v33  ;;  %v4205_v0 = vld [vmem:[#allocation13 + $0x48] ss:$16 sps:$4 sm:$0xff]   ;;  %v4211_v21 = vld [vmem:[#allocation13 + $0x64] ss:$16 sps:$4 sm:$0xff]   ;;  %v4213_v33 = vld [vmem:[#allocation13 + $0x6c] ss:$16 sps:$4 sm:$0xff]  }
 0x272   :  { %3475 = vtanh.f32 %v1112_v17  ;;  %v4193_v17 = vld [vmem:[#allocation13 + $0x28] ss:$16 sps:$4 sm:$0xff]  }
 0x273   :  { %3477 = vtanh.f32 %v1115_v34  ;;  %v4215_v34 = vld [vmem:[#allocation13 + $0x60] ss:$16 sps:$4 sm:$0xff]  }
 0x27a   :  { %v3472_v22 = vpop.eup %3471 }
 0x27b   :  { %v1119_v25 = vmul.f32 0.5, %v3472_v22  ;;  %v3474_v28 = vpop.eup %3473  ;;  %v4217_v22 = vld [vmem:[#allocation13 + $0x68] ss:$16 sps:$4 sm:$0xff]  }
 0x27c   :  { %v1120_v26 = vmul.f32 0.5, %v3474_v28  ;;  %v3476_v62 = vpop.eup %3475  ;;  %v4225_v28 = vld [vmem:[#allocation13 + $0x8c] ss:$16 sps:$4 sm:$0xff]  }
 0x27d   :  { %v1122_v27 = vadd.f32 0.5, %v1119_v25  ;;  %v3478_v44 = vpop.eup %3477  ;;  %v4223_v25 = vld [vmem:[#allocation13 + $0x84] ss:$16 sps:$4 sm:$0xff]  }
 0x27e   :  { %v1123_v29 = vadd.f32 0.5, %v1120_v26  ;;  %v1121_v11 = vmul.f32 0.5, %v3478_v44  ;;  %v4229_v26 = vld [vmem:[#allocation13 + $0x88] ss:$16 sps:$4 sm:$0xff]   ;;  %v4246_v44 = vld [vmem:[#allocation13 + $0xcc] ss:$16 sps:$4 sm:$0xff]  }
 0x27f   :  { %v1127_v8 = vmul.f32 %v3476_v62, %v1122_v27  ;;  %v4227_v27 = vld [vmem:[#allocation13 + $0x80] ss:$16 sps:$4 sm:$0xff]  }
 0x280   :  { %v1126_v30 = vmul.f32 %v1123_v29, %v4088_v10  ;;  %v1124_v23 = vadd.f32 0.5, %v1121_v11  ;;  %v4177_v10 = vld [vmem:[#allocation13 + $0xc] ss:$16 sps:$4 sm:$0xff]   ;;  %v4235_v62 = vld [vmem:[#allocation13 + $0xa0] ss:$16 sps:$4 sm:$0xff]  }
 0x281   :  { %v4237_v29 = vld [vmem:[#allocation13 + $0xa4] ss:$16 sps:$4 sm:$0xff]   ;;  %v4251_v11 = vld [vmem:[#allocation13 + $0xc0] ss:$16 sps:$4 sm:$0xff]  }
 0x282   :  { %v4130_v12 = vadd.f32 %v1127_v8, %v1126_v30  ;;  %v4239_v8 = vld [vmem:[#allocation13 + $0xa8] ss:$16 sps:$4 sm:$0xff]   ;;  %v4241_v30 = vld [vmem:[#allocation13 + $0xac] ss:$16 sps:$4 sm:$0xff]  }
 0x284   :  { %3479 = vtanh.f32 %v4130_v12 }
 0x28e   :  { %v3480_v31 = vpop.eup %3479 }
 0x28f   :  { %v1130_v7 = vmul.f32 %v3480_v31, %v1124_v23  ;;  %v4253_v23 = vld [vmem:[#allocation13 + $0xc8] ss:$16 sps:$4 sm:$0xff]   ;;  %v4257_v31 = vld [vmem:[#allocation13 + $0xe4] ss:$16 sps:$4 sm:$0xff]  }
 0x291   :  { %v1131_v9 = vpack.c.bf16 %v1130_v7, %v1130_v7  ;;  %v4259_v7 = vld [vmem:[#allocation13 + $0xec] ss:$16 sps:$4 sm:$0xff]  }
 0x293   :  { %1133 = vst [vmem:[#allocation14 + $0x4] sm:$0xf] %v1131_v9  ;;  %1359 = vmatmul.mubr.bf16.vlgmr.msra.gmra.mrb[24].mxu0 %v1131_v9  ;;  %1400 = vmatmul.mubr.bf16.vlgmr.msra.gmra.mrb[24].mxu1 %v1131_v9  ;;  %v4263_v9 = vld [vmem:[#allocation13 + $0xe0] ss:$16 sps:$4 sm:$0xff]  }
 0x294   :  { %1631 = vmatpush1.bf16.msra.mxu0 %v3867_v36  ;;  %1672 = vmatpush1.bf16.msra.mxu1 %v3869_v37 }
 0x295   :  { %1632 = vmatprep.subr.bf16.mxu0 %v3873_v38  ;;  %1673 = vmatprep.subr.bf16.mxu1 %v3875_v39 }
 0x296   :  { %1662 = vmatprep.mubr.bf16.mxu0 %v4491_v14  ;;  %1703 = vmatprep.mubr.bf16.mxu1 %v4491_v14 }
 0x298   :  { %1633 = vmatpush1.bf16.msra.mxu0 %v3877_v40  ;;  %1674 = vmatpush1.bf16.msra.mxu1 %v3881_v41 }
 0x299   :  { %1634 = vmatprep.subr.bf16.mxu0 %v3885_v42  ;;  %1675 = vmatprep.subr.bf16.mxu1 %v3887_v43  ;;  %v4492_v43 = vld [vmem:[#allocation23_spill] sm:$0xff] }
 0x29c   :  { %1635 = vmatpush1.bf16.msra.mxu0 %v3891_v45  ;;  %1676 = vmatpush1.bf16.msra.mxu1 %v3893_v46 }
 0x29d   :  { %1636 = vmatprep.subr.bf16.mxu0 %v3897_v47  ;;  %1677 = vmatprep.subr.bf16.mxu1 %v3901_v48 }
 0x2a0   :  { %1637 = vmatpush1.bf16.msra.mxu0 %v3903_v49  ;;  %1678 = vmatpush1.bf16.msra.mxu1 %v3905_v50 }
 0x2a1   :  { %1638 = vmatprep.subr.bf16.mxu0 %v3909_v51  ;;  %1679 = vmatprep.subr.bf16.mxu1 %v3913_v52 }
 0x2a4   :  { %1639 = vmatpush1.bf16.msra.mxu0 %v3917_v54  ;;  %1680 = vmatpush1.bf16.msra.mxu1 %v3919_v55 }
 0x2a5   :  { %1640 = vmatprep.subr.bf16.mxu0 %v3921_v56  ;;  %1681 = vmatprep.subr.bf16.mxu1 %v3923_v57 }
 0x2a8   :  { %1641 = vmatpush1.bf16.msra.mxu0 %v3929_v58  ;;  %1682 = vmatpush1.bf16.msra.mxu1 %v3931_v59 }
 0x2a9   :  { %1642 = vmatprep.subr.bf16.mxu0 %v3933_v60  ;;  %1683 = vmatprep.subr.bf16.mxu1 %v3935_v61 }
 0x2ac   :  { %1643 = vmatpush1.bf16.msra.mxu0 %v3943_v63  ;;  %1684 = vmatpush1.bf16.msra.mxu1 %v3945_v1 }
 0x2ad   :  { %1644 = vmatprep.subr.bf16.mxu0 %v3947_v2  ;;  %1685 = vmatprep.subr.bf16.mxu1 %v3949_v3 }
 0x2b0   :  { %1645 = vmatpush1.bf16.msra.mxu0 %v3957_v4  ;;  %1686 = vmatpush1.bf16.msra.mxu1 %v3959_v5 }
 0x2b1   :  { %1975 = vmatprep.subr.bf16.mxu1 %v4177_v10 }
 0x366   :  { %v1360_v36 = vpop.f32.mrb[24].mxu0  ;;  %v1401_v37 = vpop.f32.mrb[24].mxu1 }
 0x367   :  { %v1413_v38 = vadd.f32 %v1360_v36, %v4024_v35  ;;  %v1415_v39 = vadd.f32 %v1401_v37, %v4027_v53  ;;  %v1362_v40 = vpop.f32.mrb[25].mxu0  ;;  %v1403_v41 = vpop.f32.mrb[25].mxu1  ;;  %v4265_v36 = vld [vmem:[#allocation13 + $0xe8] ss:$16 sps:$4 sm:$0xff]  }
 0x368   :  { %v1414_v42 = vadd.f32 %v1362_v40, %v4029_v6  ;;  %v1416_v45 = vadd.f32 %v1403_v41, %v4492_v43  ;;  %v1364_v46 = vpop.f32.mrb[26].mxu0  ;;  %v1405_v47 = vpop.f32.mrb[26].mxu1  ;;  %v4175_v6 = vld [vmem:[#allocation13 + $0x4] ss:$16 sps:$4 sm:$0xff]  }
 0x369   :  { %v1417_v48 = vmul.f32 0.5, %v1413_v38  ;;  %v1365_v49 = vpop.f32.mrb[27].mxu0  ;;  %v1406_v50 = vpop.f32.mrb[27].mxu1  ;;  %v1419_v52 = vmul.f32 0.5, %v1415_v39  ;;  %1934 = vmatprep.subr.bf16.mxu0 %v4175_v6  ;;  %v4493_v39 = vld [vmem:[#allocation24_spill] sm:$0xff]  ;;  %v4494_v41 = vld [vmem:[#allocation25_spill] sm:$0xff] }
 0x36a   :  { %v1418_v51 = vmul.f32 0.5, %v1414_v42  ;;  %v4495_v46 = vld [vmem:[#allocation26_spill] sm:$0xff] }
 0x36b   :  { %3481 = vtanh.f32 %v1417_v48  ;;  %v4496_v48 = vld [vmem:[#allocation27_spill] sm:$0xff] }
 0x36c   :  { %3483 = vtanh.f32 %v1418_v51 }
 0x36d   :  { %3485 = vtanh.f32 %v1416_v45 }
 0x36e   :  { %3487 = vtanh.f32 %v1419_v52 }
 0x375   :  { %v3482_v54 = vpop.eup %3481 }
 0x376   :  { %v1423_v55 = vmul.f32 0.5, %v3482_v54  ;;  %v3484_v56 = vpop.eup %3483 }
 0x377   :  { %v1424_v58 = vmul.f32 0.5, %v3484_v56  ;;  %v3486_v59 = vpop.eup %3485 }
 0x378   :  { %v1426_v57 = vadd.f32 0.5, %v1423_v55  ;;  %v3488_v2 = vpop.eup %3487 }
 0x379   :  { %v1427_v60 = vadd.f32 0.5, %v1424_v58  ;;  %v1425_v3 = vmul.f32 0.5, %v3488_v2 }
 0x37a   :  { %v1431_v61 = vmul.f32 %v3486_v59, %v1426_v57 }
 0x37b   :  { %v1430_v63 = vmul.f32 %v1427_v60, %v4130_v12  ;;  %v1428_v4 = vadd.f32 0.5, %v1425_v3  ;;  %v4243_v12 = vld [vmem:[#allocation13 + $0xc4] ss:$16 sps:$4 sm:$0xff]  }
 0x37d   :  { %v4170_v1 = vadd.f32 %v1431_v61, %v1430_v63 }
 0x37f   :  { %3489 = vtanh.f32 %v4170_v1 }
 0x389   :  { %v3490_v5 = vpop.eup %3489 }
 0x38a   :  { %v1434_v35 = vmul.f32 %v3490_v5, %v1428_v4 }
 0x38c   :  { %v1435_v53 = vpack.c.bf16 %v1434_v35, %v1434_v35 }
 0x38e   :  { %1437 = vst [vmem:[#allocation14 + $0x8] sm:$0xf] %v1435_v53  ;;  %1663 = vmatmul.mubr.bf16.vlgmr.msra.gmra.mrb[28].mxu0 %v1435_v53  ;;  %1704 = vmatmul.mubr.bf16.vlgmr.msra.gmra.mrb[28].mxu1 %v1435_v53 }
 0x38f   :  { %1966 = vmatprep.mubr.bf16.mxu0 %v4491_v14  ;;  %2007 = vmatprep.mubr.bf16.mxu1 %v4491_v14 }
 0x390   :  { %1935 = vmatpush1.bf16.msra.mxu0 %v4179_v13  ;;  %1976 = vmatpush1.bf16.msra.mxu1 %v4181_v24 }
 0x391   :  { %1936 = vmatprep.subr.bf16.mxu0 %v4187_v32  ;;  %1977 = vmatprep.subr.bf16.mxu1 %v4189_v16 }
 0x394   :  { %1937 = vmatpush1.bf16.msra.mxu0 %v4191_v15  ;;  %1978 = vmatpush1.bf16.msra.mxu1 %v4193_v17 }
 0x395   :  { %1938 = vmatprep.subr.bf16.mxu0 %v4199_v18  ;;  %1979 = vmatprep.subr.bf16.mxu1 %v4201_v19 }
 0x398   :  { %1939 = vmatpush1.bf16.msra.mxu0 %v4203_v20  ;;  %1980 = vmatpush1.bf16.msra.mxu1 %v4205_v0 }
 0x399   :  { %1940 = vmatprep.subr.bf16.mxu0 %v4211_v21  ;;  %1981 = vmatprep.subr.bf16.mxu1 %v4213_v33 }
 0x39c   :  { %1941 = vmatpush1.bf16.msra.mxu0 %v4215_v34  ;;  %1982 = vmatpush1.bf16.msra.mxu1 %v4217_v22 }
 0x39d   :  { %1942 = vmatprep.subr.bf16.mxu0 %v4223_v25  ;;  %1983 = vmatprep.subr.bf16.mxu1 %v4225_v28 }
 0x3a0   :  { %1943 = vmatpush1.bf16.msra.mxu0 %v4227_v27  ;;  %1984 = vmatpush1.bf16.msra.mxu1 %v4229_v26 }
 0x3a1   :  { %1944 = vmatprep.subr.bf16.mxu0 %v4237_v29  ;;  %1985 = vmatprep.subr.bf16.mxu1 %v4241_v30 }
 0x3a4   :  { %1945 = vmatpush1.bf16.msra.mxu0 %v4235_v62  ;;  %1986 = vmatpush1.bf16.msra.mxu1 %v4239_v8 }
 0x3a5   :  { %1946 = vmatprep.subr.bf16.mxu0 %v4243_v12  ;;  %1987 = vmatprep.subr.bf16.mxu1 %v4246_v44 }
 0x3a8   :  { %1947 = vmatpush1.bf16.msra.mxu0 %v4251_v11  ;;  %1988 = vmatpush1.bf16.msra.mxu1 %v4253_v23 }
 0x3a9   :  { %1948 = vmatprep.subr.bf16.mxu0 %v4257_v31  ;;  %1989 = vmatprep.subr.bf16.mxu1 %v4259_v7 }
 0x3ac   :  { %1949 = vmatpush1.bf16.msra.mxu0 %v4263_v9  ;;  %1990 = vmatpush1.bf16.msra.mxu1 %v4265_v36 }
 0x3ad   :  { %2238 = vmatprep.subr.bf16.mxu0 %v4175_v6  ;;  %2279 = vmatprep.subr.bf16.mxu1 %v4177_v10 }
 0x461   :  { %v1664_v37 = vpop.f32.mrb[28].mxu0  ;;  %v1705_v38 = vpop.f32.mrb[28].mxu1 }
 0x462   :  { %v1717_v40 = vadd.f32 %v1664_v37, %v4493_v39  ;;  %v1719_v42 = vadd.f32 %v1705_v38, %v4494_v41  ;;  %v1666_v43 = vpop.f32.mrb[29].mxu0  ;;  %v1707_v45 = vpop.f32.mrb[29].mxu1 }
 0x463   :  { %v1718_v47 = vadd.f32 %v1666_v43, %v4495_v46  ;;  %v1720_v49 = vadd.f32 %v1707_v45, %v4496_v48  ;;  %v1668_v50 = vpop.f32.mrb[30].mxu0  ;;  %v1709_v51 = vpop.f32.mrb[30].mxu1  ;;  %v4497_v43 = vld [vmem:[#allocation28_spill] sm:$0xff]  ;;  %v4498_v46 = vld [vmem:[#allocation29_spill] sm:$0xff] }
 0x464   :  { %v1721_v52 = vmul.f32 0.5, %v1717_v40  ;;  %v1669_v54 = vpop.f32.mrb[31].mxu0  ;;  %v1710_v55 = vpop.f32.mrb[31].mxu1  ;;  %v1723_v57 = vmul.f32 0.5, %v1719_v42  ;;  %v4499_v50 = vld [vmem:[#allocation30_spill] sm:$0xff] }
 0x465   :  { %v1722_v56 = vmul.f32 0.5, %v1718_v47 }
 0x466   :  { %3491 = vtanh.f32 %v1721_v52  ;;  %v4500_v52 = vld [vmem:[#allocation31_spill] sm:$0xff] }
 0x467   :  { %3493 = vtanh.f32 %v1722_v56 }
 0x468   :  { %3495 = vtanh.f32 %v1720_v49 }
 0x469   :  { %3497 = vtanh.f32 %v1723_v57 }
 0x470   :  { %v3492_v58 = vpop.eup %3491 }
 0x471   :  { %v1727_v59 = vmul.f32 0.5, %v3492_v58  ;;  %v3494_v60 = vpop.eup %3493 }
 0x472   :  { %v1728_v63 = vmul.f32 0.5, %v3494_v60  ;;  %v3496_v2 = vpop.eup %3495 }
 0x473   :  { %v1730_v61 = vadd.f32 0.5, %v1727_v59  ;;  %v3498_v53 = vpop.eup %3497 }
 0x474   :  { %v1731_v3 = vadd.f32 0.5, %v1728_v63  ;;  %v1729_v37 = vmul.f32 0.5, %v3498_v53 }
 0x475   :  { %v1735_v4 = vmul.f32 %v3496_v2, %v1730_v61 }
 0x476   :  { %v1734_v5 = vmul.f32 %v1731_v3, %v4170_v1  ;;  %v1732_v38 = vadd.f32 0.5, %v1729_v37 }
 0x478   :  { %v4278_v35 = vadd.f32 %v1735_v4, %v1734_v5 }
 0x47a   :  { %3499 = vtanh.f32 %v4278_v35 }
 0x484   :  { %v3500_v39 = vpop.eup %3499 }
 0x485   :  { %v1738_v40 = vmul.f32 %v3500_v39, %v1732_v38 }
 0x487   :  { %v1739_v41 = vpack.c.bf16 %v1738_v40, %v1738_v40 }
 0x489   :  { %1741 = vst [vmem:[#allocation14 + $0xc] sm:$0xf] %v1739_v41  ;;  %1967 = vmatmul.mubr.bf16.vlgmr.msra.gmra.mrb[32].mxu0 %v1739_v41  ;;  %2008 = vmatmul.mubr.bf16.vlgmr.msra.gmra.mrb[32].mxu1 %v1739_v41 }
 0x48a   :  { %2239 = vmatpush1.bf16.msra.mxu0 %v4179_v13  ;;  %2280 = vmatpush1.bf16.msra.mxu1 %v4181_v24 }
 0x48b   :  { %2240 = vmatprep.subr.bf16.mxu0 %v4187_v32  ;;  %2281 = vmatprep.subr.bf16.mxu1 %v4189_v16 }
 0x48c   :  { %2270 = vmatprep.mubr.bf16.mxu0 %v4491_v14  ;;  %2311 = vmatprep.mubr.bf16.mxu1 %v4491_v14 }
 0x48e   :  { %2241 = vmatpush1.bf16.msra.mxu0 %v4191_v15  ;;  %2282 = vmatpush1.bf16.msra.mxu1 %v4193_v17 }
 0x48f   :  { %2242 = vmatprep.subr.bf16.mxu0 %v4199_v18  ;;  %2283 = vmatprep.subr.bf16.mxu1 %v4201_v19 }
 0x492   :  { %2243 = vmatpush1.bf16.msra.mxu0 %v4203_v20  ;;  %2284 = vmatpush1.bf16.msra.mxu1 %v4205_v0 }
 0x493   :  { %2244 = vmatprep.subr.bf16.mxu0 %v4211_v21  ;;  %2285 = vmatprep.subr.bf16.mxu1 %v4213_v33 }
 0x496   :  { %2245 = vmatpush1.bf16.msra.mxu0 %v4215_v34  ;;  %2286 = vmatpush1.bf16.msra.mxu1 %v4217_v22 }
 0x497   :  { %2246 = vmatprep.subr.bf16.mxu0 %v4223_v25  ;;  %2287 = vmatprep.subr.bf16.mxu1 %v4225_v28 }
 0x49a   :  { %2247 = vmatpush1.bf16.msra.mxu0 %v4227_v27  ;;  %2288 = vmatpush1.bf16.msra.mxu1 %v4229_v26 }
 0x49b   :  { %2248 = vmatprep.subr.bf16.mxu0 %v4237_v29  ;;  %2289 = vmatprep.subr.bf16.mxu1 %v4241_v30 }
 0x49e   :  { %2249 = vmatpush1.bf16.msra.mxu0 %v4235_v62  ;;  %2290 = vmatpush1.bf16.msra.mxu1 %v4239_v8 }
 0x49f   :  { %2250 = vmatprep.subr.bf16.mxu0 %v4243_v12  ;;  %2291 = vmatprep.subr.bf16.mxu1 %v4246_v44 }
 0x4a2   :  { %2251 = vmatpush1.bf16.msra.mxu0 %v4251_v11  ;;  %2292 = vmatpush1.bf16.msra.mxu1 %v4253_v23 }
 0x4a3   :  { %2252 = vmatprep.subr.bf16.mxu0 %v4257_v31  ;;  %2293 = vmatprep.subr.bf16.mxu1 %v4259_v7 }
 0x4a6   :  { %2253 = vmatpush1.bf16.msra.mxu0 %v4263_v9  ;;  %2294 = vmatpush1.bf16.msra.mxu1 %v4265_v36 }
 0x4a7   :  { %2542 = vmatprep.subr.bf16.mxu0 %v4175_v6  ;;  %2583 = vmatprep.subr.bf16.mxu1 %v4177_v10 }
 0x55c   :  { %v1968_v1 = vpop.f32.mrb[32].mxu0  ;;  %v2009_v42 = vpop.f32.mrb[32].mxu1 }
 0x55d   :  { %v2021_v45 = vadd.f32 %v1968_v1, %v4497_v43  ;;  %v2023_v47 = vadd.f32 %v2009_v42, %v4498_v46  ;;  %v1970_v48 = vpop.f32.mrb[33].mxu0  ;;  %v2011_v49 = vpop.f32.mrb[33].mxu1 }
 0x55e   :  { %v2022_v51 = vadd.f32 %v1970_v48, %v4499_v50  ;;  %v2024_v54 = vadd.f32 %v2011_v49, %v4500_v52  ;;  %v1972_v55 = vpop.f32.mrb[34].mxu0  ;;  %v2013_v56 = vpop.f32.mrb[34].mxu1  ;;  %v4501_v48 = vld [vmem:[#allocation32_spill] sm:$0xff]  ;;  %v4502_v50 = vld [vmem:[#allocation33_spill] sm:$0xff] }
 0x55f   :  { %v2025_v57 = vmul.f32 0.5, %v2021_v45  ;;  %v1973_v58 = vpop.f32.mrb[35].mxu0  ;;  %v2014_v59 = vpop.f32.mrb[35].mxu1  ;;  %v2027_v61 = vmul.f32 0.5, %v2023_v47  ;;  %v4503_v55 = vld [vmem:[#allocation34_spill] sm:$0xff] }
 0x560   :  { %v2026_v60 = vmul.f32 0.5, %v2022_v51 }
 0x561   :  { %3501 = vtanh.f32 %v2025_v57  ;;  %v4504_v57 = vld [vmem:[#allocation35_spill] sm:$0xff] }
 0x562   :  { %3503 = vtanh.f32 %v2026_v60 }
 0x563   :  { %3505 = vtanh.f32 %v2024_v54 }
 0x564   :  { %3507 = vtanh.f32 %v2027_v61 }
 0x56b   :  { %v3502_v63 = vpop.eup %3501 }
 0x56c   :  { %v2031_v2 = vmul.f32 0.5, %v3502_v63  ;;  %v3504_v3 = vpop.eup %3503 }
 0x56d   :  { %v2032_v5 = vmul.f32 0.5, %v3504_v3  ;;  %v3506_v53 = vpop.eup %3505 }
 0x56e   :  { %v2034_v4 = vadd.f32 0.5, %v2031_v2  ;;  %v3508_v41 = vpop.eup %3507 }
 0x56f   :  { %v2035_v37 = vadd.f32 0.5, %v2032_v5  ;;  %v2033_v1 = vmul.f32 0.5, %v3508_v41 }
 0x570   :  { %v2039_v38 = vmul.f32 %v3506_v53, %v2034_v4 }
 0x571   :  { %v2038_v39 = vmul.f32 %v2035_v37, %v4278_v35  ;;  %v2036_v42 = vadd.f32 0.5, %v2033_v1 }
 0x573   :  { %v4320_v40 = vadd.f32 %v2039_v38, %v2038_v39 }
 0x575   :  { %3509 = vtanh.f32 %v4320_v40 }
 0x57f   :  { %v3510_v43 = vpop.eup %3509 }
 0x580   :  { %v2042_v45 = vmul.f32 %v3510_v43, %v2036_v42 }
 0x582   :  { %v2043_v46 = vpack.c.bf16 %v2042_v45, %v2042_v45 }
 0x584   :  { %2045 = vst [vmem:[#allocation14 + $0x10] sm:$0xf] %v2043_v46  ;;  %2271 = vmatmul.mubr.bf16.vlgmr.msra.gmra.mrb[36].mxu0 %v2043_v46  ;;  %2312 = vmatmul.mubr.bf16.vlgmr.msra.gmra.mrb[36].mxu1 %v2043_v46 }
 0x585   :  { %2543 = vmatpush1.bf16.msra.mxu0 %v4179_v13  ;;  %2584 = vmatpush1.bf16.msra.mxu1 %v4181_v24 }
 0x586   :  { %2544 = vmatprep.subr.bf16.mxu0 %v4187_v32  ;;  %2585 = vmatprep.subr.bf16.mxu1 %v4189_v16 }
 0x587   :  { %2574 = vmatprep.mubr.bf16.mxu0 %v4491_v14  ;;  %2615 = vmatprep.mubr.bf16.mxu1 %v4491_v14 }
 0x589   :  { %2545 = vmatpush1.bf16.msra.mxu0 %v4191_v15  ;;  %2586 = vmatpush1.bf16.msra.mxu1 %v4193_v17 }
 0x58a   :  { %2546 = vmatprep.subr.bf16.mxu0 %v4199_v18  ;;  %2587 = vmatprep.subr.bf16.mxu1 %v4201_v19 }
 0x58d   :  { %2547 = vmatpush1.bf16.msra.mxu0 %v4203_v20  ;;  %2588 = vmatpush1.bf16.msra.mxu1 %v4205_v0 }
 0x58e   :  { %2548 = vmatprep.subr.bf16.mxu0 %v4211_v21  ;;  %2589 = vmatprep.subr.bf16.mxu1 %v4213_v33 }
 0x591   :  { %2549 = vmatpush1.bf16.msra.mxu0 %v4215_v34  ;;  %2590 = vmatpush1.bf16.msra.mxu1 %v4217_v22 }
 0x592   :  { %2550 = vmatprep.subr.bf16.mxu0 %v4223_v25  ;;  %2591 = vmatprep.subr.bf16.mxu1 %v4225_v28 }
 0x595   :  { %2551 = vmatpush1.bf16.msra.mxu0 %v4227_v27  ;;  %2592 = vmatpush1.bf16.msra.mxu1 %v4229_v26 }
 0x596   :  { %2552 = vmatprep.subr.bf16.mxu0 %v4237_v29  ;;  %2593 = vmatprep.subr.bf16.mxu1 %v4241_v30 }
 0x599   :  { %2553 = vmatpush1.bf16.msra.mxu0 %v4235_v62  ;;  %2594 = vmatpush1.bf16.msra.mxu1 %v4239_v8 }
 0x59a   :  { %2554 = vmatprep.subr.bf16.mxu0 %v4243_v12  ;;  %2595 = vmatprep.subr.bf16.mxu1 %v4246_v44 }
 0x59d   :  { %2555 = vmatpush1.bf16.msra.mxu0 %v4251_v11  ;;  %2596 = vmatpush1.bf16.msra.mxu1 %v4253_v23 }
 0x59e   :  { %2556 = vmatprep.subr.bf16.mxu0 %v4257_v31  ;;  %2597 = vmatprep.subr.bf16.mxu1 %v4259_v7 }
 0x5a1   :  { %2557 = vmatpush1.bf16.msra.mxu0 %v4263_v9  ;;  %2598 = vmatpush1.bf16.msra.mxu1 %v4265_v36 }
 0x5a2   :  { %2846 = vmatprep.subr.bf16.mxu0 %v4175_v6  ;;  %2887 = vmatprep.subr.bf16.mxu1 %v4177_v10 }
 0x657   :  { %v2272_v35 = vpop.f32.mrb[36].mxu0  ;;  %v2313_v47 = vpop.f32.mrb[36].mxu1 }
 0x658   :  { %v2325_v49 = vadd.f32 %v2272_v35, %v4501_v48  ;;  %v2327_v51 = vadd.f32 %v2313_v47, %v4502_v50  ;;  %v2274_v52 = vpop.f32.mrb[37].mxu0  ;;  %v2315_v54 = vpop.f32.mrb[37].mxu1 }
 0x659   :  { %v2326_v56 = vadd.f32 %v2274_v52, %v4503_v55  ;;  %v2328_v58 = vadd.f32 %v2315_v54, %v4504_v57  ;;  %v2276_v59 = vpop.f32.mrb[38].mxu0  ;;  %v2317_v60 = vpop.f32.mrb[38].mxu1  ;;  %v4509_v55 = vld [vmem:[#allocation40_spill] sm:$0xff]  ;;  %v4510_v57 = vld [vmem:[#allocation41_spill] sm:$0xff] }
 0x65a   :  { %v2329_v61 = vmul.f32 0.5, %v2325_v49  ;;  %v2277_v63 = vpop.f32.mrb[39].mxu0  ;;  %v2318_v2 = vpop.f32.mrb[39].mxu1  ;;  %v2331_v10 = vmul.f32 0.5, %v2327_v51 }
 0x65b   :  { %v2330_v6 = vmul.f32 0.5, %v2326_v56  ;;  %v4512_v2 = vld [vmem:[#allocation43_spill] sm:$0xff] }
 0x65c   :  { %3511 = vtanh.f32 %v2329_v61  ;;  %v4511_v61 = vld [vmem:[#allocation42_spill] sm:$0xff] }
 0x65d   :  { %3513 = vtanh.f32 %v2330_v6 }
 0x65e   :  { %3515 = vtanh.f32 %v2328_v58 }
 0x65f   :  { %3517 = vtanh.f32 %v2331_v10 }
 0x666   :  { %v3512_v3 = vpop.eup %3511 }
 0x667   :  { %v2335_v4 = vmul.f32 0.5, %v3512_v3  ;;  %v3514_v5 = vpop.eup %3513 }
 0x668   :  { %v2336_v37 = vmul.f32 0.5, %v3514_v5  ;;  %v3516_v38 = vpop.eup %3515 }
 0x669   :  { %v2338_v53 = vadd.f32 0.5, %v2335_v4  ;;  %v3518_v43 = vpop.eup %3517 }
 0x66a   :  { %v2339_v39 = vadd.f32 0.5, %v2336_v37  ;;  %v2337_v45 = vmul.f32 0.5, %v3518_v43 }
 0x66b   :  { %v2343_v41 = vmul.f32 %v3516_v38, %v2338_v53 }
 0x66c   :  { %v2342_v1 = vmul.f32 %v2339_v39, %v4320_v40  ;;  %v2340_v46 = vadd.f32 0.5, %v2337_v45 }
 0x66e   :  { %v4362_v42 = vadd.f32 %v2343_v41, %v2342_v1 }
 0x670   :  { %3519 = vtanh.f32 %v4362_v42 }
 0x67a   :  { %v3520_v35 = vpop.eup %3519 }
 0x67b   :  { %v2346_v47 = vmul.f32 %v3520_v35, %v2340_v46 }
 0x67d   :  { %v2347_v48 = vpack.c.bf16 %v2346_v47, %v2346_v47 }
 0x67f   :  { %2349 = vst [vmem:[#allocation14 + $0x14] sm:$0xf] %v2347_v48  ;;  %2575 = vmatmul.mubr.bf16.vlgmr.msra.gmra.mrb[40].mxu0 %v2347_v48  ;;  %2616 = vmatmul.mubr.bf16.vlgmr.msra.gmra.mrb[40].mxu1 %v2347_v48 }
 0x680   :  { %2847 = vmatpush1.bf16.msra.mxu0 %v4179_v13  ;;  %2888 = vmatpush1.bf16.msra.mxu1 %v4181_v24  ;;  %v4505_v24 = vld [vmem:[#allocation36_spill] sm:$0xff] }
 0x681   :  { %2848 = vmatprep.subr.bf16.mxu0 %v4187_v32  ;;  %2889 = vmatprep.subr.bf16.mxu1 %v4189_v16  ;;  %v4506_v16 = vld [vmem:[#allocation37_spill] sm:$0xff] }
 0x682   :  { %2878 = vmatprep.mubr.bf16.mxu0 %v4491_v14  ;;  %2919 = vmatprep.mubr.bf16.mxu1 %v4491_v14 }
 0x684   :  { %2849 = vmatpush1.bf16.msra.mxu0 %v4191_v15  ;;  %2890 = vmatpush1.bf16.msra.mxu1 %v4193_v17 }
 0x685   :  { %2850 = vmatprep.subr.bf16.mxu0 %v4199_v18  ;;  %2891 = vmatprep.subr.bf16.mxu1 %v4201_v19  ;;  %v4507_v19 = vld [vmem:[#allocation38_spill] sm:$0xff] }
 0x688   :  { %2851 = vmatpush1.bf16.msra.mxu0 %v4203_v20  ;;  %2892 = vmatpush1.bf16.msra.mxu1 %v4205_v0  ;;  %v4508_v0 = vld [vmem:[#allocation39_spill] sm:$0xff] }
 0x689   :  { %2852 = vmatprep.subr.bf16.mxu0 %v4211_v21  ;;  %2893 = vmatprep.subr.bf16.mxu1 %v4213_v33 }
 0x68c   :  { %2853 = vmatpush1.bf16.msra.mxu0 %v4215_v34  ;;  %2894 = vmatpush1.bf16.msra.mxu1 %v4217_v22 }
 0x68d   :  { %2854 = vmatprep.subr.bf16.mxu0 %v4223_v25  ;;  %2895 = vmatprep.subr.bf16.mxu1 %v4225_v28 }
 0x690   :  { %2855 = vmatpush1.bf16.msra.mxu0 %v4227_v27  ;;  %2896 = vmatpush1.bf16.msra.mxu1 %v4229_v26 }
 0x691   :  { %2856 = vmatprep.subr.bf16.mxu0 %v4237_v29  ;;  %2897 = vmatprep.subr.bf16.mxu1 %v4241_v30 }
 0x694   :  { %2857 = vmatpush1.bf16.msra.mxu0 %v4235_v62  ;;  %2898 = vmatpush1.bf16.msra.mxu1 %v4239_v8 }
 0x695   :  { %2858 = vmatprep.subr.bf16.mxu0 %v4243_v12  ;;  %2899 = vmatprep.subr.bf16.mxu1 %v4246_v44 }
 0x698   :  { %2859 = vmatpush1.bf16.msra.mxu0 %v4251_v11  ;;  %2900 = vmatpush1.bf16.msra.mxu1 %v4253_v23 }
 0x699   :  { %2860 = vmatprep.subr.bf16.mxu0 %v4257_v31  ;;  %2901 = vmatprep.subr.bf16.mxu1 %v4259_v7 }
 0x69c   :  { %2861 = vmatpush1.bf16.msra.mxu0 %v4263_v9  ;;  %2902 = vmatpush1.bf16.msra.mxu1 %v4265_v36 }
 0x752   :  { %v2576_v14 = vpop.f32.mrb[40].mxu0  ;;  %v2617_v13 = vpop.f32.mrb[40].mxu1 }
 0x753   :  { %v2629_v32 = vadd.f32 %v2576_v14, %v4505_v24  ;;  %v2631_v15 = vadd.f32 %v2617_v13, %v4506_v16  ;;  %v2578_v17 = vpop.f32.mrb[41].mxu0  ;;  %v2619_v18 = vpop.f32.mrb[41].mxu1 }
 0x754   :  { %v2630_v20 = vadd.f32 %v2578_v17, %v4507_v19  ;;  %v2632_v21 = vadd.f32 %v2619_v18, %v4508_v0  ;;  %v2580_v33 = vpop.f32.mrb[42].mxu0  ;;  %v2621_v34 = vpop.f32.mrb[42].mxu1 }
 0x755   :  { %v2633_v22 = vmul.f32 0.5, %v2629_v32  ;;  %v2581_v25 = vpop.f32.mrb[43].mxu0  ;;  %v2622_v28 = vpop.f32.mrb[43].mxu1  ;;  %v2635_v26 = vmul.f32 0.5, %v2631_v15 }
 0x756   :  { %v2634_v27 = vmul.f32 0.5, %v2630_v20 }
 0x757   :  { %3521 = vtanh.f32 %v2633_v22 }
 0x758   :  { %3523 = vtanh.f32 %v2634_v27 }
 0x759   :  { %3525 = vtanh.f32 %v2632_v21 }
 0x75a   :  { %3527 = vtanh.f32 %v2635_v26 }
 0x761   :  { %v3522_v62 = vpop.eup %3521 }
 0x762   :  { %v2639_v29 = vmul.f32 0.5, %v3522_v62  ;;  %v3524_v8 = vpop.eup %3523 }
 0x763   :  { %v2640_v12 = vmul.f32 0.5, %v3524_v8  ;;  %v3526_v44 = vpop.eup %3525 }
 0x764   :  { %v2642_v30 = vadd.f32 0.5, %v2639_v29  ;;  %v3528_v9 = vpop.eup %3527 }
 0x765   :  { %v2643_v11 = vadd.f32 0.5, %v2640_v12  ;;  %v2641_v36 = vmul.f32 0.5, %v3528_v9 }
 0x766   :  { %v2647_v23 = vmul.f32 %v3526_v44, %v2642_v30 }
 0x767   :  { %v2646_v31 = vmul.f32 %v2643_v11, %v4362_v42  ;;  %v2644_v40 = vadd.f32 0.5, %v2641_v36 }
 0x769   :  { %v2648_v7 = vadd.f32 %v2647_v23, %v2646_v31 }
 0x76b   :  { %3529 = vtanh.f32 %v2648_v7 }
 0x775   :  { %v3530_v49 = vpop.eup %3529 }
 0x776   :  { %v2650_v50 = vmul.f32 %v3530_v49, %v2644_v40 }
 0x778   :  { %v2651_v51 = vpack.c.bf16 %v2650_v50, %v2650_v50 }
 0x77a   :  { %2653 = vst [vmem:[#allocation14 + $0x18] sm:$0xf] %v2651_v51  ;;  %2879 = vmatmul.mubr.bf16.vlgmr.msra.gmra.mrb[44].mxu0 %v2651_v51  ;;  %2920 = vmatmul.mubr.bf16.vlgmr.msra.gmra.mrb[44].mxu1 %v2651_v51 }
 0x84d   :  { %v2880_v52 = vpop.f32.mrb[44].mxu0  ;;  %v2921_v54 = vpop.f32.mrb[44].mxu1 }
 0x84e   :  { %v2933_v56 = vadd.f32 %v2880_v52, %v4509_v55  ;;  %v2935_v58 = vadd.f32 %v2921_v54, %v4510_v57  ;;  %v2882_v59 = vpop.f32.mrb[45].mxu0  ;;  %v2923_v60 = vpop.f32.mrb[45].mxu1 }
 0x84f   :  { %v2934_v63 = vadd.f32 %v2882_v59, %v4511_v61  ;;  %v2936_v6 = vadd.f32 %v2923_v60, %v4512_v2  ;;  %v2884_v10 = vpop.f32.mrb[46].mxu0  ;;  %v2925_v3 = vpop.f32.mrb[46].mxu1 }
 0x850   :  { %v2937_v4 = vmul.f32 0.5, %v2933_v56  ;;  %v2885_v5 = vpop.f32.mrb[47].mxu0  ;;  %v2926_v53 = vpop.f32.mrb[47].mxu1  ;;  %v2939_v38 = vmul.f32 0.5, %v2935_v58 }
 0x851   :  { %v2938_v37 = vmul.f32 0.5, %v2934_v63 }
 0x852   :  { %3531 = vtanh.f32 %v2937_v4 }
 0x853   :  { %3533 = vtanh.f32 %v2938_v37 }
 0x854   :  { %3535 = vtanh.f32 %v2936_v6 }
 0x855   :  { %3537 = vtanh.f32 %v2939_v38 }
 0x85c   :  { %v3532_v39 = vpop.eup %3531 }
 0x85d   :  { %v2943_v41 = vmul.f32 0.5, %v3532_v39  ;;  %v3534_v1 = vpop.eup %3533 }
 0x85e   :  { %v2944_v43 = vmul.f32 0.5, %v3534_v1  ;;  %v3536_v45 = vpop.eup %3535 }
 0x85f   :  { %v2946_v42 = vadd.f32 0.5, %v2943_v41  ;;  %v3538_v14 = vpop.eup %3537 }
 0x860   :  { %v2947_v46 = vadd.f32 0.5, %v2944_v43  ;;  %v2945_v13 = vmul.f32 0.5, %v3538_v14 }
 0x861   :  { %v2951_v35 = vmul.f32 %v3536_v45, %v2946_v42 }
 0x862   :  { %v2950_v47 = vmul.f32 %v2947_v46, %v2648_v7  ;;  %v2948_v24 = vadd.f32 0.5, %v2945_v13 }
 0x864   :  { %v2952_v48 = vadd.f32 %v2951_v35, %v2950_v47 }
 0x866   :  { %2961 = vst [vmem:[#allocation17] sm:$0xff] %v2952_v48  ;;  %3539 = vtanh.f32 %v2952_v48 }
 0x870   :  { %v3540_v32 = vpop.eup %3539 }
 0x871   :  { %v2954_v16 = vmul.f32 %v3540_v32, %v2948_v24 }
 0x873   :  { %v2955_v15 = vpack.c.bf16 %v2954_v16, %v2954_v16  ;;  %2960 = vst [vmem:[#allocation15] sm:$0xff] %v2954_v16 }
 0x874   :  { %3662 = shalt.err (!%p3659_p2)
}
 0x875   :  { %s3663_s11 = scalar_lea.hbm %s4466_s7, 128 }
 0x876   :  { %p3664_p3 = scmp.ne.s32.totalorder %s4466_s7, %s3663_s11  ;;  %p3667_p4 = scmp.lt.u32.totalorder %s3663_s11, %s4466_s7 }
 0x878   :  { %p3669_p5 = pnand %p3667_p4, %p3664_p3 }
 0x87a   :  { %3672 = shalt.err (!%p3669_p5)
}
 0x87b   :  { %2983 = dma.vmem_to_hbm [thread:$0]  %s2981_s27, 128, %s4466_s7, [#allocation16]   ;;  %2957 = vst [vmem:[#allocation14 + $0x1c] sm:$0xf] %v2955_v15 }
 0x87c   :  { %s3673_s16 = scalar_lea.vmem %s4406_s24, 128  ;;  %p3678_p7 = scmp.lt.s32.totalorder %s4406_s24, %s4406_s24 }
 0x87d   :  { %p3674_p6 = scmp.ne.s32.totalorder %s4406_s24, %s3673_s16  ;;  %p3679_p8 = scmp.lt.s32.totalorder %s3673_s16, %s3673_s16 }
 0x87f   :  { %p3680_p9 = por %p3679_p8, %p3678_p7 }
 0x881   :  { %p3681_p10 = pnand %p3680_p9, %p3674_p6 }
 0x883   :  { %3684 = shalt.err (!%p3681_p10)
}
 0x884   :  { %s3685_s19 = scalar_lea.hbm %s4467_s8, 128 }
 0x885   :  { %p3686_p11 = scmp.ne.s32.totalorder %s4467_s8, %s3685_s19  ;;  %p3689_p12 = scmp.lt.u32.totalorder %s3685_s19, %s4467_s8 }
 0x887   :  { %p3691_p13 = pnand %p3689_p12, %p3686_p11 }
 0x889   :  { %3694 = shalt.err (!%p3691_p13)
}
 0x88a   :  { %2993 = dma.vmem_to_hbm [thread:$0]  %s4406_s24, 128, %s4467_s8, [#allocation16]  }
 0x88b   :  { %s3695_s1 = scalar_lea.vmem %s4408_s26, 512  ;;  %p3700_p1 = scmp.lt.s32.totalorder %s4408_s26, %s4408_s26 }
 0x88c   :  { %p3696_p0 = scmp.ne.s32.totalorder %s4408_s26, %s3695_s1  ;;  %p3701_p2 = scmp.lt.s32.totalorder %s3695_s1, %s3695_s1 }
 0x88e   :  { %p3702_p3 = por %p3701_p2, %p3700_p1 }
 0x890   :  { %p3703_p4 = pnand %p3702_p3, %p3696_p0 }
 0x892   :  { %3706 = shalt.err (!%p3703_p4)
}
 0x893   :  { %s3707_s23 = scalar_lea.hbm %s4465_s6, 512 }
 0x894   :  { %p3708_p5 = scmp.ne.s32.totalorder %s4465_s6, %s3707_s23  ;;  %p3711_p6 = scmp.lt.u32.totalorder %s3707_s23, %s4465_s6 }
 0x896   :  { %p3713_p7 = pnand %p3711_p6, %p3708_p5 }
 0x898   :  { %3716 = shalt.err (!%p3713_p7)
}
 0x899   :  { %2973 = dma.vmem_to_hbm [thread:$0]  %s4408_s26, 512, %s4465_s6, [#allocation7], %s3732_s3, %s3732_s3, %s3733_s30  }
 0x89a   :  { %3723 = dma.done.wait [#allocation7], 512  }
 0x89b   :  { %3724 = vsyncadd [#allocation7], 4294966784 }
 0x89c   :  { %3725 = dma.done.wait [#allocation16], 256  }
 0x89d   :  { %3726 = vsyncadd [#allocation16], 4294967040 }
 0x89e   :  { %3003 = vsyncpa [#allocation6], 1 }
 0x89f   :  { %3004 = vsyncpa [#allocation9], 1 }
 0x8a0   :  { %3005 = vsyncpa [#allocation12], 1 }
 0x8a1   :  { %3006 = vsyncpa [#allocation7], 1 }
 0x8a2   :  { %3007 = vsyncpa [#allocation16], 1 }

// kernel: tpu_custom_call.1
= control target key start
LH: loop header
LB: loop body
LE: loop exit
PB: predicated region body
PF: predicated region fallthrough
CT: control target
= control target key end

     0   :  { %14 = vsyncpa [#allocation6], 0  ;;  %s4459_s0 = inlined_call_operand.hbm [shape: bf16[8,8,128], index: 0, kind: input, shape index: {}]   ;;  %s4460_s1 = inlined_call_operand.hbm [shape: f32[8,128], index: 1, kind: input, shape index: {}]   ;;  %s4461_s2 = inlined_call_operand.hbm [shape: f32[8,128], index: 2, kind: input, shape index: {}]   ;;  %s4462_s3 = inlined_call_operand.hbm [shape: bf16[128,512], index: 3, kind: input, shape index: {}]   ;;  %s4463_s4 = inlined_call_operand.hbm [shape: bf16[128,512], index: 4, kind: input, shape index: {}]   ;;  %s4464_s5 = inlined_call_operand.vmem [shape: f32[1,512], index: 5, kind: input, shape index: {}]   ;;  %s4465_s6 = inlined_call_operand.hbm [shape: bf16[8,8,128], index: 6, kind: output, shape index: {0}]   ;;  %s4466_s7 = inlined_call_operand.hbm [shape: f32[8,128], index: 7, kind: output, shape index: {1}]   ;;  %s4467_s8 = inlined_call_operand.hbm [shape: f32[8,128], index: 8, kind: output, shape index: {2}]  }
   0x1   :  { %15 = vsyncpa [#allocation9], 0 }
   0x2   :  { %16 = vsyncpa [#allocation12], 0 }
   0x3   :  { %17 = vsyncpa [#allocation7], 0 }
   0x4   :  { %18 = vsyncpa [#allocation16], 0  ;;  %s3727_s27 = smov [#allocation8]   ;;  %s3728_s29 = smov [#allocation11]  }
   0x5   :  { %s37_s28 = sshll.u32 %s3727_s27, 4  ;;  %s56_s30 = sshll.u32 %s3728_s29, 4  ;;  %s38_s28 = int_to_ptr.vmem [resolvable:$true] %s37_s28  ;;  %s3785_s30 = int_to_ptr.vmem [resolvable:$true] %s56_s30 }
   0x6   :  { %s3541_s11 = scalar_lea.hbm %s4460_s1, 128 }
   0x7   :  { %p3542_p0 = scmp.ne.s32.totalorder %s4460_s1, %s3541_s11  ;;  %p3545_p1 = scmp.lt.u32.totalorder %s3541_s11, %s4460_s1 }
   0x9   :  { %p3547_p2 = pnand %p3545_p1, %p3542_p0 }
   0xb   :  { %3550 = shalt.err (!%p3547_p2)
}
   0xc   :  { %s3551_s16 = scalar_lea.vmem %s38_s28, 128  ;;  %p3556_p4 = scmp.lt.s32.totalorder %s38_s28, %s38_s28 }
   0xd   :  { %p3552_p3 = scmp.ne.s32.totalorder %s38_s28, %s3551_s16  ;;  %p3557_p5 = scmp.lt.s32.totalorder %s3551_s16, %s3551_s16 }
   0xf   :  { %p3558_p6 = por %p3557_p5, %p3556_p4 }
  0x11   :  { %p3559_p7 = pnand %p3558_p6, %p3552_p3 }
  0x13   :  { %3562 = shalt.err (!%p3559_p7)
}
  0x14   :  { %40 = dma.hbm_to_vmem [thread:$0]  %s4460_s1, 128, %s38_s28, [#allocation9]  }
  0x15   :  { %s3563_s21 = scalar_lea.hbm %s4462_s3, 4096 }
  0x16   :  { %p3564_p8 = scmp.ne.s32.totalorder %s4462_s3, %s3563_s21  ;;  %p3567_p9 = scmp.lt.u32.totalorder %s3563_s21, %s4462_s3 }
  0x18   :  { %p3569_p10 = pnand %p3567_p9, %p3564_p8 }
  0x1a   :  { %3572 = shalt.err (!%p3569_p10)
}
  0x1b   :  { %s3573_s26 = scalar_lea.vmem %s3785_s30, 4096  ;;  %p3578_p12 = scmp.lt.s32.totalorder %s3785_s30, %s3785_s30 }
  0x1c   :  { %p3574_p11 = scmp.ne.s32.totalorder %s3785_s30, %s3573_s26  ;;  %p3579_p13 = scmp.lt.s32.totalorder %s3573_s26, %s3573_s26 }
  0x1e   :  { %p3580_p0 = por %p3579_p13, %p3578_p12 }
  0x20   :  { %p3581_p1 = pnand %p3580_p0, %p3574_p11 }
  0x22   :  { %3584 = shalt.err (!%p3581_p1)
}
  0x23   :  { %s3729_s1 = smov 256   ;;  %s3730_s27 = smov 16  }
  0x24   :  { %62 = dma.hbm_to_vmem [thread:$0]  %s4462_s3, 4096, %s3785_s30, [#allocation12], %s3729_s1, %s3729_s1, %s3730_s27  }
  0x25   :  { %s3731_s9 = smov [#allocation5]   ;;  %s3585_s13 = scalar_lea.hbm %s4459_s0, 512 }
  0x26   :  { %s24_s10 = sshll.u32 %s3731_s9, 4  ;;  %p3586_p2 = scmp.ne.s32.totalorder %s4459_s0, %s3585_s13  ;;  %s25_s10 = int_to_ptr.vmem [resolvable:$true] %s24_s10 }
  0x27   :  { %p3589_p3 = scmp.lt.u32.totalorder %s3585_s13, %s4459_s0 }
  0x29   :  { %p3591_p4 = pnand %p3589_p3, %p3586_p2 }
  0x2b   :  { %3594 = shalt.err (!%p3591_p4)
}
  0x2c   :  { %s3595_s18 = scalar_lea.vmem %s25_s10, 512  ;;  %p3600_p6 = scmp.lt.s32.totalorder %s25_s10, %s25_s10 }
  0x2d   :  { %p3596_p5 = scmp.ne.s32.totalorder %s25_s10, %s3595_s18  ;;  %p3601_p7 = scmp.lt.s32.totalorder %s3595_s18, %s3595_s18 }
  0x2f   :  { %p3602_p8 = por %p3601_p7, %p3600_p6 }
  0x31   :  { %p3603_p9 = pnand %p3602_p8, %p3596_p5 }
  0x33   :  { %3606 = shalt.err (!%p3603_p9)
}
  0x34   :  { %s3732_s3 = smov 64   ;;  %s3733_s30 = smov 4  }
  0x35   :  { %30 = dma.hbm_to_vmem [thread:$0]  %s4459_s0, 512, %s25_s10, [#allocation6], %s3732_s3, %s3732_s3, %s3733_s30  }
  0x36   :  { %s3734_s21 = smov [#allocation10]   ;;  %s3735_s23 = smov [#allocation13]  }
  0x37   :  { %s47_s22 = sshll.u32 %s3734_s21, 4  ;;  %s68_s24 = sshll.u32 %s3735_s23, 4  ;;  %s48_s22 = int_to_ptr.vmem [resolvable:$true] %s47_s22  ;;  %s69_s24 = int_to_ptr.vmem [resolvable:$true] %s68_s24 }
  0x38   :  { %s3607_s28 = scalar_lea.hbm %s4461_s2, 128 }
  0x39   :  { %p3608_p10 = scmp.ne.s32.totalorder %s4461_s2, %s3607_s28  ;;  %p3611_p11 = scmp.lt.u32.totalorder %s3607_s28, %s4461_s2 }
  0x3b   :  { %p3613_p12 = pnand %p3611_p11, %p3608_p10 }
  0x3d   :  { %3616 = shalt.err (!%p3613_p12)
}
  0x3e   :  { %s3617_s0 = scalar_lea.vmem %s48_s22, 128  ;;  %p3622_p0 = scmp.lt.s32.totalorder %s48_s22, %s48_s22 }
  0x3f   :  { %p3618_p13 = scmp.ne.s32.totalorder %s48_s22, %s3617_s0  ;;  %p3623_p1 = scmp.lt.s32.totalorder %s3617_s0, %s3617_s0 }
  0x41   :  { %p3624_p2 = por %p3623_p1, %p3622_p0 }
  0x43   :  { %p3625_p3 = pnand %p3624_p2, %p3618_p13 }
  0x45   :  { %3628 = shalt.err (!%p3625_p3)
}
  0x46   :  { %50 = dma.hbm_to_vmem [thread:$0]  %s4461_s2, 128, %s48_s22, [#allocation9]  }
  0x47   :  { %s3629_s16 = scalar_lea.hbm %s4463_s4, 4096 }
  0x48   :  { %p3630_p4 = scmp.ne.s32.totalorder %s4463_s4, %s3629_s16  ;;  %p3633_p5 = scmp.lt.u32.totalorder %s3629_s16, %s4463_s4 }
  0x4a   :  { %p3635_p6 = pnand %p3633_p5, %p3630_p4 }
  0x4c   :  { %3638 = shalt.err (!%p3635_p6)
}
  0x4d   :  { %s3639_s21 = scalar_lea.vmem %s69_s24, 4096  ;;  %p3644_p8 = scmp.lt.s32.totalorder %s69_s24, %s69_s24 }
  0x4e   :  { %p3640_p7 = scmp.ne.s32.totalorder %s69_s24, %s3639_s21  ;;  %p3645_p9 = scmp.lt.s32.totalorder %s3639_s21, %s3639_s21 }
  0x50   :  { %p3646_p10 = por %p3645_p9, %p3644_p8 }
  0x52   :  { %p3647_p11 = pnand %p3646_p10, %p3640_p7 }
  0x54   :  { %3650 = shalt.err (!%p3647_p11)
}
  0x55   :  { %74 = dma.hbm_to_vmem [thread:$0]  %s4463_s4, 4096, %s69_s24, [#allocation12], %s3729_s1, %s3729_s1, %s3730_s27  }
  0x56   :  { %3717 = dma.done.wait [#allocation6], 512  }
  0x57   :  { %3718 = vsyncadd [#allocation6], 4294966784 }
  0x58   :  { %3719 = dma.done.wait [#allocation9], 256  }
  0x59   :  { %3720 = vsyncadd [#allocation9], 4294967040 }
  0x5a   :  { %3721 = dma.done.wait [#allocation12], 8192  }
  0x5b   :  { %3722 = vsyncadd [#allocation12], 4294959104  ;;  %v4468_v0 = vmov 0   ;;  %v3313_v1 = vld [vmem:[#allocation11 + $0x4] ss:$16 sps:$4 sm:$0xff]   ;;  %v3374_v44 = vld [vmem:[#allocation5 + $0x8] sm:$0xff]  }
  0x5c   :  { %379 = vmatprep.mubr.bf16.mxu0 %v4468_v0  ;;  %452 = vmatprep.mubr.bf16.mxu1 %v4468_v0  ;;  %v3315_v2 = vld [vmem:[#allocation11 + $0xc] ss:$16 sps:$4 sm:$0xff]   ;;  %v3317_v3 = vld [vmem:[#allocation11] ss:$16 sps:$4 sm:$0xff]   ;;  %v3318_v4 = vld [vmem:[#allocation11 + $0x8] ss:$16 sps:$4 sm:$0xff]  }
  0x5d   :  { %347 = vmatprep.subr.bf16.mxu0 %v3313_v1  ;;  %420 = vmatprep.subr.bf16.mxu1 %v3315_v2  ;;  %v3319_v5 = vld [vmem:[#allocation11 + $0x24] ss:$16 sps:$4 sm:$0xff]   ;;  %v3321_v6 = vld [vmem:[#allocation11 + $0x2c] ss:$16 sps:$4 sm:$0xff]   ;;  %v3323_v7 = vld [vmem:[#allocation11 + $0x20] ss:$16 sps:$4 sm:$0xff]  }
  0x5e   :  { %348 = vmatpush1.bf16.msra.mxu0 %v3317_v3  ;;  %421 = vmatpush1.bf16.msra.mxu1 %v3318_v4  ;;  %v3324_v8 = vld [vmem:[#allocation11 + $0x28] ss:$16 sps:$4 sm:$0xff]   ;;  %v3325_v9 = vld [vmem:[#allocation11 + $0x44] ss:$16 sps:$4 sm:$0xff]   ;;  %v3327_v10 = vld [vmem:[#allocation11 + $0x4c] ss:$16 sps:$4 sm:$0xff]  }
  0x5f   :  { %349 = vmatprep.subr.bf16.mxu0 %v3319_v5  ;;  %422 = vmatprep.subr.bf16.mxu1 %v3321_v6  ;;  %v3329_v11 = vld [vmem:[#allocation11 + $0x40] ss:$16 sps:$4 sm:$0xff]   ;;  %v3330_v12 = vld [vmem:[#allocation11 + $0x48] ss:$16 sps:$4 sm:$0xff]   ;;  %v3331_v13 = vld [vmem:[#allocation11 + $0x64] ss:$16 sps:$4 sm:$0xff]  }
  0x60   :  { %v3333_v14 = vld [vmem:[#allocation11 + $0x6c] ss:$16 sps:$4 sm:$0xff]   ;;  %v3335_v15 = vld [vmem:[#allocation11 + $0x60] ss:$16 sps:$4 sm:$0xff]   ;;  %v3336_v16 = vld [vmem:[#allocation11 + $0x68] ss:$16 sps:$4 sm:$0xff]  }
  0x61   :  { %v3337_v17 = vld [vmem:[#allocation11 + $0x84] ss:$16 sps:$4 sm:$0xff]   ;;  %v3339_v18 = vld [vmem:[#allocation11 + $0x8c] ss:$16 sps:$4 sm:$0xff]   ;;  %v3341_v19 = vld [vmem:[#allocation11 + $0x80] ss:$16 sps:$4 sm:$0xff]  }
  0x62   :  { %350 = vmatpush1.bf16.msra.mxu0 %v3323_v7  ;;  %423 = vmatpush1.bf16.msra.mxu1 %v3324_v8  ;;  %v3342_v20 = vld [vmem:[#allocation11 + $0x88] ss:$16 sps:$4 sm:$0xff]   ;;  %v3343_v21 = vld [vmem:[#allocation11 + $0xa4] ss:$16 sps:$4 sm:$0xff]   ;;  %v3345_v22 = vld [vmem:[#allocation11 + $0xac] ss:$16 sps:$4 sm:$0xff]   ;;  %v143_v8 = vlaneseq }
  0x63   :  { %351 = vmatprep.subr.bf16.mxu0 %v3325_v9  ;;  %424 = vmatprep.subr.bf16.mxu1 %v3327_v10  ;;  %v3347_v23 = vld [vmem:[#allocation11 + $0xa0] ss:$16 sps:$4 sm:$0xff]   ;;  %v3348_v24 = vld [vmem:[#allocation11 + $0xa8] ss:$16 sps:$4 sm:$0xff]   ;;  %v3349_v25 = vld [vmem:[#allocation11 + $0xc4] ss:$16 sps:$4 sm:$0xff]  }
  0x64   :  { %v3351_v26 = vld [vmem:[#allocation11 + $0xcc] ss:$16 sps:$4 sm:$0xff]   ;;  %v3353_v27 = vld [vmem:[#allocation11 + $0xc0] ss:$16 sps:$4 sm:$0xff]   ;;  %v3354_v28 = vld [vmem:[#allocation11 + $0xc8] ss:$16 sps:$4 sm:$0xff]  }
  0x65   :  { %v3355_v29 = vld [vmem:[#allocation11 + $0xe4] ss:$16 sps:$4 sm:$0xff]   ;;  %v3357_v30 = vld [vmem:[#allocation11 + $0xec] ss:$16 sps:$4 sm:$0xff]   ;;  %v3359_v31 = vld [vmem:[#allocation11 + $0xe0] ss:$16 sps:$4 sm:$0xff]  }
  0x66   :  { %352 = vmatpush1.bf16.msra.mxu0 %v3329_v11  ;;  %425 = vmatpush1.bf16.msra.mxu1 %v3330_v12  ;;  %v3360_v32 = vld [vmem:[#allocation11 + $0xe8] ss:$16 sps:$4 sm:$0xff]   ;;  %v3863_v33 = vld [vmem:[#allocation13 + $0x4] ss:$16 sps:$4 sm:$0xff]   ;;  %v3865_v34 = vld [vmem:[#allocation13 + $0xc] ss:$16 sps:$4 sm:$0xff]  }
  0x67   :  { %353 = vmatprep.subr.bf16.mxu0 %v3331_v13  ;;  %426 = vmatprep.subr.bf16.mxu1 %v3333_v14  ;;  %v3361_v35 = vld [vmem:[#allocation5] sm:$0xff]   ;;  %v3869_v37 = vld [vmem:[#allocation13 + $0x8] ss:$16 sps:$4 sm:$0xff]   ;;  %v3875_v39 = vld [vmem:[#allocation13 + $0x2c] ss:$16 sps:$4 sm:$0xff]   ;;  %v144_v9 = vshrl.u32 %v143_v8, 7 }
  0x68   :  { %v3867_v36 = vld [vmem:[#allocation13] ss:$16 sps:$4 sm:$0xff]   ;;  %v3873_v38 = vld [vmem:[#allocation13 + $0x24] ss:$16 sps:$4 sm:$0xff]   ;;  %v3881_v41 = vld [vmem:[#allocation13 + $0x28] ss:$16 sps:$4 sm:$0xff]  }
  0x69   :  { %v3877_v40 = vld [vmem:[#allocation13 + $0x20] ss:$16 sps:$4 sm:$0xff]   ;;  %v3885_v42 = vld [vmem:[#allocation13 + $0x44] ss:$16 sps:$4 sm:$0xff]   ;;  %v3887_v43 = vld [vmem:[#allocation13 + $0x4c] ss:$16 sps:$4 sm:$0xff]  }
  0x6a   :  { %354 = vmatpush1.bf16.msra.mxu0 %v3335_v15  ;;  %427 = vmatpush1.bf16.msra.mxu1 %v3336_v16  ;;  %v3891_v45 = vld [vmem:[#allocation13 + $0x40] ss:$16 sps:$4 sm:$0xff]   ;;  %v3893_v46 = vld [vmem:[#allocation13 + $0x48] ss:$16 sps:$4 sm:$0xff]   ;;  %v3897_v47 = vld [vmem:[#allocation13 + $0x64] ss:$16 sps:$4 sm:$0xff]  }
  0x6b   :  { %355 = vmatprep.subr.bf16.mxu0 %v3337_v17  ;;  %428 = vmatprep.subr.bf16.mxu1 %v3339_v18  ;;  %v3901_v48 = vld [vmem:[#allocation13 + $0x6c] ss:$16 sps:$4 sm:$0xff]   ;;  %v3903_v49 = vld [vmem:[#allocation13 + $0x60] ss:$16 sps:$4 sm:$0xff]   ;;  %v3905_v50 = vld [vmem:[#allocation13 + $0x68] ss:$16 sps:$4 sm:$0xff]  }
  0x6c   :  { %v3909_v51 = vld [vmem:[#allocation13 + $0x84] ss:$16 sps:$4 sm:$0xff]   ;;  %v3913_v52 = vld [vmem:[#allocation13 + $0x8c] ss:$16 sps:$4 sm:$0xff]   ;;  %v3917_v54 = vld [vmem:[#allocation13 + $0x80] ss:$16 sps:$4 sm:$0xff]  }
  0x6d   :  { %v3387_v53 = vld [vmem:[#allocation5 + $0x10] sm:$0xff]   ;;  %v3919_v55 = vld [vmem:[#allocation13 + $0x88] ss:$16 sps:$4 sm:$0xff]   ;;  %v3923_v57 = vld [vmem:[#allocation13 + $0xac] ss:$16 sps:$4 sm:$0xff]   ;;  %v153_v10 = vsub.s32 2, %v144_v9 }
  0x6e   :  { %356 = vmatpush1.bf16.msra.mxu0 %v3341_v19  ;;  %429 = vmatpush1.bf16.msra.mxu1 %v3342_v20  ;;  %v3921_v56 = vld [vmem:[#allocation13 + $0xa4] ss:$16 sps:$4 sm:$0xff]   ;;  %v3929_v58 = vld [vmem:[#allocation13 + $0xa0] ss:$16 sps:$4 sm:$0xff]   ;;  %v3931_v59 = vld [vmem:[#allocation13 + $0xa8] ss:$16 sps:$4 sm:$0xff]  }
  0x6f   :  { %357 = vmatprep.subr.bf16.mxu0 %v3343_v21  ;;  %430 = vmatprep.subr.bf16.mxu1 %v3345_v22  ;;  %v3933_v60 = vld [vmem:[#allocation13 + $0xc4] ss:$16 sps:$4 sm:$0xff]   ;;  %v3935_v61 = vld [vmem:[#allocation13 + $0xcc] ss:$16 sps:$4 sm:$0xff]   ;;  %v3943_v63 = vld [vmem:[#allocation13 + $0xc0] ss:$16 sps:$4 sm:$0xff]  }
  0x70   :  { %v3400_v62 = vld [vmem:[#allocation5 + $0x18] sm:$0xff]   ;;  %v3947_v2 = vld [vmem:[#allocation13 + $0xe4] ss:$16 sps:$4 sm:$0xff]   ;;  %v3957_v4 = vld [vmem:[#allocation13 + $0xe0] ss:$16 sps:$4 sm:$0xff]   ;;  %v157_v11 = vsub.s32 3, %v144_v9 }
  0x71   :  { %v3945_v1 = vld [vmem:[#allocation13 + $0xc8] ss:$16 sps:$4 sm:$0xff]   ;;  %v3949_v3 = vld [vmem:[#allocation13 + $0xec] ss:$16 sps:$4 sm:$0xff]   ;;  %v97_v6 = vld [vmem:[#allocation8] sm:$0xff]  ;;  %v145_v12 = vsub.s32 0, %v144_v9 }
  0x72   :  { %358 = vmatpush1.bf16.msra.mxu0 %v3347_v23  ;;  %431 = vmatpush1.bf16.msra.mxu1 %v3348_v24  ;;  %v3959_v5 = vld [vmem:[#allocation13 + $0xe8] ss:$16 sps:$4 sm:$0xff]   ;;  %v527_v7 = vpack.c.bf16 %v97_v6, %v97_v6  ;;  %v141_v13 = vld [vmem:[%s4464_s5] sm:$0xf]  ;;  %v149_v14 = vsub.s32 1, %v144_v9  ;;  %s3737_s5 = smov [#allocation15]  }
  0x73   :  { %359 = vmatprep.subr.bf16.mxu0 %v3349_v25  ;;  %432 = vmatprep.subr.bf16.mxu1 %v3351_v26  ;;  %v4006_v15 = vrot.slane %v141_v13, %v153_v10  ;;  %v4012_v18 = vrot.slane %v141_v13, %v157_v11  ;;  %v146_v19 = vrot.slane %v141_v13, %v145_v12  ;;  %s2980_s27 = sshll.u32 %s3737_s5, 4  ;;  %s3738_s23 = smov [#allocation17]   ;;  %s2981_s27 = int_to_ptr.vmem [resolvable:$true] %s2980_s27 }
  0x74   :  { %v150_v22 = vrot.slane %v141_v13, %v149_v14  ;;  %s2990_s24 = sshll.u32 %s3738_s23, 4  ;;  %s3739_s25 = smov [#allocation14]   ;;  %s4406_s24 = int_to_ptr.vmem [resolvable:$true] %s2990_s24 }
  0x75   :  { %s2967_s26 = sshll.u32 %s3739_s25, 4  ;;  %s3651_s28 = scalar_lea.vmem %s2981_s27, 128  ;;  %s4408_s26 = int_to_ptr.vmem [resolvable:$true] %s2967_s26 }
  0x76   :  { %360 = vmatpush1.bf16.msra.mxu0 %v3353_v27  ;;  %433 = vmatpush1.bf16.msra.mxu1 %v3354_v28  ;;  %p3652_p12 = scmp.ne.s32.totalorder %s2981_s27, %s3651_s28  ;;  %p3656_p13 = scmp.lt.s32.totalorder %s2981_s27, %s2981_s27 }
  0x77   :  { %361 = vmatprep.subr.bf16.mxu0 %v3355_v29  ;;  %434 = vmatprep.subr.bf16.mxu1 %v3357_v30  ;;  %p3657_p0 = scmp.lt.s32.totalorder %s3651_s28, %s3651_s28 }
  0x79   :  { %p3658_p1 = por %p3657_p0, %p3656_p13 }
  0x7a   :  { %362 = vmatpush1.bf16.msra.mxu0 %v3359_v31  ;;  %435 = vmatpush1.bf16.msra.mxu1 %v3360_v32 }
  0x7b   :  { %720 = vmatprep.subr.bf16.mxu0 %v3863_v33  ;;  %761 = vmatprep.subr.bf16.mxu1 %v3865_v34  ;;  %p3659_p2 = pnand %p3658_p1, %p3652_p12 }
  0x7d   :  { %380 = vmatmul.mubr.bf16.vlgmr.msra.gmra.mrb[0].mxu0 %v3361_v35  ;;  %453 = vmatmul.mubr.bf16.vlgmr.msra.gmra.mrb[0].mxu1 %v3361_v35 }
  0x7e   :  { %721 = vmatpush1.bf16.msra.mxu0 %v3867_v36  ;;  %762 = vmatpush1.bf16.msra.mxu1 %v3869_v37 }
  0x7f   :  { %722 = vmatprep.subr.bf16.mxu0 %v3873_v38  ;;  %763 = vmatprep.subr.bf16.mxu1 %v3875_v39 }
  0x80   :  { %389 = vmatprep.mubr.bf16.mxu0 %v4468_v0  ;;  %462 = vmatprep.mubr.bf16.mxu1 %v4468_v0 }
  0x82   :  { %723 = vmatpush1.bf16.msra.mxu0 %v3877_v40  ;;  %764 = vmatpush1.bf16.msra.mxu1 %v3881_v41 }
  0x83   :  { %724 = vmatprep.subr.bf16.mxu0 %v3885_v42  ;;  %765 = vmatprep.subr.bf16.mxu1 %v3887_v43 }
  0x85   :  { %390 = vmatmul.mubr.bf16.gmra.mrb[4].mxu0 %v3374_v44  ;;  %463 = vmatmul.mubr.bf16.gmra.mrb[4].mxu1 %v3374_v44 }
  0x86   :  { %725 = vmatpush1.bf16.msra.mxu0 %v3891_v45  ;;  %766 = vmatpush1.bf16.msra.mxu1 %v3893_v46 }
  0x87   :  { %726 = vmatprep.subr.bf16.mxu0 %v3897_v47  ;;  %767 = vmatprep.subr.bf16.mxu1 %v3901_v48 }
  0x88   :  { %399 = vmatprep.mubr.bf16.mxu0 %v4468_v0  ;;  %472 = vmatprep.mubr.bf16.mxu1 %v4468_v0 }
  0x8a   :  { %727 = vmatpush1.bf16.msra.mxu0 %v3903_v49  ;;  %768 = vmatpush1.bf16.msra.mxu1 %v3905_v50 }
  0x8b   :  { %728 = vmatprep.subr.bf16.mxu0 %v3909_v51  ;;  %769 = vmatprep.subr.bf16.mxu1 %v3913_v52 }
  0x8d   :  { %400 = vmatmul.mubr.bf16.gmra.mrb[8].mxu0 %v3387_v53  ;;  %473 = vmatmul.mubr.bf16.gmra.mrb[8].mxu1 %v3387_v53 }
  0x8e   :  { %729 = vmatpush1.bf16.msra.mxu0 %v3917_v54  ;;  %770 = vmatpush1.bf16.msra.mxu1 %v3919_v55 }
  0x8f   :  { %730 = vmatprep.subr.bf16.mxu0 %v3921_v56  ;;  %771 = vmatprep.subr.bf16.mxu1 %v3923_v57 }
  0x90   :  { %409 = vmatprep.mubr.bf16.mxu0 %v4468_v0  ;;  %482 = vmatprep.mubr.bf16.mxu1 %v4468_v0 }
  0x92   :  { %731 = vmatpush1.bf16.msra.mxu0 %v3929_v58  ;;  %772 = vmatpush1.bf16.msra.mxu1 %v3931_v59 }
  0x93   :  { %732 = vmatprep.subr.bf16.mxu0 %v3933_v60  ;;  %773 = vmatprep.subr.bf16.mxu1 %v3935_v61 }
  0x95   :  { %410 = vmatmul.mubr.bf16.gmra.mrb[12].mxu0 %v3400_v62  ;;  %483 = vmatmul.mubr.bf16.gmra.mrb[12].mxu1 %v3400_v62 }
  0x96   :  { %733 = vmatpush1.bf16.msra.mxu0 %v3943_v63  ;;  %774 = vmatpush1.bf16.msra.mxu1 %v3945_v1 }
  0x97   :  { %734 = vmatprep.subr.bf16.mxu0 %v3947_v2  ;;  %775 = vmatprep.subr.bf16.mxu1 %v3949_v3 }
  0x98   :  { %752 = vmatprep.mubr.bf16.mxu0 %v4468_v0  ;;  %793 = vmatprep.mubr.bf16.mxu1 %v4468_v0 }
  0x9a   :  { %735 = vmatpush1.bf16.msra.mxu0 %v3957_v4  ;;  %776 = vmatpush1.bf16.msra.mxu1 %v3959_v5 }
  0x9b   :  { %1022 = vmatprep.subr.bf16.mxu0 %v3863_v33  ;;  %1063 = vmatprep.subr.bf16.mxu1 %v3865_v34 }
  0x9d   :  { %753 = vmatmul.mubr.bf16.vlgmr.msra.gmra.mrb[16].mxu0 %v527_v7  ;;  %794 = vmatmul.mubr.bf16.vlgmr.msra.gmra.mrb[16].mxu1 %v527_v7 }
  0x9e   :  { %1023 = vmatpush1.bf16.msra.mxu0 %v3867_v36  ;;  %1064 = vmatpush1.bf16.msra.mxu1 %v3869_v37 }
  0x9f   :  { %1024 = vmatprep.subr.bf16.mxu0 %v3873_v38  ;;  %1065 = vmatprep.subr.bf16.mxu1 %v3875_v39 }
  0xa0   :  { %1054 = vmatprep.mubr.bf16.mxu0 %v4468_v0  ;;  %1095 = vmatprep.mubr.bf16.mxu1 %v4468_v0 }
  0xa2   :  { %1025 = vmatpush1.bf16.msra.mxu0 %v3877_v40  ;;  %1066 = vmatpush1.bf16.msra.mxu1 %v3881_v41 }
  0xa3   :  { %1026 = vmatprep.subr.bf16.mxu0 %v3885_v42  ;;  %1067 = vmatprep.subr.bf16.mxu1 %v3887_v43 }
  0xa6   :  { %1027 = vmatpush1.bf16.msra.mxu0 %v3891_v45  ;;  %1068 = vmatpush1.bf16.msra.mxu1 %v3893_v46 }
  0xa7   :  { %1028 = vmatprep.subr.bf16.mxu0 %v3897_v47  ;;  %1069 = vmatprep.subr.bf16.mxu1 %v3901_v48 }
  0xaa   :  { %1029 = vmatpush1.bf16.msra.mxu0 %v3903_v49  ;;  %1070 = vmatpush1.bf16.msra.mxu1 %v3905_v50 }
  0xab   :  { %1030 = vmatprep.subr.bf16.mxu0 %v3909_v51  ;;  %1071 = vmatprep.subr.bf16.mxu1 %v3913_v52 }
  0xae   :  { %1031 = vmatpush1.bf16.msra.mxu0 %v3917_v54  ;;  %1072 = vmatpush1.bf16.msra.mxu1 %v3919_v55 }
  0xaf   :  { %1032 = vmatprep.subr.bf16.mxu0 %v3921_v56  ;;  %1073 = vmatprep.subr.bf16.mxu1 %v3923_v57 }
  0xb2   :  { %1033 = vmatpush1.bf16.msra.mxu0 %v3929_v58  ;;  %1074 = vmatpush1.bf16.msra.mxu1 %v3931_v59 }
  0xb3   :  { %1034 = vmatprep.subr.bf16.mxu0 %v3933_v60  ;;  %1075 = vmatprep.subr.bf16.mxu1 %v3935_v61 }
  0xb6   :  { %1035 = vmatpush1.bf16.msra.mxu0 %v3943_v63  ;;  %1076 = vmatpush1.bf16.msra.mxu1 %v3945_v1 }
  0xb7   :  { %1036 = vmatprep.subr.bf16.mxu0 %v3947_v2  ;;  %1077 = vmatprep.subr.bf16.mxu1 %v3949_v3 }
  0xba   :  { %1037 = vmatpush1.bf16.msra.mxu0 %v3957_v4  ;;  %1078 = vmatpush1.bf16.msra.mxu1 %v3959_v5 }
  0xbb   :  { %1326 = vmatprep.subr.bf16.mxu0 %v3863_v33  ;;  %1367 = vmatprep.subr.bf16.mxu1 %v3865_v34 }
 0x150   :  { %v4008_v16 = vpop.f32.mrb[0].mxu0  ;;  %v4010_v17 = vpop.f32.mrb[0].mxu1 }
 0x151   :  { %v383_v20 = vpop.f32.mrb[1].mxu0  ;;  %v456_v21 = vpop.f32.mrb[1].mxu1 }
 0x152   :  { %v385_v23 = vpop.f32.mrb[2].mxu0  ;;  %v458_v24 = vpop.f32.mrb[2].mxu1 }
 0x153   :  { %v4014_v25 = vadd.f32 %v385_v23, %v146_v19  ;;  %v387_v26 = vpop.f32.mrb[3].mxu0  ;;  %v4017_v27 = vadd.f32 %v458_v24, %v4006_v15  ;;  %v460_v28 = vpop.f32.mrb[3].mxu1 }
 0x154   :  { %v4019_v29 = vadd.f32 %v387_v26, %v150_v22  ;;  %v4022_v30 = vadd.f32 %v460_v28, %v4012_v18 }
 0x158   :  { %v391_v31 = vpop.f32.mrb[4].mxu0  ;;  %v464_v32 = vpop.f32.mrb[4].mxu1 }
 0x159   :  { %v4024_v35 = vadd.f32 %v391_v31, %v146_v19  ;;  %v393_v44 = vpop.f32.mrb[5].mxu0  ;;  %v4027_v53 = vadd.f32 %v464_v32, %v4006_v15  ;;  %v466_v62 = vpop.f32.mrb[5].mxu1 }
 0x15a   :  { %v4029_v6 = vadd.f32 %v393_v44, %v150_v22  ;;  %v395_v7 = vpop.f32.mrb[6].mxu0  ;;  %v4032_v8 = vadd.f32 %v466_v62, %v4012_v18  ;;  %v468_v9 = vpop.f32.mrb[6].mxu1 }
 0x15b   :  { %v4034_v10 = vadd.f32 %v395_v7, %v146_v19  ;;  %v397_v11 = vpop.f32.mrb[7].mxu0  ;;  %v4037_v12 = vadd.f32 %v468_v9, %v4006_v15  ;;  %v470_v13 = vpop.f32.mrb[7].mxu1 }
 0x15c   :  { %4470 = vst [vmem:[#allocation23_spill] sm:$0xff] %v4032_v8  ;;  %v4039_v14 = vadd.f32 %v397_v11, %v150_v22  ;;  %v4042_v23 = vadd.f32 %v470_v13, %v4012_v18 }
 0x15d   :  { %4471 = vst [vmem:[#allocation24_spill] sm:$0xff] %v4034_v10  ;;  %4472 = vst [vmem:[#allocation25_spill] sm:$0xff] %v4037_v12 }
 0x15e   :  { %4473 = vst [vmem:[#allocation26_spill] sm:$0xff] %v4039_v14  ;;  %4474 = vst [vmem:[#allocation27_spill] sm:$0xff] %v4042_v23 }
 0x160   :  { %v401_v24 = vpop.f32.mrb[8].mxu0  ;;  %v474_v26 = vpop.f32.mrb[8].mxu1 }
 0x161   :  { %v4044_v28 = vadd.f32 %v401_v24, %v146_v19  ;;  %v403_v31 = vpop.f32.mrb[9].mxu0  ;;  %v4047_v32 = vadd.f32 %v474_v26, %v4006_v15  ;;  %v476_v44 = vpop.f32.mrb[9].mxu1 }
 0x162   :  { %v4049_v62 = vadd.f32 %v403_v31, %v150_v22  ;;  %v405_v7 = vpop.f32.mrb[10].mxu0  ;;  %v4052_v9 = vadd.f32 %v476_v44, %v4012_v18  ;;  %v478_v11 = vpop.f32.mrb[10].mxu1 }
 0x163   :  { %4475 = vst [vmem:[#allocation28_spill] sm:$0xff] %v4044_v28  ;;  %4476 = vst [vmem:[#allocation29_spill] sm:$0xff] %v4047_v32  ;;  %v4054_v0 = vadd.f32 %v405_v7, %v146_v19  ;;  %v407_v13 = vpop.f32.mrb[11].mxu0  ;;  %v4057_v23 = vadd.f32 %v478_v11, %v4006_v15  ;;  %v480_v24 = vpop.f32.mrb[11].mxu1 }
 0x164   :  { %4477 = vst [vmem:[#allocation30_spill] sm:$0xff] %v4049_v62  ;;  %4478 = vst [vmem:[#allocation31_spill] sm:$0xff] %v4052_v9  ;;  %v4059_v28 = vadd.f32 %v407_v13, %v150_v22  ;;  %v4062_v26 = vadd.f32 %v480_v24, %v4012_v18 }
 0x165   :  { %4479 = vst [vmem:[#allocation32_spill] sm:$0xff] %v4054_v0  ;;  %4480 = vst [vmem:[#allocation33_spill] sm:$0xff] %v4057_v23 }
 0x166   :  { %4481 = vst [vmem:[#allocation34_spill] sm:$0xff] %v4059_v28  ;;  %4482 = vst [vmem:[#allocation35_spill] sm:$0xff] %v4062_v26 }
 0x168   :  { %v411_v32 = vpop.f32.mrb[12].mxu0  ;;  %v484_v31 = vpop.f32.mrb[12].mxu1 }
 0x169   :  { %v4064_v62 = vadd.f32 %v411_v32, %v146_v19  ;;  %v413_v14 = vpop.f32.mrb[13].mxu0  ;;  %v4067_v44 = vadd.f32 %v484_v31, %v4006_v15  ;;  %v486_v7 = vpop.f32.mrb[13].mxu1 }
 0x16a   :  { %v4069_v0 = vadd.f32 %v413_v14, %v150_v22  ;;  %v415_v9 = vpop.f32.mrb[14].mxu0  ;;  %v4072_v11 = vadd.f32 %v486_v7, %v4012_v18  ;;  %v488_v13 = vpop.f32.mrb[14].mxu1  ;;  %v382_v14 = vadd.f32 %v4008_v16, %v146_v19  ;;  %v384_v7 = vadd.f32 %v383_v20, %v150_v22 }
 0x16b   :  { %4483 = vst [vmem:[#allocation36_spill] sm:$0xff] %v4064_v62  ;;  %4484 = vst [vmem:[#allocation37_spill] sm:$0xff] %v4067_v44  ;;  %v4074_v28 = vadd.f32 %v415_v9, %v146_v19  ;;  %v417_v24 = vpop.f32.mrb[15].mxu0  ;;  %v4077_v26 = vadd.f32 %v488_v13, %v4006_v15  ;;  %v490_v32 = vpop.f32.mrb[15].mxu1 }
 0x16c   :  { %4485 = vst [vmem:[#allocation38_spill] sm:$0xff] %v4069_v0  ;;  %4486 = vst [vmem:[#allocation39_spill] sm:$0xff] %v4072_v11  ;;  %v4079_v62 = vadd.f32 %v417_v24, %v150_v22  ;;  %v4082_v31 = vadd.f32 %v490_v32, %v4012_v18  ;;  %v455_v0 = vadd.f32 %v4010_v17, %v4006_v15  ;;  %v99_v22 = vld [vmem:[#allocation10] sm:$0xff] }
 0x16d   :  { %4487 = vst [vmem:[#allocation40_spill] sm:$0xff] %v4074_v28  ;;  %4488 = vst [vmem:[#allocation41_spill] sm:$0xff] %v4077_v26  ;;  %v457_v11 = vadd.f32 %v456_v21, %v4012_v18 }
 0x16e   :  { %4489 = vst [vmem:[#allocation42_spill] sm:$0xff] %v4079_v62  ;;  %4490 = vst [vmem:[#allocation43_spill] sm:$0xff] %v4082_v31 }
 0x170   :  { %v754_v9 = vpop.f32.mrb[16].mxu0  ;;  %v795_v28 = vpop.f32.mrb[16].mxu1 }
 0x171   :  { %v806_v44 = vadd.f32 %v754_v9, %v382_v14  ;;  %v808_v23 = vadd.f32 %v795_v28, %v455_v0  ;;  %v756_v13 = vpop.f32.mrb[17].mxu0  ;;  %v797_v26 = vpop.f32.mrb[17].mxu1  ;;  %v4491_v14 = vmov 0  }
 0x172   :  { %v807_v12 = vadd.f32 %v756_v13, %v384_v7  ;;  %v809_v24 = vadd.f32 %v797_v26, %v457_v11  ;;  %v758_v62 = vpop.f32.mrb[18].mxu0  ;;  %v799_v10 = vpop.f32.mrb[18].mxu1 }
 0x173   :  { %v810_v32 = vmul.f32 0.5, %v806_v44  ;;  %v759_v31 = vpop.f32.mrb[19].mxu0  ;;  %v800_v8 = vpop.f32.mrb[19].mxu1  ;;  %v812_v15 = vmul.f32 0.5, %v808_v23 }
 0x174   :  { %v811_v16 = vmul.f32 0.5, %v807_v12 }
 0x175   :  { %3461 = vtanh.f32 %v810_v32 }
 0x176   :  { %3463 = vtanh.f32 %v811_v16 }
 0x177   :  { %3465 = vtanh.f32 %v809_v24 }
 0x178   :  { %3467 = vtanh.f32 %v812_v15 }
 0x17f   :  { %v3462_v17 = vpop.eup %3461 }
 0x180   :  { %v816_v18 = vmul.f32 0.5, %v3462_v17  ;;  %v3464_v19 = vpop.eup %3463 }
 0x181   :  { %v817_v0 = vmul.f32 0.5, %v3464_v19  ;;  %v3466_v21 = vpop.eup %3465 }
 0x182   :  { %v819_v20 = vadd.f32 0.5, %v816_v18  ;;  %v3468_v8 = vpop.eup %3467 }
 0x183   :  { %v820_v28 = vadd.f32 0.5, %v817_v0  ;;  %v818_v12 = vmul.f32 0.5, %v3468_v8 }
 0x184   :  { %v824_v26 = vmul.f32 %v3466_v21, %v819_v20 }
 0x185   :  { %v823_v62 = vmul.f32 %v820_v28, %v99_v22  ;;  %v821_v44 = vadd.f32 0.5, %v818_v12 }
 0x187   :  { %v4088_v10 = vadd.f32 %v824_v26, %v823_v62 }
 0x189   :  { %3469 = vtanh.f32 %v4088_v10 }
 0x193   :  { %v3470_v11 = vpop.eup %3469 }
 0x194   :  { %v827_v23 = vmul.f32 %v3470_v11, %v821_v44 }
 0x196   :  { %v828_v31 = vpack.c.bf16 %v827_v23, %v827_v23 }
 0x198   :  { %829 = vst [vmem:[#allocation14] sm:$0xf] %v828_v31  ;;  %1055 = vmatmul.mubr.bf16.vlgmr.msra.gmra.mrb[20].mxu0 %v828_v31  ;;  %1096 = vmatmul.mubr.bf16.vlgmr.msra.gmra.mrb[20].mxu1 %v828_v31 }
 0x199   :  { %1327 = vmatpush1.bf16.msra.mxu0 %v3867_v36  ;;  %1368 = vmatpush1.bf16.msra.mxu1 %v3869_v37 }
 0x19a   :  { %1328 = vmatprep.subr.bf16.mxu0 %v3873_v38  ;;  %1369 = vmatprep.subr.bf16.mxu1 %v3875_v39 }
 0x19b   :  { %1358 = vmatprep.mubr.bf16.mxu0 %v4491_v14  ;;  %1399 = vmatprep.mubr.bf16.mxu1 %v4491_v14 }
 0x19d   :  { %1329 = vmatpush1.bf16.msra.mxu0 %v3877_v40  ;;  %1370 = vmatpush1.bf16.msra.mxu1 %v3881_v41 }
 0x19e   :  { %1330 = vmatprep.subr.bf16.mxu0 %v3885_v42  ;;  %1371 = vmatprep.subr.bf16.mxu1 %v3887_v43 }
 0x1a1   :  { %1331 = vmatpush1.bf16.msra.mxu0 %v3891_v45  ;;  %1372 = vmatpush1.bf16.msra.mxu1 %v3893_v46 }
 0x1a2   :  { %1332 = vmatprep.subr.bf16.mxu0 %v3897_v47  ;;  %1373 = vmatprep.subr.bf16.mxu1 %v3901_v48 }
 0x1a5   :  { %1333 = vmatpush1.bf16.msra.mxu0 %v3903_v49  ;;  %1374 = vmatpush1.bf16.msra.mxu1 %v3905_v50 }
 0x1a6   :  { %1334 = vmatprep.subr.bf16.mxu0 %v3909_v51  ;;  %1375 = vmatprep.subr.bf16.mxu1 %v3913_v52 }
 0x1a9   :  { %1335 = vmatpush1.bf16.msra.mxu0 %v3917_v54  ;;  %1376 = vmatpush1.bf16.msra.mxu1 %v3919_v55 }
 0x1aa   :  { %1336 = vmatprep.subr.bf16.mxu0 %v3921_v56  ;;  %1377 = vmatprep.subr.bf16.mxu1 %v3923_v57 }
 0x1ad   :  { %1337 = vmatpush1.bf16.msra.mxu0 %v3929_v58  ;;  %1378 = vmatpush1.bf16.msra.mxu1 %v3931_v59 }
 0x1ae   :  { %1338 = vmatprep.subr.bf16.mxu0 %v3933_v60  ;;  %1379 = vmatprep.subr.bf16.mxu1 %v3935_v61 }
 0x1b1   :  { %1339 = vmatpush1.bf16.msra.mxu0 %v3943_v63  ;;  %1380 = vmatpush1.bf16.msra.mxu1 %v3945_v1 }
 0x1b2   :  { %1340 = vmatprep.subr.bf16.mxu0 %v3947_v2  ;;  %1381 = vmatprep.subr.bf16.mxu1 %v3949_v3 }
 0x1b5   :  { %1341 = vmatpush1.bf16.msra.mxu0 %v3957_v4  ;;  %1382 = vmatpush1.bf16.msra.mxu1 %v3959_v5 }
 0x1b6   :  { %1630 = vmatprep.subr.bf16.mxu0 %v3863_v33  ;;  %1671 = vmatprep.subr.bf16.mxu1 %v3865_v34 }
 0x26b   :  { %v1056_v7 = vpop.f32.mrb[20].mxu0  ;;  %v1097_v9 = vpop.f32.mrb[20].mxu1 }
 0x26c   :  { %v1109_v13 = vadd.f32 %v1056_v7, %v4014_v25  ;;  %v1111_v24 = vadd.f32 %v1097_v9, %v4017_v27  ;;  %v1058_v32 = vpop.f32.mrb[21].mxu0  ;;  %v1099_v16 = vpop.f32.mrb[21].mxu1 }
 0x26d   :  { %v1110_v15 = vadd.f32 %v1058_v32, %v4019_v29  ;;  %v1112_v17 = vadd.f32 %v1099_v16, %v4022_v30  ;;  %v1060_v18 = vpop.f32.mrb[22].mxu0  ;;  %v1101_v19 = vpop.f32.mrb[22].mxu1  ;;  %v4187_v32 = vld [vmem:[#allocation13 + $0x24] ss:$16 sps:$4 sm:$0xff]   ;;  %v4189_v16 = vld [vmem:[#allocation13 + $0x2c] ss:$16 sps:$4 sm:$0xff]  }
 0x26e   :  { %v1113_v20 = vmul.f32 0.5, %v1109_v13  ;;  %v1061_v0 = vpop.f32.mrb[23].mxu0  ;;  %v1102_v21 = vpop.f32.mrb[23].mxu1  ;;  %v1115_v34 = vmul.f32 0.5, %v1111_v24  ;;  %v4179_v13 = vld [vmem:[#allocation13] ss:$16 sps:$4 sm:$0xff]  }
 0x26f   :  { %v1114_v33 = vmul.f32 0.5, %v1110_v15  ;;  %v4181_v24 = vld [vmem:[#allocation13 + $0x8] ss:$16 sps:$4 sm:$0xff]   ;;  %v4191_v15 = vld [vmem:[#allocation13 + $0x20] ss:$16 sps:$4 sm:$0xff]  }
 0x270   :  { %3471 = vtanh.f32 %v1113_v20  ;;  %v4199_v18 = vld [vmem:[#allocation13 + $0x44] ss:$16 sps:$4 sm:$0xff]   ;;  %v4201_v19 = vld [vmem:[#allocation13 + $0x4c] ss:$16 sps:$4 sm:$0xff]   ;;  %v4203_v20 = vld [vmem:[#allocation13 + $0x40] ss:$16 sps:$4 sm:$0xff]  }
 0x271   :  { %3473 = vtanh.f32 %v1114_v33  ;;  %v4205_v0 = vld [vmem:[#allocation13 + $0x48] ss:$16 sps:$4 sm:$0xff]   ;;  %v4211_v21 = vld [vmem:[#allocation13 + $0x64] ss:$16 sps:$4 sm:$0xff]   ;;  %v4213_v33 = vld [vmem:[#allocation13 + $0x6c] ss:$16 sps:$4 sm:$0xff]  }
 0x272   :  { %3475 = vtanh.f32 %v1112_v17  ;;  %v4193_v17 = vld [vmem:[#allocation13 + $0x28] ss:$16 sps:$4 sm:$0xff]  }
 0x273   :  { %3477 = vtanh.f32 %v1115_v34  ;;  %v4215_v34 = vld [vmem:[#allocation13 + $0x60] ss:$16 sps:$4 sm:$0xff]  }
 0x27a   :  { %v3472_v22 = vpop.eup %3471 }
 0x27b   :  { %v1119_v25 = vmul.f32 0.5, %v3472_v22  ;;  %v3474_v28 = vpop.eup %3473  ;;  %v4217_v22 = vld [vmem:[#allocation13 + $0x68] ss:$16 sps:$4 sm:$0xff]  }
 0x27c   :  { %v1120_v26 = vmul.f32 0.5, %v3474_v28  ;;  %v3476_v62 = vpop.eup %3475  ;;  %v4225_v28 = vld [vmem:[#allocation13 + $0x8c] ss:$16 sps:$4 sm:$0xff]  }
 0x27d   :  { %v1122_v27 = vadd.f32 0.5, %v1119_v25  ;;  %v3478_v44 = vpop.eup %3477  ;;  %v4223_v25 = vld [vmem:[#allocation13 + $0x84] ss:$16 sps:$4 sm:$0xff]  }
 0x27e   :  { %v1123_v29 = vadd.f32 0.5, %v1120_v26  ;;  %v1121_v11 = vmul.f32 0.5, %v3478_v44  ;;  %v4229_v26 = vld [vmem:[#allocation13 + $0x88] ss:$16 sps:$4 sm:$0xff]   ;;  %v4246_v44 = vld [vmem:[#allocation13 + $0xcc] ss:$16 sps:$4 sm:$0xff]  }
 0x27f   :  { %v1127_v8 = vmul.f32 %v3476_v62, %v1122_v27  ;;  %v4227_v27 = vld [vmem:[#allocation13 + $0x80] ss:$16 sps:$4 sm:$0xff]  }
 0x280   :  { %v1126_v30 = vmul.f32 %v1123_v29, %v4088_v10  ;;  %v1124_v23 = vadd.f32 0.5, %v1121_v11  ;;  %v4177_v10 = vld [vmem:[#allocation13 + $0xc] ss:$16 sps:$4 sm:$0xff]   ;;  %v4235_v62 = vld [vmem:[#allocation13 + $0xa0] ss:$16 sps:$4 sm:$0xff]  }
 0x281   :  { %v4237_v29 = vld [vmem:[#allocation13 + $0xa4] ss:$16 sps:$4 sm:$0xff]   ;;  %v4251_v11 = vld [vmem:[#allocation13 + $0xc0] ss:$16 sps:$4 sm:$0xff]  }
 0x282   :  { %v4130_v12 = vadd.f32 %v1127_v8, %v1126_v30  ;;  %v4239_v8 = vld [vmem:[#allocation13 + $0xa8] ss:$16 sps:$4 sm:$0xff]   ;;  %v4241_v30 = vld [vmem:[#allocation13 + $0xac] ss:$16 sps:$4 sm:$0xff]  }
 0x284   :  { %3479 = vtanh.f32 %v4130_v12 }
 0x28e   :  { %v3480_v31 = vpop.eup %3479 }
 0x28f   :  { %v1130_v7 = vmul.f32 %v3480_v31, %v1124_v23  ;;  %v4253_v23 = vld [vmem:[#allocation13 + $0xc8] ss:$16 sps:$4 sm:$0xff]   ;;  %v4257_v31 = vld [vmem:[#allocation13 + $0xe4] ss:$16 sps:$4 sm:$0xff]  }
 0x291   :  { %v1131_v9 = vpack.c.bf16 %v1130_v7, %v1130_v7  ;;  %v4259_v7 = vld [vmem:[#allocation13 + $0xec] ss:$16 sps:$4 sm:$0xff]  }
 0x293   :  { %1133 = vst [vmem:[#allocation14 + $0x4] sm:$0xf] %v1131_v9  ;;  %1359 = vmatmul.mubr.bf16.vlgmr.msra.gmra.mrb[24].mxu0 %v1131_v9  ;;  %1400 = vmatmul.mubr.bf16.vlgmr.msra.gmra.mrb[24].mxu1 %v1131_v9  ;;  %v4263_v9 = vld [vmem:[#allocation13 + $0xe0] ss:$16 sps:$4 sm:$0xff]  }
 0x294   :  { %1631 = vmatpush1.bf16.msra.mxu0 %v3867_v36  ;;  %1672 = vmatpush1.bf16.msra.mxu1 %v3869_v37 }
 0x295   :  { %1632 = vmatprep.subr.bf16.mxu0 %v3873_v38  ;;  %1673 = vmatprep.subr.bf16.mxu1 %v3875_v39 }
 0x296   :  { %1662 = vmatprep.mubr.bf16.mxu0 %v4491_v14  ;;  %1703 = vmatprep.mubr.bf16.mxu1 %v4491_v14 }
 0x298   :  { %1633 = vmatpush1.bf16.msra.mxu0 %v3877_v40  ;;  %1674 = vmatpush1.bf16.msra.mxu1 %v3881_v41 }
 0x299   :  { %1634 = vmatprep.subr.bf16.mxu0 %v3885_v42  ;;  %1675 = vmatprep.subr.bf16.mxu1 %v3887_v43  ;;  %v4492_v43 = vld [vmem:[#allocation23_spill] sm:$0xff] }
 0x29c   :  { %1635 = vmatpush1.bf16.msra.mxu0 %v3891_v45  ;;  %1676 = vmatpush1.bf16.msra.mxu1 %v3893_v46 }
 0x29d   :  { %1636 = vmatprep.subr.bf16.mxu0 %v3897_v47  ;;  %1677 = vmatprep.subr.bf16.mxu1 %v3901_v48 }
 0x2a0   :  { %1637 = vmatpush1.bf16.msra.mxu0 %v3903_v49  ;;  %1678 = vmatpush1.bf16.msra.mxu1 %v3905_v50 }
 0x2a1   :  { %1638 = vmatprep.subr.bf16.mxu0 %v3909_v51  ;;  %1679 = vmatprep.subr.bf16.mxu1 %v3913_v52 }
 0x2a4   :  { %1639 = vmatpush1.bf16.msra.mxu0 %v3917_v54  ;;  %1680 = vmatpush1.bf16.msra.mxu1 %v3919_v55 }
 0x2a5   :  { %1640 = vmatprep.subr.bf16.mxu0 %v3921_v56  ;;  %1681 = vmatprep.subr.bf16.mxu1 %v3923_v57 }
 0x2a8   :  { %1641 = vmatpush1.bf16.msra.mxu0 %v3929_v58  ;;  %1682 = vmatpush1.bf16.msra.mxu1 %v3931_v59 }
 0x2a9   :  { %1642 = vmatprep.subr.bf16.mxu0 %v3933_v60  ;;  %1683 = vmatprep.subr.bf16.mxu1 %v3935_v61 }
 0x2ac   :  { %1643 = vmatpush1.bf16.msra.mxu0 %v3943_v63  ;;  %1684 = vmatpush1.bf16.msra.mxu1 %v3945_v1 }
 0x2ad   :  { %1644 = vmatprep.subr.bf16.mxu0 %v3947_v2  ;;  %1685 = vmatprep.subr.bf16.mxu1 %v3949_v3 }
 0x2b0   :  { %1645 = vmatpush1.bf16.msra.mxu0 %v3957_v4  ;;  %1686 = vmatpush1.bf16.msra.mxu1 %v3959_v5 }
 0x2b1   :  { %1975 = vmatprep.subr.bf16.mxu1 %v4177_v10 }
 0x366   :  { %v1360_v36 = vpop.f32.mrb[24].mxu0  ;;  %v1401_v37 = vpop.f32.mrb[24].mxu1 }
 0x367   :  { %v1413_v38 = vadd.f32 %v1360_v36, %v4024_v35  ;;  %v1415_v39 = vadd.f32 %v1401_v37, %v4027_v53  ;;  %v1362_v40 = vpop.f32.mrb[25].mxu0  ;;  %v1403_v41 = vpop.f32.mrb[25].mxu1  ;;  %v4265_v36 = vld [vmem:[#allocation13 + $0xe8] ss:$16 sps:$4 sm:$0xff]  }
 0x368   :  { %v1414_v42 = vadd.f32 %v1362_v40, %v4029_v6  ;;  %v1416_v45 = vadd.f32 %v1403_v41, %v4492_v43  ;;  %v1364_v46 = vpop.f32.mrb[26].mxu0  ;;  %v1405_v47 = vpop.f32.mrb[26].mxu1  ;;  %v4175_v6 = vld [vmem:[#allocation13 + $0x4] ss:$16 sps:$4 sm:$0xff]  }
 0x369   :  { %v1417_v48 = vmul.f32 0.5, %v1413_v38  ;;  %v1365_v49 = vpop.f32.mrb[27].mxu0  ;;  %v1406_v50 = vpop.f32.mrb[27].mxu1  ;;  %v1419_v52 = vmul.f32 0.5, %v1415_v39  ;;  %1934 = vmatprep.subr.bf16.mxu0 %v4175_v6  ;;  %v4493_v39 = vld [vmem:[#allocation24_spill] sm:$0xff]  ;;  %v4494_v41 = vld [vmem:[#allocation25_spill] sm:$0xff] }
 0x36a   :  { %v1418_v51 = vmul.f32 0.5, %v1414_v42  ;;  %v4495_v46 = vld [vmem:[#allocation26_spill] sm:$0xff] }
 0x36b   :  { %3481 = vtanh.f32 %v1417_v48  ;;  %v4496_v48 = vld [vmem:[#allocation27_spill] sm:$0xff] }
 0x36c   :  { %3483 = vtanh.f32 %v1418_v51 }
 0x36d   :  { %3485 = vtanh.f32 %v1416_v45 }
 0x36e   :  { %3487 = vtanh.f32 %v1419_v52 }
 0x375   :  { %v3482_v54 = vpop.eup %3481 }
 0x376   :  { %v1423_v55 = vmul.f32 0.5, %v3482_v54  ;;  %v3484_v56 = vpop.eup %3483 }
 0x377   :  { %v1424_v58 = vmul.f32 0.5, %v3484_v56  ;;  %v3486_v59 = vpop.eup %3485 }
 0x378   :  { %v1426_v57 = vadd.f32 0.5, %v1423_v55  ;;  %v3488_v2 = vpop.eup %3487 }
 0x379   :  { %v1427_v60 = vadd.f32 0.5, %v1424_v58  ;;  %v1425_v3 = vmul.f32 0.5, %v3488_v2 }
 0x37a   :  { %v1431_v61 = vmul.f32 %v3486_v59, %v1426_v57 }
 0x37b   :  { %v1430_v63 = vmul.f32 %v1427_v60, %v4130_v12  ;;  %v1428_v4 = vadd.f32 0.5, %v1425_v3  ;;  %v4243_v12 = vld [vmem:[#allocation13 + $0xc4] ss:$16 sps:$4 sm:$0xff]  }
 0x37d   :  { %v4170_v1 = vadd.f32 %v1431_v61, %v1430_v63 }
 0x37f   :  { %3489 = vtanh.f32 %v4170_v1 }
 0x389   :  { %v3490_v5 = vpop.eup %3489 }
 0x38a   :  { %v1434_v35 = vmul.f32 %v3490_v5, %v1428_v4 }
 0x38c   :  { %v1435_v53 = vpack.c.bf16 %v1434_v35, %v1434_v35 }
 0x38e   :  { %1437 = vst [vmem:[#allocation14 + $0x8] sm:$0xf] %v1435_v53  ;;  %1663 = vmatmul.mubr.bf16.vlgmr.msra.gmra.mrb[28].mxu0 %v1435_v53  ;;  %1704 = vmatmul.mubr.bf16.vlgmr.msra.gmra.mrb[28].mxu1 %v1435_v53 }
 0x38f   :  { %1966 = vmatprep.mubr.bf16.mxu0 %v4491_v14  ;;  %2007 = vmatprep.mubr.bf16.mxu1 %v4491_v14 }
 0x390   :  { %1935 = vmatpush1.bf16.msra.mxu0 %v4179_v13  ;;  %1976 = vmatpush1.bf16.msra.mxu1 %v4181_v24 }
 0x391   :  { %1936 = vmatprep.subr.bf16.mxu0 %v4187_v32  ;;  %1977 = vmatprep.subr.bf16.mxu1 %v4189_v16 }
 0x394   :  { %1937 = vmatpush1.bf16.msra.mxu0 %v4191_v15  ;;  %1978 = vmatpush1.bf16.msra.mxu1 %v4193_v17 }
 0x395   :  { %1938 = vmatprep.subr.bf16.mxu0 %v4199_v18  ;;  %1979 = vmatprep.subr.bf16.mxu1 %v4201_v19 }
 0x398   :  { %1939 = vmatpush1.bf16.msra.mxu0 %v4203_v20  ;;  %1980 = vmatpush1.bf16.msra.mxu1 %v4205_v0 }
 0x399   :  { %1940 = vmatprep.subr.bf16.mxu0 %v4211_v21  ;;  %1981 = vmatprep.subr.bf16.mxu1 %v4213_v33 }
 0x39c   :  { %1941 = vmatpush1.bf16.msra.mxu0 %v4215_v34  ;;  %1982 = vmatpush1.bf16.msra.mxu1 %v4217_v22 }
 0x39d   :  { %1942 = vmatprep.subr.bf16.mxu0 %v4223_v25  ;;  %1983 = vmatprep.subr.bf16.mxu1 %v4225_v28 }
 0x3a0   :  { %1943 = vmatpush1.bf16.msra.mxu0 %v4227_v27  ;;  %1984 = vmatpush1.bf16.msra.mxu1 %v4229_v26 }
 0x3a1   :  { %1944 = vmatprep.subr.bf16.mxu0 %v4237_v29  ;;  %1985 = vmatprep.subr.bf16.mxu1 %v4241_v30 }
 0x3a4   :  { %1945 = vmatpush1.bf16.msra.mxu0 %v4235_v62  ;;  %1986 = vmatpush1.bf16.msra.mxu1 %v4239_v8 }
 0x3a5   :  { %1946 = vmatprep.subr.bf16.mxu0 %v4243_v12  ;;  %1987 = vmatprep.subr.bf16.mxu1 %v4246_v44 }
 0x3a8   :  { %1947 = vmatpush1.bf16.msra.mxu0 %v4251_v11  ;;  %1988 = vmatpush1.bf16.msra.mxu1 %v4253_v23 }
 0x3a9   :  { %1948 = vmatprep.subr.bf16.mxu0 %v4257_v31  ;;  %1989 = vmatprep.subr.bf16.mxu1 %v4259_v7 }
 0x3ac   :  { %1949 = vmatpush1.bf16.msra.mxu0 %v4263_v9  ;;  %1990 = vmatpush1.bf16.msra.mxu1 %v4265_v36 }
 0x3ad   :  { %2238 = vmatprep.subr.bf16.mxu0 %v4175_v6  ;;  %2279 = vmatprep.subr.bf16.mxu1 %v4177_v10 }
 0x461   :  { %v1664_v37 = vpop.f32.mrb[28].mxu0  ;;  %v1705_v38 = vpop.f32.mrb[28].mxu1 }
 0x462   :  { %v1717_v40 = vadd.f32 %v1664_v37, %v4493_v39  ;;  %v1719_v42 = vadd.f32 %v1705_v38, %v4494_v41  ;;  %v1666_v43 = vpop.f32.mrb[29].mxu0  ;;  %v1707_v45 = vpop.f32.mrb[29].mxu1 }
 0x463   :  { %v1718_v47 = vadd.f32 %v1666_v43, %v4495_v46  ;;  %v1720_v49 = vadd.f32 %v1707_v45, %v4496_v48  ;;  %v1668_v50 = vpop.f32.mrb[30].mxu0  ;;  %v1709_v51 = vpop.f32.mrb[30].mxu1  ;;  %v4497_v43 = vld [vmem:[#allocation28_spill] sm:$0xff]  ;;  %v4498_v46 = vld [vmem:[#allocation29_spill] sm:$0xff] }
 0x464   :  { %v1721_v52 = vmul.f32 0.5, %v1717_v40  ;;  %v1669_v54 = vpop.f32.mrb[31].mxu0  ;;  %v1710_v55 = vpop.f32.mrb[31].mxu1  ;;  %v1723_v57 = vmul.f32 0.5, %v1719_v42  ;;  %v4499_v50 = vld [vmem:[#allocation30_spill] sm:$0xff] }
 0x465   :  { %v1722_v56 = vmul.f32 0.5, %v1718_v47 }
 0x466   :  { %3491 = vtanh.f32 %v1721_v52  ;;  %v4500_v52 = vld [vmem:[#allocation31_spill] sm:$0xff] }
 0x467   :  { %3493 = vtanh.f32 %v1722_v56 }
 0x468   :  { %3495 = vtanh.f32 %v1720_v49 }
 0x469   :  { %3497 = vtanh.f32 %v1723_v57 }
 0x470   :  { %v3492_v58 = vpop.eup %3491 }
 0x471   :  { %v1727_v59 = vmul.f32 0.5, %v3492_v58  ;;  %v3494_v60 = vpop.eup %3493 }
 0x472   :  { %v1728_v63 = vmul.f32 0.5, %v3494_v60  ;;  %v3496_v2 = vpop.eup %3495 }
 0x473   :  { %v1730_v61 = vadd.f32 0.5, %v1727_v59  ;;  %v3498_v53 = vpop.eup %3497 }
 0x474   :  { %v1731_v3 = vadd.f32 0.5, %v1728_v63  ;;  %v1729_v37 = vmul.f32 0.5, %v3498_v53 }
 0x475   :  { %v1735_v4 = vmul.f32 %v3496_v2, %v1730_v61 }
 0x476   :  { %v1734_v5 = vmul.f32 %v1731_v3, %v4170_v1  ;;  %v1732_v38 = vadd.f32 0.5, %v1729_v37 }
 0x478   :  { %v4278_v35 = vadd.f32 %v1735_v4, %v1734_v5 }
 0x47a   :  { %3499 = vtanh.f32 %v4278_v35 }
 0x484   :  { %v3500_v39 = vpop.eup %3499 }
 0x485   :  { %v1738_v40 = vmul.f32 %v3500_v39, %v1732_v38 }
 0x487   :  { %v1739_v41 = vpack.c.bf16 %v1738_v40, %v1738_v40 }
 0x489   :  { %1741 = vst [vmem:[#allocation14 + $0xc] sm:$0xf] %v1739_v41  ;;  %1967 = vmatmul.mubr.bf16.vlgmr.msra.gmra.mrb[32].mxu0 %v1739_v41  ;;  %2008 = vmatmul.mubr.bf16.vlgmr.msra.gmra.mrb[32].mxu1 %v1739_v41 }
 0x48a   :  { %2239 = vmatpush1.bf16.msra.mxu0 %v4179_v13  ;;  %2280 = vmatpush1.bf16.msra.mxu1 %v4181_v24 }
 0x48b   :  { %2240 = vmatprep.subr.bf16.mxu0 %v4187_v32  ;;  %2281 = vmatprep.subr.bf16.mxu1 %v4189_v16 }
 0x48c   :  { %2270 = vmatprep.mubr.bf16.mxu0 %v4491_v14  ;;  %2311 = vmatprep.mubr.bf16.mxu1 %v4491_v14 }
 0x48e   :  { %2241 = vmatpush1.bf16.msra.mxu0 %v4191_v15  ;;  %2282 = vmatpush1.bf16.msra.mxu1 %v4193_v17 }
 0x48f   :  { %2242 = vmatprep.subr.bf16.mxu0 %v4199_v18  ;;  %2283 = vmatprep.subr.bf16.mxu1 %v4201_v19 }
 0x492   :  { %2243 = vmatpush1.bf16.msra.mxu0 %v4203_v20  ;;  %2284 = vmatpush1.bf16.msra.mxu1 %v4205_v0 }
 0x493   :  { %2244 = vmatprep.subr.bf16.mxu0 %v4211_v21  ;;  %2285 = vmatprep.subr.bf16.mxu1 %v4213_v33 }
 0x496   :  { %2245 = vmatpush1.bf16.msra.mxu0 %v4215_v34  ;;  %2286 = vmatpush1.bf16.msra.mxu1 %v4217_v22 }
 0x497   :  { %2246 = vmatprep.subr.bf16.mxu0 %v4223_v25  ;;  %2287 = vmatprep.subr.bf16.mxu1 %v4225_v28 }
 0x49a   :  { %2247 = vmatpush1.bf16.msra.mxu0 %v4227_v27  ;;  %2288 = vmatpush1.bf16.msra.mxu1 %v4229_v26 }
 0x49b   :  { %2248 = vmatprep.subr.bf16.mxu0 %v4237_v29  ;;  %2289 = vmatprep.subr.bf16.mxu1 %v4241_v30 }
 0x49e   :  { %2249 = vmatpush1.bf16.msra.mxu0 %v4235_v62  ;;  %2290 = vmatpush1.bf16.msra.mxu1 %v4239_v8 }
 0x49f   :  { %2250 = vmatprep.subr.bf16.mxu0 %v4243_v12  ;;  %2291 = vmatprep.subr.bf16.mxu1 %v4246_v44 }
 0x4a2   :  { %2251 = vmatpush1.bf16.msra.mxu0 %v4251_v11  ;;  %2292 = vmatpush1.bf16.msra.mxu1 %v4253_v23 }
 0x4a3   :  { %2252 = vmatprep.subr.bf16.mxu0 %v4257_v31  ;;  %2293 = vmatprep.subr.bf16.mxu1 %v4259_v7 }
 0x4a6   :  { %2253 = vmatpush1.bf16.msra.mxu0 %v4263_v9  ;;  %2294 = vmatpush1.bf16.msra.mxu1 %v4265_v36 }
 0x4a7   :  { %2542 = vmatprep.subr.bf16.mxu0 %v4175_v6  ;;  %2583 = vmatprep.subr.bf16.mxu1 %v4177_v10 }
 0x55c   :  { %v1968_v1 = vpop.f32.mrb[32].mxu0  ;;  %v2009_v42 = vpop.f32.mrb[32].mxu1 }
 0x55d   :  { %v2021_v45 = vadd.f32 %v1968_v1, %v4497_v43  ;;  %v2023_v47 = vadd.f32 %v2009_v42, %v4498_v46  ;;  %v1970_v48 = vpop.f32.mrb[33].mxu0  ;;  %v2011_v49 = vpop.f32.mrb[33].mxu1 }
 0x55e   :  { %v2022_v51 = vadd.f32 %v1970_v48, %v4499_v50  ;;  %v2024_v54 = vadd.f32 %v2011_v49, %v4500_v52  ;;  %v1972_v55 = vpop.f32.mrb[34].mxu0  ;;  %v2013_v56 = vpop.f32.mrb[34].mxu1  ;;  %v4501_v48 = vld [vmem:[#allocation32_spill] sm:$0xff]  ;;  %v4502_v50 = vld [vmem:[#allocation33_spill] sm:$0xff] }
 0x55f   :  { %v2025_v57 = vmul.f32 0.5, %v2021_v45  ;;  %v1973_v58 = vpop.f32.mrb[35].mxu0  ;;  %v2014_v59 = vpop.f32.mrb[35].mxu1  ;;  %v2027_v61 = vmul.f32 0.5, %v2023_v47  ;;  %v4503_v55 = vld [vmem:[#allocation34_spill] sm:$0xff] }
 0x560   :  { %v2026_v60 = vmul.f32 0.5, %v2022_v51 }
 0x561   :  { %3501 = vtanh.f32 %v2025_v57  ;;  %v4504_v57 = vld [vmem:[#allocation35_spill] sm:$0xff] }
 0x562   :  { %3503 = vtanh.f32 %v2026_v60 }
 0x563   :  { %3505 = vtanh.f32 %v2024_v54 }
 0x564   :  { %3507 = vtanh.f32 %v2027_v61 }
 0x56b   :  { %v3502_v63 = vpop.eup %3501 }
 0x56c   :  { %v2031_v2 = vmul.f32 0.5, %v3502_v63  ;;  %v3504_v3 = vpop.eup %3503 }
 0x56d   :  { %v2032_v5 = vmul.f32 0.5, %v3504_v3  ;;  %v3506_v53 = vpop.eup %3505 }
 0x56e   :  { %v2034_v4 = vadd.f32 0.5, %v2031_v2  ;;  %v3508_v41 = vpop.eup %3507 }
 0x56f   :  { %v2035_v37 = vadd.f32 0.5, %v2032_v5  ;;  %v2033_v1 = vmul.f32 0.5, %v3508_v41 }
 0x570   :  { %v2039_v38 = vmul.f32 %v3506_v53, %v2034_v4 }
 0x571   :  { %v2038_v39 = vmul.f32 %v2035_v37, %v4278_v35  ;;  %v2036_v42 = vadd.f32 0.5, %v2033_v1 }
 0x573   :  { %v4320_v40 = vadd.f32 %v2039_v38, %v2038_v39 }
 0x575   :  { %3509 = vtanh.f32 %v4320_v40 }
 0x57f   :  { %v3510_v43 = vpop.eup %3509 }
 0x580   :  { %v2042_v45 = vmul.f32 %v3510_v43, %v2036_v42 }
 0x582   :  { %v2043_v46 = vpack.c.bf16 %v2042_v45, %v2042_v45 }
 0x584   :  { %2045 = vst [vmem:[#allocation14 + $0x10] sm:$0xf] %v2043_v46  ;;  %2271 = vmatmul.mubr.bf16.vlgmr.msra.gmra.mrb[36].mxu0 %v2043_v46  ;;  %2312 = vmatmul.mubr.bf16.vlgmr.msra.gmra.mrb[36].mxu1 %v2043_v46 }
 0x585   :  { %2543 = vmatpush1.bf16.msra.mxu0 %v4179_v13  ;;  %2584 = vmatpush1.bf16.msra.mxu1 %v4181_v24 }
 0x586   :  { %2544 = vmatprep.subr.bf16.mxu0 %v4187_v32  ;;  %2585 = vmatprep.subr.bf16.mxu1 %v4189_v16 }
 0x587   :  { %2574 = vmatprep.mubr.bf16.mxu0 %v4491_v14  ;;  %2615 = vmatprep.mubr.bf16.mxu1 %v4491_v14 }
 0x589   :  { %2545 = vmatpush1.bf16.msra.mxu0 %v4191_v15  ;;  %2586 = vmatpush1.bf16.msra.mxu1 %v4193_v17 }
 0x58a   :  { %2546 = vmatprep.subr.bf16.mxu0 %v4199_v18  ;;  %2587 = vmatprep.subr.bf16.mxu1 %v4201_v19 }
 0x58d   :  { %2547 = vmatpush1.bf16.msra.mxu0 %v4203_v20  ;;  %2588 = vmatpush1.bf16.msra.mxu1 %v4205_v0 }
 0x58e   :  { %2548 = vmatprep.subr.bf16.mxu0 %v4211_v21  ;;  %2589 = vmatprep.subr.bf16.mxu1 %v4213_v33 }
 0x591   :  { %2549 = vmatpush1.bf16.msra.mxu0 %v4215_v34  ;;  %2590 = vmatpush1.bf16.msra.mxu1 %v4217_v22 }
 0x592   :  { %2550 = vmatprep.subr.bf16.mxu0 %v4223_v25  ;;  %2591 = vmatprep.subr.bf16.mxu1 %v4225_v28 }
 0x595   :  { %2551 = vmatpush1.bf16.msra.mxu0 %v4227_v27  ;;  %2592 = vmatpush1.bf16.msra.mxu1 %v4229_v26 }
 0x596   :  { %2552 = vmatprep.subr.bf16.mxu0 %v4237_v29  ;;  %2593 = vmatprep.subr.bf16.mxu1 %v4241_v30 }
 0x599   :  { %2553 = vmatpush1.bf16.msra.mxu0 %v4235_v62  ;;  %2594 = vmatpush1.bf16.msra.mxu1 %v4239_v8 }
 0x59a   :  { %2554 = vmatprep.subr.bf16.mxu0 %v4243_v12  ;;  %2595 = vmatprep.subr.bf16.mxu1 %v4246_v44 }
 0x59d   :  { %2555 = vmatpush1.bf16.msra.mxu0 %v4251_v11  ;;  %2596 = vmatpush1.bf16.msra.mxu1 %v4253_v23 }
 0x59e   :  { %2556 = vmatprep.subr.bf16.mxu0 %v4257_v31  ;;  %2597 = vmatprep.subr.bf16.mxu1 %v4259_v7 }
 0x5a1   :  { %2557 = vmatpush1.bf16.msra.mxu0 %v4263_v9  ;;  %2598 = vmatpush1.bf16.msra.mxu1 %v4265_v36 }
 0x5a2   :  { %2846 = vmatprep.subr.bf16.mxu0 %v4175_v6  ;;  %2887 = vmatprep.subr.bf16.mxu1 %v4177_v10 }
 0x657   :  { %v2272_v35 = vpop.f32.mrb[36].mxu0  ;;  %v2313_v47 = vpop.f32.mrb[36].mxu1 }
 0x658   :  { %v2325_v49 = vadd.f32 %v2272_v35, %v4501_v48  ;;  %v2327_v51 = vadd.f32 %v2313_v47, %v4502_v50  ;;  %v2274_v52 = vpop.f32.mrb[37].mxu0  ;;  %v2315_v54 = vpop.f32.mrb[37].mxu1 }
 0x659   :  { %v2326_v56 = vadd.f32 %v2274_v52, %v4503_v55  ;;  %v2328_v58 = vadd.f32 %v2315_v54, %v4504_v57  ;;  %v2276_v59 = vpop.f32.mrb[38].mxu0  ;;  %v2317_v60 = vpop.f32.mrb[38].mxu1  ;;  %v4509_v55 = vld [vmem:[#allocation40_spill] sm:$0xff]  ;;  %v4510_v57 = vld [vmem:[#allocation41_spill] sm:$0xff] }
 0x65a   :  { %v2329_v61 = vmul.f32 0.5, %v2325_v49  ;;  %v2277_v63 = vpop.f32.mrb[39].mxu0  ;;  %v2318_v2 = vpop.f32.mrb[39].mxu1  ;;  %v2331_v10 = vmul.f32 0.5, %v2327_v51 }
 0x65b   :  { %v2330_v6 = vmul.f32 0.5, %v2326_v56  ;;  %v4512_v2 = vld [vmem:[#allocation43_spill] sm:$0xff] }
 0x65c   :  { %3511 = vtanh.f32 %v2329_v61  ;;  %v4511_v61 = vld [vmem:[#allocation42_spill] sm:$0xff] }
 0x65d   :  { %3513 = vtanh.f32 %v2330_v6 }
 0x65e   :  { %3515 = vtanh.f32 %v2328_v58 }
 0x65f   :  { %3517 = vtanh.f32 %v2331_v10 }
 0x666   :  { %v3512_v3 = vpop.eup %3511 }
 0x667   :  { %v2335_v4 = vmul.f32 0.5, %v3512_v3  ;;  %v3514_v5 = vpop.eup %3513 }
 0x668   :  { %v2336_v37 = vmul.f32 0.5, %v3514_v5  ;;  %v3516_v38 = vpop.eup %3515 }
 0x669   :  { %v2338_v53 = vadd.f32 0.5, %v2335_v4  ;;  %v3518_v43 = vpop.eup %3517 }
 0x66a   :  { %v2339_v39 = vadd.f32 0.5, %v2336_v37  ;;  %v2337_v45 = vmul.f32 0.5, %v3518_v43 }
 0x66b   :  { %v2343_v41 = vmul.f32 %v3516_v38, %v2338_v53 }
 0x66c   :  { %v2342_v1 = vmul.f32 %v2339_v39, %v4320_v40  ;;  %v2340_v46 = vadd.f32 0.5, %v2337_v45 }
 0x66e   :  { %v4362_v42 = vadd.f32 %v2343_v41, %v2342_v1 }
 0x670   :  { %3519 = vtanh.f32 %v4362_v42 }
 0x67a   :  { %v3520_v35 = vpop.eup %3519 }
 0x67b   :  { %v2346_v47 = vmul.f32 %v3520_v35, %v2340_v46 }
 0x67d   :  { %v2347_v48 = vpack.c.bf16 %v2346_v47, %v2346_v47 }
 0x67f   :  { %2349 = vst [vmem:[#allocation14 + $0x14] sm:$0xf] %v2347_v48  ;;  %2575 = vmatmul.mubr.bf16.vlgmr.msra.gmra.mrb[40].mxu0 %v2347_v48  ;;  %2616 = vmatmul.mubr.bf16.vlgmr.msra.gmra.mrb[40].mxu1 %v2347_v48 }
 0x680   :  { %2847 = vmatpush1.bf16.msra.mxu0 %v4179_v13  ;;  %2888 = vmatpush1.bf16.msra.mxu1 %v4181_v24  ;;  %v4505_v24 = vld [vmem:[#allocation36_spill] sm:$0xff] }
 0x681   :  { %2848 = vmatprep.subr.bf16.mxu0 %v4187_v32  ;;  %2889 = vmatprep.subr.bf16.mxu1 %v4189_v16  ;;  %v4506_v16 = vld [vmem:[#allocation37_spill] sm:$0xff] }
 0x682   :  { %2878 = vmatprep.mubr.bf16.mxu0 %v4491_v14  ;;  %2919 = vmatprep.mubr.bf16.mxu1 %v4491_v14 }
 0x684   :  { %2849 = vmatpush1.bf16.msra.mxu0 %v4191_v15  ;;  %2890 = vmatpush1.bf16.msra.mxu1 %v4193_v17 }
 0x685   :  { %2850 = vmatprep.subr.bf16.mxu0 %v4199_v18  ;;  %2891 = vmatprep.subr.bf16.mxu1 %v4201_v19  ;;  %v4507_v19 = vld [vmem:[#allocation38_spill] sm:$0xff] }
 0x688   :  { %2851 = vmatpush1.bf16.msra.mxu0 %v4203_v20  ;;  %2892 = vmatpush1.bf16.msra.mxu1 %v4205_v0  ;;  %v4508_v0 = vld [vmem:[#allocation39_spill] sm:$0xff] }
 0x689   :  { %2852 = vmatprep.subr.bf16.mxu0 %v4211_v21  ;;  %2893 = vmatprep.subr.bf16.mxu1 %v4213_v33 }
 0x68c   :  { %2853 = vmatpush1.bf16.msra.mxu0 %v4215_v34  ;;  %2894 = vmatpush1.bf16.msra.mxu1 %v4217_v22 }
 0x68d   :  { %2854 = vmatprep.subr.bf16.mxu0 %v4223_v25  ;;  %2895 = vmatprep.subr.bf16.mxu1 %v4225_v28 }
 0x690   :  { %2855 = vmatpush1.bf16.msra.mxu0 %v4227_v27  ;;  %2896 = vmatpush1.bf16.msra.mxu1 %v4229_v26 }
 0x691   :  { %2856 = vmatprep.subr.bf16.mxu0 %v4237_v29  ;;  %2897 = vmatprep.subr.bf16.mxu1 %v4241_v30 }
 0x694   :  { %2857 = vmatpush1.bf16.msra.mxu0 %v4235_v62  ;;  %2898 = vmatpush1.bf16.msra.mxu1 %v4239_v8 }
 0x695   :  { %2858 = vmatprep.subr.bf16.mxu0 %v4243_v12  ;;  %2899 = vmatprep.subr.bf16.mxu1 %v4246_v44 }
 0x698   :  { %2859 = vmatpush1.bf16.msra.mxu0 %v4251_v11  ;;  %2900 = vmatpush1.bf16.msra.mxu1 %v4253_v23 }
 0x699   :  { %2860 = vmatprep.subr.bf16.mxu0 %v4257_v31  ;;  %2901 = vmatprep.subr.bf16.mxu1 %v4259_v7 }
 0x69c   :  { %2861 = vmatpush1.bf16.msra.mxu0 %v4263_v9  ;;  %2902 = vmatpush1.bf16.msra.mxu1 %v4265_v36 }
 0x752   :  { %v2576_v14 = vpop.f32.mrb[40].mxu0  ;;  %v2617_v13 = vpop.f32.mrb[40].mxu1 }
 0x753   :  { %v2629_v32 = vadd.f32 %v2576_v14, %v4505_v24  ;;  %v2631_v15 = vadd.f32 %v2617_v13, %v4506_v16  ;;  %v2578_v17 = vpop.f32.mrb[41].mxu0  ;;  %v2619_v18 = vpop.f32.mrb[41].mxu1 }
 0x754   :  { %v2630_v20 = vadd.f32 %v2578_v17, %v4507_v19  ;;  %v2632_v21 = vadd.f32 %v2619_v18, %v4508_v0  ;;  %v2580_v33 = vpop.f32.mrb[42].mxu0  ;;  %v2621_v34 = vpop.f32.mrb[42].mxu1 }
 0x755   :  { %v2633_v22 = vmul.f32 0.5, %v2629_v32  ;;  %v2581_v25 = vpop.f32.mrb[43].mxu0  ;;  %v2622_v28 = vpop.f32.mrb[43].mxu1  ;;  %v2635_v26 = vmul.f32 0.5, %v2631_v15 }
 0x756   :  { %v2634_v27 = vmul.f32 0.5, %v2630_v20 }
 0x757   :  { %3521 = vtanh.f32 %v2633_v22 }
 0x758   :  { %3523 = vtanh.f32 %v2634_v27 }
 0x759   :  { %3525 = vtanh.f32 %v2632_v21 }
 0x75a   :  { %3527 = vtanh.f32 %v2635_v26 }
 0x761   :  { %v3522_v62 = vpop.eup %3521 }
 0x762   :  { %v2639_v29 = vmul.f32 0.5, %v3522_v62  ;;  %v3524_v8 = vpop.eup %3523 }
 0x763   :  { %v2640_v12 = vmul.f32 0.5, %v3524_v8  ;;  %v3526_v44 = vpop.eup %3525 }
 0x764   :  { %v2642_v30 = vadd.f32 0.5, %v2639_v29  ;;  %v3528_v9 = vpop.eup %3527 }
 0x765   :  { %v2643_v11 = vadd.f32 0.5, %v2640_v12  ;;  %v2641_v36 = vmul.f32 0.5, %v3528_v9 }
 0x766   :  { %v2647_v23 = vmul.f32 %v3526_v44, %v2642_v30 }
 0x767   :  { %v2646_v31 = vmul.f32 %v2643_v11, %v4362_v42  ;;  %v2644_v40 = vadd.f32 0.5, %v2641_v36 }
 0x769   :  { %v2648_v7 = vadd.f32 %v2647_v23, %v2646_v31 }
 0x76b   :  { %3529 = vtanh.f32 %v2648_v7 }
 0x775   :  { %v3530_v49 = vpop.eup %3529 }
 0x776   :  { %v2650_v50 = vmul.f32 %v3530_v49, %v2644_v40 }
 0x778   :  { %v2651_v51 = vpack.c.bf16 %v2650_v50, %v2650_v50 }
 0x77a   :  { %2653 = vst [vmem:[#allocation14 + $0x18] sm:$0xf] %v2651_v51  ;;  %2879 = vmatmul.mubr.bf16.vlgmr.msra.gmra.mrb[44].mxu0 %v2651_v51  ;;  %2920 = vmatmul.mubr.bf16.vlgmr.msra.gmra.mrb[44].mxu1 %v2651_v51 }
 0x84d   :  { %v2880_v52 = vpop.f32.mrb[44].mxu0  ;;  %v2921_v54 = vpop.f32.mrb[44].mxu1 }
 0x84e   :  { %v2933_v56 = vadd.f32 %v2880_v52, %v4509_v55  ;;  %v2935_v58 = vadd.f32 %v2921_v54, %v4510_v57  ;;  %v2882_v59 = vpop.f32.mrb[45].mxu0  ;;  %v2923_v60 = vpop.f32.mrb[45].mxu1 }
 0x84f   :  { %v2934_v63 = vadd.f32 %v2882_v59, %v4511_v61  ;;  %v2936_v6 = vadd.f32 %v2923_v60, %v4512_v2  ;;  %v2884_v10 = vpop.f32.mrb[46].mxu0  ;;  %v2925_v3 = vpop.f32.mrb[46].mxu1 }
 0x850   :  { %v2937_v4 = vmul.f32 0.5, %v2933_v56  ;;  %v2885_v5 = vpop.f32.mrb[47].mxu0  ;;  %v2926_v53 = vpop.f32.mrb[47].mxu1  ;;  %v2939_v38 = vmul.f32 0.5, %v2935_v58 }
 0x851   :  { %v2938_v37 = vmul.f32 0.5, %v2934_v63 }
 0x852   :  { %3531 = vtanh.f32 %v2937_v4 }
 0x853   :  { %3533 = vtanh.f32 %v2938_v37 }
 0x854   :  { %3535 = vtanh.f32 %v2936_v6 }
 0x855   :  { %3537 = vtanh.f32 %v2939_v38 }
 0x85c   :  { %v3532_v39 = vpop.eup %3531 }
 0x85d   :  { %v2943_v41 = vmul.f32 0.5, %v3532_v39  ;;  %v3534_v1 = vpop.eup %3533 }
 0x85e   :  { %v2944_v43 = vmul.f32 0.5, %v3534_v1  ;;  %v3536_v45 = vpop.eup %3535 }
 0x85f   :  { %v2946_v42 = vadd.f32 0.5, %v2943_v41  ;;  %v3538_v14 = vpop.eup %3537 }
 0x860   :  { %v2947_v46 = vadd.f32 0.5, %v2944_v43  ;;  %v2945_v13 = vmul.f32 0.5, %v3538_v14 }
 0x861   :  { %v2951_v35 = vmul.f32 %v3536_v45, %v2946_v42 }
 0x862   :  { %v2950_v47 = vmul.f32 %v2947_v46, %v2648_v7  ;;  %v2948_v24 = vadd.f32 0.5, %v2945_v13 }
 0x864   :  { %v2952_v48 = vadd.f32 %v2951_v35, %v2950_v47 }
 0x866   :  { %2961 = vst [vmem:[#allocation17] sm:$0xff] %v2952_v48  ;;  %3539 = vtanh.f32 %v2952_v48 }
 0x870   :  { %v3540_v32 = vpop.eup %3539 }
 0x871   :  { %v2954_v16 = vmul.f32 %v3540_v32, %v2948_v24 }
 0x873   :  { %v2955_v15 = vpack.c.bf16 %v2954_v16, %v2954_v16  ;;  %2960 = vst [vmem:[#allocation15] sm:$0xff] %v2954_v16 }
 0x874   :  { %3662 = shalt.err (!%p3659_p2)
}
 0x875   :  { %s3663_s11 = scalar_lea.hbm %s4466_s7, 128 }
 0x876   :  { %p3664_p3 = scmp.ne.s32.totalorder %s4466_s7, %s3663_s11  ;;  %p3667_p4 = scmp.lt.u32.totalorder %s3663_s11, %s4466_s7 }
 0x878   :  { %p3669_p5 = pnand %p3667_p4, %p3664_p3 }
 0x87a   :  { %3672 = shalt.err (!%p3669_p5)
}
 0x87b   :  { %2983 = dma.vmem_to_hbm [thread:$0]  %s2981_s27, 128, %s4466_s7, [#allocation16]   ;;  %2957 = vst [vmem:[#allocation14 + $0x1c] sm:$0xf] %v2955_v15 }
 0x87c   :  { %s3673_s16 = scalar_lea.vmem %s4406_s24, 128  ;;  %p3678_p7 = scmp.lt.s32.totalorder %s4406_s24, %s4406_s24 }
 0x87d   :  { %p3674_p6 = scmp.ne.s32.totalorder %s4406_s24, %s3673_s16  ;;  %p3679_p8 = scmp.lt.s32.totalorder %s3673_s16, %s3673_s16 }
 0x87f   :  { %p3680_p9 = por %p3679_p8, %p3678_p7 }
 0x881   :  { %p3681_p10 = pnand %p3680_p9, %p3674_p6 }
 0x883   :  { %3684 = shalt.err (!%p3681_p10)
}
 0x884   :  { %s3685_s19 = scalar_lea.hbm %s4467_s8, 128 }
 0x885   :  { %p3686_p11 = scmp.ne.s32.totalorder %s4467_s8, %s3685_s19  ;;  %p3689_p12 = scmp.lt.u32.totalorder %s3685_s19, %s4467_s8 }
 0x887   :  { %p3691_p13 = pnand %p3689_p12, %p3686_p11 }
 0x889   :  { %3694 = shalt.err (!%p3691_p13)
}
 0x88a   :  { %2993 = dma.vmem_to_hbm [thread:$0]  %s4406_s24, 128, %s4467_s8, [#allocation16]  }
 0x88b   :  { %s3695_s1 = scalar_lea.vmem %s4408_s26, 512  ;;  %p3700_p1 = scmp.lt.s32.totalorder %s4408_s26, %s4408_s26 }
 0x88c   :  { %p3696_p0 = scmp.ne.s32.totalorder %s4408_s26, %s3695_s1  ;;  %p3701_p2 = scmp.lt.s32.totalorder %s3695_s1, %s3695_s1 }
 0x88e   :  { %p3702_p3 = por %p3701_p2, %p3700_p1 }
 0x890   :  { %p3703_p4 = pnand %p3702_p3, %p3696_p0 }
 0x892   :  { %3706 = shalt.err (!%p3703_p4)
}
 0x893   :  { %s3707_s23 = scalar_lea.hbm %s4465_s6, 512 }
 0x894   :  { %p3708_p5 = scmp.ne.s32.totalorder %s4465_s6, %s3707_s23  ;;  %p3711_p6 = scmp.lt.u32.totalorder %s3707_s23, %s4465_s6 }
 0x896   :  { %p3713_p7 = pnand %p3711_p6, %p3708_p5 }
 0x898   :  { %3716 = shalt.err (!%p3713_p7)
}
 0x899   :  { %2973 = dma.vmem_to_hbm [thread:$0]  %s4408_s26, 512, %s4465_s6, [#allocation7], %s3732_s3, %s3732_s3, %s3733_s30  }
 0x89a   :  { %3723 = dma.done.wait [#allocation7], 512  }
 0x89b   :  { %3724 = vsyncadd [#allocation7], 4294966784 }
 0x89c   :  { %3725 = dma.done.wait [#allocation16], 256  }
 0x89d   :  { %3726 = vsyncadd [#allocation16], 4294967040 }
 0x89e   :  { %3003 = vsyncpa [#allocation6], 1 }
 0x89f   :  { %3004 = vsyncpa [#allocation9], 1 }
 0x8a0   :  { %3005 = vsyncpa [#allocation12], 1 }
 0x8a1   :  { %3006 = vsyncpa [#allocation7], 1 }
 0x8a2   :  { %3007 = vsyncpa [#allocation16], 1 }

</bundles_post_ra>
